<compile_context>
chip_gen: v7x
topology: tpu7x:2x2x1
jax: 0.10.0
libtpu: 0.0.40
codegen_flags: <defaults>
</compile_context>

<pallas_src>
import functools

import jax
import jax.numpy as jnp
from jax.experimental import pallas as pl
from jax.experimental.pallas import tpu as pltpu

NEG_SLOPE = 0.2
BN_EPS = 1e-5


# ---------------------------------------------------------------------------
# Helpers
# ---------------------------------------------------------------------------
def _round_up(x, m):
    return (x + m - 1) // m * m


@functools.lru_cache(maxsize=1)
def _vmem_limit_bytes():
    """Generation-aware scoped-VMEM limit: half of physical, capped at 64MiB."""
    try:
        cap = int(pltpu.get_tpu_info().vmem_capacity_bytes)
    except Exception:  # older jax / no device info -> conservative default
        cap = 64 * 1024 * 1024
    return int(min(cap // 2, 64 * 1024 * 1024))


# ---------------------------------------------------------------------------
# Pallas kernel 1: tiled matmul (conv-as-matmul) + bias + fused activation
# ---------------------------------------------------------------------------
def _matmul_kernel(a_ref, b_ref, bias_ref, o_ref, acc_ref, *, act):
    k = pl.program_id(2)

    @pl.when(k == 0)
    def _init():
        acc_ref[...] = jnp.zeros_like(acc_ref)

    acc_ref[...] += jnp.dot(
        a_ref[...], b_ref[...], preferred_element_type=jnp.float32
    )

    @pl.when(k == pl.num_programs(2) - 1)
    def _finalize():
        r = acc_ref[...] + bias_ref[...]
        if act == "lrelu":
            r = jnp.where(r >= 0, r, NEG_SLOPE * r)
        elif act == "sigmoid":
            r = jax.nn.sigmoid(r)
        o_ref[...] = r.astype(o_ref.dtype)


def matmul_bias_act(a, b_bf16, bias2d, act):
    """Tiled Pallas matmul: a(M,K) @ b(Kpad,Npad) + bias, fused activation.

    `a` is f32 im2col data (unpadded); `b_bf16`/`bias2d` are pre-padded
    (K->Kpad, Cout->Npad, multiples of 128). Returns (Mpad, Npad) f32;
    caller slices back to (M, Cout).
    """
    M, K = a.shape
    Kpad, Npad = b_bf16.shape
    assert K <= Kpad and bias2d.shape == (1, Npad)

    # Tile sizes (M aligned to 8 sublanes, N/K aligned to 128 lanes).
    tm = min(256, _round_up(M, 8))
    Mpad = _round_up(M, tm)
    tn = 256 if Npad % 256 == 0 else 128
    if Kpad <= 512:
        tk = Kpad
    else:
        tk = 512 if Kpad % 512 == 0 else (256 if Kpad % 256 == 0 else 128)

    # Zero-pad the activation matrix and cast MXU inputs to bf16
    # (accumulation stays f32 inside the kernel).
    a_p = jnp.pad(a, ((0, Mpad - M), (0, Kpad - K))).astype(jnp.bfloat16)

    grid = (Mpad // tm, Npad // tn, Kpad // tk)
    kernel = functools.partial(_matmul_kernel, act=act)
    cost = pl.CostEstimate(
        flops=2 * Mpad * Npad * Kpad,
        transcendentals=Mpad * Npad if act == "sigmoid" else 0,
        bytes_accessed=a_p.size * 2 + b_bf16.size * 2
        + bias2d.size * 4 + Mpad * Npad * 4,
    )
    return pl.pallas_call(
        kernel,
        out_shape=jax.ShapeDtypeStruct((Mpad, Npad), jnp.float32),
        grid=grid,
        in_specs=[
            pl.BlockSpec((tm, tk), lambda i, j, k: (i, k)),
            pl.BlockSpec((tk, tn), lambda i, j, k: (k, j)),
            pl.BlockSpec((1, tn), lambda i, j, k: (0, j)),
        ],
        out_specs=pl.BlockSpec((tm, tn), lambda i, j, k: (i, j)),
        scratch_shapes=[pltpu.VMEM((tm, tn), jnp.float32)],
        compiler_params=pltpu.CompilerParams(
            dimension_semantics=("parallel", "parallel", "arbitrary"),
            vmem_limit_bytes=_vmem_limit_bytes(),
        ),
        cost_estimate=cost,
    )(a_p, b_bf16, bias2d)


# ---------------------------------------------------------------------------
# Pallas kernels 2+3: training-mode BatchNorm2d + LeakyReLU, tiled over M
# ---------------------------------------------------------------------------
def _channel_stats_kernel(x_ref, sum_ref, sq_ref, *, m_real):
    i = pl.program_id(0)

    @pl.when(i == 0)
    def _init():
        sum_ref[...] = jnp.zeros_like(sum_ref)
        sq_ref[...] = jnp.zeros_like(sq_ref)

    tm = x_ref.shape[0]
    # Mask out padded rows (they hold conv-bias garbage, not zeros).
    rows = jax.lax.broadcasted_iota(jnp.int32, (tm, 1), 0) + i * tm
    mask = (rows < m_real).astype(jnp.float32)
    x = x_ref[...] * mask
    sum_ref[...] += jnp.sum(x, axis=0, keepdims=True)
    sq_ref[...] += jnp.sum(x * x, axis=0, keepdims=True)


def _scale_shift_lrelu_kernel(x_ref, scale_ref, shift_ref, o_ref):
    y = x_ref[...] * scale_ref[...] + shift_ref[...]
    o_ref[...] = jnp.where(y >= 0, y, NEG_SLOPE * y)


def bn_lrelu(x_pad, m_real, gamma, beta):
    """Training-mode BN (batch stats over the first m_real rows) + LeakyReLU.

    x_pad: (Mpad, C) f32 activation (rows >= m_real are padding).
    """
    Mpad, C = x_pad.shape
    tm = min(256, Mpad)
    assert Mpad % tm == 0
    grid = (Mpad // tm,)

    stats_kernel = functools.partial(_channel_stats_kernel, m_real=m_real)
    s, sq = pl.pallas_call(
        stats_kernel,
        out_shape=(
            jax.ShapeDtypeStruct((1, C), jnp.float32),
            jax.ShapeDtypeStruct((1, C), jnp.float32),
        ),
        grid=grid,
        in_specs=[pl.BlockSpec((tm, C), lambda i: (i, 0))],
        out_specs=(
            pl.BlockSpec((1, C), lambda i: (0, 0)),
            pl.BlockSpec((1, C), lambda i: (0, 0)),
        ),
        compiler_params=pltpu.CompilerParams(
            dimension_semantics=("arbitrary",),
            vmem_limit_bytes=_vmem_limit_bytes(),
        ),
        cost_estimate=pl.CostEstimate(
            flops=4 * Mpad * C, transcendentals=0,
            bytes_accessed=Mpad * C * 4 + 2 * C * 4,
        ),
    )(x_pad)

    # Tiny per-channel math in plain JAX (biased variance == training BN).
    mean = s / m_real
    var = sq / m_real - mean * mean
    scale = gamma.reshape(1, C) * jax.lax.rsqrt(var + BN_EPS)
    shift = beta.reshape(1, C) - mean * scale

    return pl.pallas_call(
        _scale_shift_lrelu_kernel,
        out_shape=jax.ShapeDtypeStruct((Mpad, C), jnp.float32),
        grid=grid,
        in_specs=[
            pl.BlockSpec((tm, C), lambda i: (i, 0)),
            pl.BlockSpec((1, C), lambda i: (0, 0)),
            pl.BlockSpec((1, C), lambda i: (0, 0)),
        ],
        out_specs=pl.BlockSpec((tm, C), lambda i: (i, 0)),
        compiler_params=pltpu.CompilerParams(
            dimension_semantics=("parallel",),
            vmem_limit_bytes=_vmem_limit_bytes(),
        ),
        cost_estimate=pl.CostEstimate(
            flops=4 * Mpad * C, transcendentals=0,
            bytes_accessed=2 * Mpad * C * 4 + 2 * C * 4,
        ),
    )(x_pad, scale.astype(jnp.float32), shift.astype(jnp.float32))


# ---------------------------------------------------------------------------
# Glue: NHWC im2col + layer plumbing (plain JAX)
# ---------------------------------------------------------------------------
def _im2col_nhwc(x, kh, kw, stride, pad):
    """(N,H,W,C) NHWC -> (N*OH*OW, KH*KW*C) with feature order (kh, kw, cin)."""
    N, H, W, C = x.shape
    xp = jnp.pad(x, ((0, 0), (pad, pad), (pad, pad), (0, 0)))
    OH = (H + 2 * pad - kh) // stride + 1
    OW = (W + 2 * pad - kw) // stride + 1
    cols = []
    for i in range(kh):
        for j in range(kw):
            cols.append(
                xp[:, i : i + OH * stride : stride, j : j + OW * stride : stride, :]
            )
    patches = jnp.concatenate(cols, axis=-1)  # (N, OH, OW, KH*KW*C)
    return patches.reshape(N * OH * OW, kh * kw * C), OH, OW


def preprocess_params(p):
    """One-time weight prep: transpose/pad/bf16-cast matmul operands."""

    def prep(w, b):
        cout, cin, kh, kw = w.shape
        K = cin * kh * kw
        Kpad = _round_up(K, 128)
        Npad = _round_up(cout, 128)
        bmat = w.transpose(2, 3, 1, 0).reshape(K, cout)  # (kh,kw,cin) x cout
        bmat = jnp.pad(bmat, ((0, Kpad - K), (0, Npad - cout))).astype(jnp.bfloat16)
        bias = jnp.pad(b, (0, Npad - cout)).astype(jnp.float32).reshape(1, Npad)
        return {"bmat": bmat, "bias": bias, "cout": cout, "kh": kh, "kw": kw}

    kp = {
        "l1": prep(p["w1"], p["b1"]),
        "l2": prep(p["w2"], p["b2"]),
        "l3": prep(p["w3"], p["b3"]),
        "l4": prep(p["w4"], p["b4"]),
        "l5": prep(p["w5"], p["b5"]),
    }
    for n in ("2", "3", "4"):
        kp["g" + n] = p["g" + n].astype(jnp.float32)
        kp["be" + n] = p["be" + n].astype(jnp.float32)
    return kp


def patchgan_forward(x_nchw, kp):
    x = jnp.transpose(x_nchw, (0, 2, 3, 1))  # single NHWC conversion at entry
    N = x.shape[0]

    def conv(x_nhwc, layer, stride, act):
        L = kp[layer]
        a, OH, OW = _im2col_nhwc(x_nhwc, L["kh"], L["kw"], stride, 1)
        M = a.shape[0]
        out_pad = matmul_bias_act(a, L["bmat"], L["bias"], act)  # (Mpad, Npad)
        return out_pad, M, OH, OW, L["cout"]

    # conv1 + LeakyReLU (fused in matmul kernel)
    h, M, OH, OW, C = conv(x, "l1", 2, "lrelu")
    x = h[:M, :C].reshape(N, OH, OW, C)
    # conv2 + BN + LeakyReLU
    h, M, OH, OW, C = conv(x, "l2", 2, "none")
    h = bn_lrelu(h, M, kp["g2"], kp["be2"])
    x = h[:M, :C].reshape(N, OH, OW, C)
    # conv3 + BN + LeakyReLU
    h, M, OH, OW, C = conv(x, "l3", 2, "none")
    h = bn_lrelu(h, M, kp["g3"], kp["be3"])
    x = h[:M, :C].reshape(N, OH, OW, C)
    # conv4 (stride 1) + BN + LeakyReLU
    h, M, OH, OW, C = conv(x, "l4", 1, "none")
    h = bn_lrelu(h, M, kp["g4"], kp["be4"])
    x = h[:M, :C].reshape(N, OH, OW, C)
    # conv5 (stride 1) + Sigmoid (fused; lane-dense padded Cout, sliced here)
    h, M, OH, OW, C = conv(x, "l5", 1, "sigmoid")
    x = h[:M, :C].reshape(N, OH, OW, C)
    return jnp.transpose(x, (0, 3, 1, 2))  # back to NCHW at the boundary


# ---------------------------------------------------------------------------
# Pure-JAX f32 reference (for correctness check)
# ---------------------------------------------------------------------------
def _conv_ref(x, w, b, stride, pad):
    y = jax.lax.conv_general_dilated(
        x, w, (stride, stride), [(pad, pad), (pad, pad)],
        dimension_numbers=("NCHW", "OIHW", "NCHW"),
        precision=jax.lax.Precision.HIGHEST,
    )
    return y + b[None, :, None, None]


def _bn_lrelu_ref(x, g, be):
    mean = x.mean(axis=(0, 2, 3), keepdims=True)
    var = jnp.square(x - mean).mean(axis=(0, 2, 3), keepdims=True)
    y = (x - mean) * jax.lax.rsqrt(var + BN_EPS)
    y = y * g[None, :, None, None] + be[None, :, None, None]
    return jnp.where(y >= 0, y, NEG_SLOPE * y)


def patchgan_ref(x, p):
    lrelu = lambda v: jnp.where(v >= 0, v, NEG_SLOPE * v)
    x = lrelu(_conv_ref(x, p["w1"], p["b1"], 2, 1))
    x = _bn_lrelu_ref(_conv_ref(x, p["w2"], p["b2"], 2, 1), p["g2"], p["be2"])
    x = _bn_lrelu_ref(_conv_ref(x, p["w3"], p["b3"], 2, 1), p["g3"], p["be3"])
    x = _bn_lrelu_ref(_conv_ref(x, p["w4"], p["b4"], 1, 1), p["g4"], p["be4"])
    x = jax.nn.sigmoid(_conv_ref(x, p["w5"], p["b5"], 1, 1))
    return x


# ---------------------------------------------------------------------------
# Parameter init + driver
# ---------------------------------------------------------------------------
def init_params(key, K=64, in_ch=18, ksize=4):
    def nxt():
        nonlocal key
        key, sub = jax.random.split(key)
        return sub

    def conv_p(cin, cout):
        w = 0.05 * jax.random.normal(nxt(), (cout, cin, ksize, ksize), jnp.float32)
        b = 0.01 * jax.random.normal(nxt(), (cout,), jnp.float32)
        return w, b

    p = {}
    p["w1"], p["b1"] = conv_p(in_ch, K)
    p["w2"], p["b2"] = conv_p(K, K * 2)
    p["w3"], p["b3"] = conv_p(K * 2, K * 4)
    p["w4"], p["b4"] = conv_p(K * 4, K * 8)
    p["w5"], p["b5"] = conv_p(K * 8, 1)
    for name, c in (("2", K * 2), ("3", K * 4), ("4", K * 8)):
        p["g" + name] = 1.0 + 0.1 * jax.random.normal(nxt(), (c,), jnp.float32)
        p["be" + name] = 0.05 * jax.random.normal(nxt(), (c,), jnp.float32)
    return p


if __name__ == "__main__":
    key = jax.random.PRNGKey(0)
    kx, kp_key = jax.random.split(key)

    # Small but valid shapes: 32x32 spatial -> 16 -> 8 -> 4 -> 3 -> 2
    N, Cin, H, W = 2, 18, 32, 32
    x = jax.random.normal(kx, (N, Cin, H, W), jnp.float32)
    params = init_params(kp_key, K=64, in_ch=Cin)
    kparams = preprocess_params(params)  # one-time transpose/pad/bf16 cast

    forward = jax.jit(functools.partial(patchgan_forward, kp=kparams))
    out = jax.block_until_ready(forward(x))
    ref = jax.block_until_ready(patchgan_ref(x, params))

    assert out.shape == (N, 1, 2, 2), out.shape
    assert bool(jnp.isfinite(out).all()), "non-finite output"
    max_err = float(jnp.max(jnp.abs(out - ref)))
    # bf16 MXU inputs with f32 accumulation vs. an f32 (HIGHEST) reference:
    # sigmoid outputs agree to well under 3e-2 absolute.
    assert jnp.allclose(out, ref, atol=3e-2, rtol=3e-2), max_err
    print("KERNEL_OK")
</pallas_src>

<mosaic_0001>
module attributes {stable_mosaic.version = 11 : i64} {
  func.func @_matmul_kernel(%arg0: i32, %arg1: i32, %arg2: i32, %arg3: memref<256x384xbf16, #tpu.memory_space<vmem>>, %arg4: memref<384x128xbf16, #tpu.memory_space<vmem>>, %arg5: memref<1x128xf32, #tpu.memory_space<vmem>>, %arg6: memref<256x128xf32, #tpu.memory_space<vmem>>, %arg7: memref<256x128xf32, #tpu.memory_space<vmem>>) attributes {dimension_semantics = [#tpu.dimension_semantics<parallel>, #tpu.dimension_semantics<parallel>, #tpu.dimension_semantics<arbitrary>], iteration_bounds = array<i64: 2, 1, 1>, scalar_prefetch = 0 : i64, scratch_operands = 1 : i64, tpu.core_type = #tpu.core_type<tc>, window_params = [{transform_indices = @transform_0, window_bounds = array<i64: 256, 384>}, {transform_indices = @transform_1, window_bounds = array<i64: 384, 128>}, {transform_indices = @transform_2, window_bounds = array<i64: 1, 128>}, {transform_indices = @transform_3, window_bounds = array<i64: 256, 128>}]} {
    %c0_i32 = arith.constant 0 : i32
    %0 = arith.cmpi eq, %arg2, %c0_i32 : i32
    %1 = arith.extui %0 : i1 to i32
    %c0_i32_0 = arith.constant 0 : i32
    %2 = arith.cmpi ne, %1, %c0_i32_0 : i32
    scf.if %2 {
      %cst_10 = arith.constant 0.000000e+00 : f32
      %12 = vector.broadcast %cst_10 : f32 to vector<256x128xf32>
      %c0_11 = arith.constant 0 : index
      %c0_12 = arith.constant 0 : index
      %13 = vector.load %arg7[%c0_11, %c0_12] : memref<256x128xf32, #tpu.memory_space<vmem>>, vector<256x128xf32>
      tpu.vector_store %arg7[%c0_11, %c0_12], %12 {strides = array<i32>} : memref<256x128xf32, #tpu.memory_space<vmem>>, vector<256x128xf32>,
    } else {
    }
    %c0 = arith.constant 0 : index
    %c0_1 = arith.constant 0 : index
    %3 = vector.load %arg7[%c0, %c0_1] : memref<256x128xf32, #tpu.memory_space<vmem>>, vector<256x128xf32>
    %c0_2 = arith.constant 0 : index
    %c0_3 = arith.constant 0 : index
    %4 = vector.load %arg3[%c0_2, %c0_3] : memref<256x384xbf16, #tpu.memory_space<vmem>>, vector<256x384xbf16>
    %c0_4 = arith.constant 0 : index
    %c0_5 = arith.constant 0 : index
    %5 = vector.load %arg4[%c0_4, %c0_5] : memref<384x128xbf16, #tpu.memory_space<vmem>>, vector<384x128xbf16>
    %cst = arith.constant dense<0.000000e+00> : vector<256x128xf32>
    %6 = tpu.matmul %4, %5, %cst {dimension_numbers = #tpu.dot_dimension_numbers<[1], [0], [0], [1], [0, 0, 1, 1], [], []>} : vector<256x384xbf16>, vector<384x128xbf16>, vector<256x128xf32> -> vector<256x128xf32>
    %7 = arith.addf %3, %6 : vector<256x128xf32>
    %c0_6 = arith.constant 0 : index
    %c0_7 = arith.constant 0 : index
    %8 = vector.load %arg7[%c0_6, %c0_7] : memref<256x128xf32, #tpu.memory_space<vmem>>, vector<256x128xf32>
    tpu.vector_store %arg7[%c0_6, %c0_7], %7 {strides = array<i32>} : memref<256x128xf32, #tpu.memory_space<vmem>>, vector<256x128xf32>,
    %c0_i32_8 = arith.constant 0 : i32
    %9 = arith.cmpi eq, %arg2, %c0_i32_8 : i32
    %10 = arith.extui %9 : i1 to i32
    %c0_i32_9 = arith.constant 0 : i32
    %11 = arith.cmpi ne, %10, %c0_i32_9 : i32
    scf.if %11 {
      %c0_10 = arith.constant 0 : index
      %c0_11 = arith.constant 0 : index
      %12 = vector.load %arg7[%c0_10, %c0_11] : memref<256x128xf32, #tpu.memory_space<vmem>>, vector<256x128xf32>
      %c0_12 = arith.constant 0 : index
      %c0_13 = arith.constant 0 : index
      %13 = vector.load %arg5[%c0_12, %c0_13] : memref<1x128xf32, #tpu.memory_space<vmem>>, vector<1x128xf32>
      %14 = vector.broadcast %13 : vector<1x128xf32> to vector<256x128xf32>
      %15 = arith.addf %12, %14 : vector<256x128xf32>
      %cst_14 = arith.constant 0.000000e+00 : f32
      %16 = vector.broadcast %cst_14 : f32 to vector<256x128xf32>
      %17 = arith.cmpf oge, %15, %16 : vector<256x128xf32>
      %cst_15 = arith.constant 2.000000e-01 : f32
      %18 = vector.broadcast %cst_15 : f32 to vector<256x128xf32>
      %19 = arith.mulf %18, %15 : vector<256x128xf32>
      %20 = arith.select %17, %15, %19 : vector<256x128xi1>, vector<256x128xf32>
      %c0_16 = arith.constant 0 : index
      %c0_17 = arith.constant 0 : index
      %21 = vector.load %arg6[%c0_16, %c0_17] : memref<256x128xf32, #tpu.memory_space<vmem>>, vector<256x128xf32>
      tpu.vector_store %arg6[%c0_16, %c0_17], %20 {strides = array<i32>} : memref<256x128xf32, #tpu.memory_space<vmem>>, vector<256x128xf32>,
    } else {
    }
    return
  }
  func.func @transform_0(%arg0: i32, %arg1: i32, %arg2: i32) -> (i32, i32) {
    %c0_i32 = arith.constant 0 : i32
    return %arg0, %arg2 : i32, i32
  }
  func.func @transform_1(%arg0: i32, %arg1: i32, %arg2: i32) -> (i32, i32) {
    %c0_i32 = arith.constant 0 : i32
    return %arg2, %arg1 : i32, i32
  }
  func.func @transform_2(%arg0: i32, %arg1: i32, %arg2: i32) -> (i32, i32) {
    %c0_i32 = arith.constant 0 : i32
    %c0_i32_0 = arith.constant 0 : i32
    return %c0_i32, %arg1 : i32, i32
  }
  func.func @transform_3(%arg0: i32, %arg1: i32, %arg2: i32) -> (i32, i32) {
    %c0_i32 = arith.constant 0 : i32
    return %arg0, %arg1 : i32, i32
  }
}

module attributes {stable_mosaic.version = 11 : i64} {
  func.func @_matmul_kernel(%arg0: i32, %arg1: i32, %arg2: i32, %arg3: memref<128x512xbf16, #tpu.memory_space<vmem>>, %arg4: memref<512x128xbf16, #tpu.memory_space<vmem>>, %arg5: memref<1x128xf32, #tpu.memory_space<vmem>>, %arg6: memref<128x128xf32, #tpu.memory_space<vmem>>, %arg7: memref<128x128xf32, #tpu.memory_space<vmem>>) attributes {dimension_semantics = [#tpu.dimension_semantics<parallel>, #tpu.dimension_semantics<parallel>, #tpu.dimension_semantics<arbitrary>], iteration_bounds = array<i64: 1, 1, 2>, scalar_prefetch = 0 : i64, scratch_operands = 1 : i64, tpu.core_type = #tpu.core_type<tc>, window_params = [{transform_indices = @transform_0, window_bounds = array<i64: 128, 512>}, {transform_indices = @transform_1, window_bounds = array<i64: 512, 128>}, {transform_indices = @transform_2, window_bounds = array<i64: 1, 128>}, {transform_indices = @transform_3, window_bounds = array<i64: 128, 128>}]} {
    %c0_i32 = arith.constant 0 : i32
    %0 = arith.cmpi eq, %arg2, %c0_i32 : i32
    %1 = arith.extui %0 : i1 to i32
    %c0_i32_0 = arith.constant 0 : i32
    %2 = arith.cmpi ne, %1, %c0_i32_0 : i32
    scf.if %2 {
      %cst_9 = arith.constant 0.000000e+00 : f32
      %12 = vector.broadcast %cst_9 : f32 to vector<128x128xf32>
      %c0_10 = arith.constant 0 : index
      %c0_11 = arith.constant 0 : index
      %13 = vector.load %arg7[%c0_10, %c0_11] : memref<128x128xf32, #tpu.memory_space<vmem>>, vector<128x128xf32>
      tpu.vector_store %arg7[%c0_10, %c0_11], %12 {strides = array<i32>} : memref<128x128xf32, #tpu.memory_space<vmem>>, vector<128x128xf32>,
    } else {
    }
    %c0 = arith.constant 0 : index
    %c0_1 = arith.constant 0 : index
    %3 = vector.load %arg7[%c0, %c0_1] : memref<128x128xf32, #tpu.memory_space<vmem>>, vector<128x128xf32>
    %c0_2 = arith.constant 0 : index
    %c0_3 = arith.constant 0 : index
    %4 = vector.load %arg3[%c0_2, %c0_3] : memref<128x512xbf16, #tpu.memory_space<vmem>>, vector<128x512xbf16>
    %c0_4 = arith.constant 0 : index
    %c0_5 = arith.constant 0 : index
    %5 = vector.load %arg4[%c0_4, %c0_5] : memref<512x128xbf16, #tpu.memory_space<vmem>>, vector<512x128xbf16>
    %cst = arith.constant dense<0.000000e+00> : vector<128x128xf32>
    %6 = tpu.matmul %4, %5, %cst {dimension_numbers = #tpu.dot_dimension_numbers<[1], [0], [0], [1], [0, 0, 1, 1], [], []>} : vector<128x512xbf16>, vector<512x128xbf16>, vector<128x128xf32> -> vector<128x128xf32>
    %7 = arith.addf %3, %6 : vector<128x128xf32>
    %c0_6 = arith.constant 0 : index
    %c0_7 = arith.constant 0 : index
    %8 = vector.load %arg7[%c0_6, %c0_7] : memref<128x128xf32, #tpu.memory_space<vmem>>, vector<128x128xf32>
    tpu.vector_store %arg7[%c0_6, %c0_7], %7 {strides = array<i32>} : memref<128x128xf32, #tpu.memory_space<vmem>>, vector<128x128xf32>,
    %c1_i32 = arith.constant 1 : i32
    %9 = arith.cmpi eq, %arg2, %c1_i32 : i32
    %10 = arith.extui %9 : i1 to i32
    %c0_i32_8 = arith.constant 0 : i32
    %11 = arith.cmpi ne, %10, %c0_i32_8 : i32
    scf.if %11 {
      %c0_9 = arith.constant 0 : index
      %c0_10 = arith.constant 0 : index
      %12 = vector.load %arg7[%c0_9, %c0_10] : memref<128x128xf32, #tpu.memory_space<vmem>>, vector<128x128xf32>
      %c0_11 = arith.constant 0 : index
      %c0_12 = arith.constant 0 : index
      %13 = vector.load %arg5[%c0_11, %c0_12] : memref<1x128xf32, #tpu.memory_space<vmem>>, vector<1x128xf32>
      %14 = vector.broadcast %13 : vector<1x128xf32> to vector<128x128xf32>
      %15 = arith.addf %12, %14 : vector<128x128xf32>
      %c0_13 = arith.constant 0 : index
      %c0_14 = arith.constant 0 : index
      %16 = vector.load %arg6[%c0_13, %c0_14] : memref<128x128xf32, #tpu.memory_space<vmem>>, vector<128x128xf32>
      tpu.vector_store %arg6[%c0_13, %c0_14], %15 {strides = array<i32>} : memref<128x128xf32, #tpu.memory_space<vmem>>, vector<128x128xf32>,
    } else {
    }
    return
  }
  func.func @transform_0(%arg0: i32, %arg1: i32, %arg2: i32) -> (i32, i32) {
    %c0_i32 = arith.constant 0 : i32
    return %arg0, %arg2 : i32, i32
  }
  func.func @transform_1(%arg0: i32, %arg1: i32, %arg2: i32) -> (i32, i32) {
    %c0_i32 = arith.constant 0 : i32
    return %arg2, %arg1 : i32, i32
  }
  func.func @transform_2(%arg0: i32, %arg1: i32, %arg2: i32) -> (i32, i32) {
    %c0_i32 = arith.constant 0 : i32
    %c0_i32_0 = arith.constant 0 : i32
    return %c0_i32, %arg1 : i32, i32
  }
  func.func @transform_3(%arg0: i32, %arg1: i32, %arg2: i32) -> (i32, i32) {
    %c0_i32 = arith.constant 0 : i32
    return %arg0, %arg1 : i32, i32
  }
}

module attributes {stable_mosaic.version = 11 : i64} {
  func.func @_channel_stats_kernel(%arg0: i32, %arg1: memref<128x128xf32, #tpu.memory_space<vmem>>, %arg2: memref<1x128xf32, #tpu.memory_space<vmem>>, %arg3: memref<1x128xf32, #tpu.memory_space<vmem>>) attributes {dimension_semantics = [#tpu.dimension_semantics<arbitrary>], iteration_bounds = array<i64: 1>, scalar_prefetch = 0 : i64, scratch_operands = 0 : i64, tpu.core_type = #tpu.core_type<tc>, window_params = [{transform_indices = @transform_0, window_bounds = array<i64: 128, 128>}, {pipeline_mode = #tpu.pipeline_mode<synchronous>, transform_indices = @transform_1, window_bounds = array<i64: 1, 128>}, {pipeline_mode = #tpu.pipeline_mode<synchronous>, transform_indices = @transform_2, window_bounds = array<i64: 1, 128>}]} {
    %c0_i32 = arith.constant 0 : i32
    %0 = arith.cmpi eq, %arg0, %c0_i32 : i32
    %1 = arith.extui %0 : i1 to i32
    %c0_i32_0 = arith.constant 0 : i32
    %2 = arith.cmpi ne, %1, %c0_i32_0 : i32
    scf.if %2 {
      %cst_12 = arith.constant 0.000000e+00 : f32
      %25 = vector.broadcast %cst_12 : f32 to vector<1x128xf32>
      %c0_13 = arith.constant 0 : index
      %c0_14 = arith.constant 0 : index
      %26 = vector.load %arg2[%c0_13, %c0_14] : memref<1x128xf32, #tpu.memory_space<vmem>>, vector<1x128xf32>
      tpu.vector_store %arg2[%c0_13, %c0_14], %25 {strides = array<i32>} : memref<1x128xf32, #tpu.memory_space<vmem>>, vector<1x128xf32>,
      %cst_15 = arith.constant 0.000000e+00 : f32
      %27 = vector.broadcast %cst_15 : f32 to vector<1x128xf32>
      %c0_16 = arith.constant 0 : index
      %c0_17 = arith.constant 0 : index
      %28 = vector.load %arg3[%c0_16, %c0_17] : memref<1x128xf32, #tpu.memory_space<vmem>>, vector<1x128xf32>
      tpu.vector_store %arg3[%c0_16, %c0_17], %27 {strides = array<i32>} : memref<1x128xf32, #tpu.memory_space<vmem>>, vector<1x128xf32>,
    } else {
    }
    %3 = tpu.iota {dimensions = array<i32: 0>} : vector<128x1xi32>
    %c128_i32 = arith.constant 128 : i32
    %4 = arith.muli %arg0, %c128_i32 : i32
    %5 = vector.broadcast %4 : i32 to vector<128x1xi32>
    %6 = arith.addi %3, %5 : vector<128x1xi32>
    %c128_i32_1 = arith.constant 128 : i32
    %7 = vector.broadcast %c128_i32_1 : i32 to vector<128x1xi32>
    %8 = arith.cmpi slt, %6, %7 : vector<128x1xi32>
    %9 = arith.extui %8 : vector<128x1xi1> to vector<128x1xi32>
    %10 = arith.sitofp %9 : vector<128x1xi32> to vector<128x1xf32>
    %c0 = arith.constant 0 : index
    %c0_2 = arith.constant 0 : index
    %11 = vector.load %arg1[%c0, %c0_2] : memref<128x128xf32, #tpu.memory_space<vmem>>, vector<128x128xf32>
    %12 = vector.broadcast %10 : vector<128x1xf32> to vector<128x128xf32>
    %13 = arith.mulf %11, %12 : vector<128x128xf32>
    %c0_3 = arith.constant 0 : index
    %c0_4 = arith.constant 0 : index
    %14 = vector.load %arg2[%c0_3, %c0_4] : memref<1x128xf32, #tpu.memory_space<vmem>>, vector<1x128xf32>
    %cst = arith.constant dense<0.000000e+00> : vector<128xf32>
    %15 = vector.multi_reduction <add>, %13, %cst [0] : vector<128x128xf32> to vector<128xf32>
    %16 = vector.shape_cast %15 : vector<128xf32> to vector<1x128xf32>
    %17 = arith.addf %14, %16 : vector<1x128xf32>
    %c0_5 = arith.constant 0 : index
    %c0_6 = arith.constant 0 : index
    %18 = vector.load %arg2[%c0_5, %c0_6] : memref<1x128xf32, #tpu.memory_space<vmem>>, vector<1x128xf32>
    tpu.vector_store %arg2[%c0_5, %c0_6], %17 {strides = array<i32>} : memref<1x128xf32, #tpu.memory_space<vmem>>, vector<1x128xf32>,
    %c0_7 = arith.constant 0 : index
    %c0_8 = arith.constant 0 : index
    %19 = vector.load %arg3[%c0_7, %c0_8] : memref<1x128xf32, #tpu.memory_space<vmem>>, vector<1x128xf32>
    %20 = arith.mulf %13, %13 : vector<128x128xf32>
    %cst_9 = arith.constant dense<0.000000e+00> : vector<128xf32>
    %21 = vector.multi_reduction <add>, %20, %cst_9 [0] : vector<128x128xf32> to vector<128xf32>
    %22 = vector.shape_cast %21 : vector<128xf32> to vector<1x128xf32>
    %23 = arith.addf %19, %22 : vector<1x128xf32>
    %c0_10 = arith.constant 0 : index
    %c0_11 = arith.constant 0 : index
    %24 = vector.load %arg3[%c0_10, %c0_11] : memref<1x128xf32, #tpu.memory_space<vmem>>, vector<1x128xf32>
    tpu.vector_store %arg3[%c0_10, %c0_11], %23 {strides = array<i32>} : memref<1x128xf32, #tpu.memory_space<vmem>>, vector<1x128xf32>,
    return
  }
  func.func @transform_0(%arg0: i32) -> (i32, i32) {
    %c0_i32 = arith.constant 0 : i32
    %c0_i32_0 = arith.constant 0 : i32
    return %arg0, %c0_i32 : i32, i32
  }
  func.func @transform_1(%arg0: i32) -> (i32, i32) {
    %c0_i32 = arith.constant 0 : i32
    %c0_i32_0 = arith.constant 0 : i32
    %c0_i32_1 = arith.constant 0 : i32
    return %c0_i32, %c0_i32_0 : i32, i32
  }
  func.func @transform_2(%arg0: i32) -> (i32, i32) {
    %c0_i32 = arith.constant 0 : i32
    %c0_i32_0 = arith.constant 0 : i32
    %c0_i32_1 = arith.constant 0 : i32
    return %c0_i32, %c0_i32_0 : i32, i32
  }
}

module attributes {stable_mosaic.version = 11 : i64} {
  func.func @_scale_shift_lrelu_kernel(%arg0: i32, %arg1: memref<128x128xf32, #tpu.memory_space<vmem>>, %arg2: memref<1x128xf32, #tpu.memory_space<vmem>>, %arg3: memref<1x128xf32, #tpu.memory_space<vmem>>, %arg4: memref<128x128xf32, #tpu.memory_space<vmem>>) attributes {dimension_semantics = [#tpu.dimension_semantics<parallel>], iteration_bounds = array<i64: 1>, scalar_prefetch = 0 : i64, scratch_operands = 0 : i64, tpu.core_type = #tpu.core_type<tc>, window_params = [{transform_indices = @transform_0, window_bounds = array<i64: 128, 128>}, {pipeline_mode = #tpu.pipeline_mode<synchronous>, transform_indices = @transform_1, window_bounds = array<i64: 1, 128>}, {pipeline_mode = #tpu.pipeline_mode<synchronous>, transform_indices = @transform_2, window_bounds = array<i64: 1, 128>}, {transform_indices = @transform_3, window_bounds = array<i64: 128, 128>}]} {
    %c0 = arith.constant 0 : index
    %c0_0 = arith.constant 0 : index
    %0 = vector.load %arg1[%c0, %c0_0] : memref<128x128xf32, #tpu.memory_space<vmem>>, vector<128x128xf32>
    %c0_1 = arith.constant 0 : index
    %c0_2 = arith.constant 0 : index
    %1 = vector.load %arg2[%c0_1, %c0_2] : memref<1x128xf32, #tpu.memory_space<vmem>>, vector<1x128xf32>
    %2 = vector.broadcast %1 : vector<1x128xf32> to vector<128x128xf32>
    %3 = arith.mulf %0, %2 : vector<128x128xf32>
    %c0_3 = arith.constant 0 : index
    %c0_4 = arith.constant 0 : index
    %4 = vector.load %arg3[%c0_3, %c0_4] : memref<1x128xf32, #tpu.memory_space<vmem>>, vector<1x128xf32>
    %5 = vector.broadcast %4 : vector<1x128xf32> to vector<128x128xf32>
    %6 = arith.addf %3, %5 : vector<128x128xf32>
    %cst = arith.constant 0.000000e+00 : f32
    %7 = vector.broadcast %cst : f32 to vector<128x128xf32>
    %8 = arith.cmpf oge, %6, %7 : vector<128x128xf32>
    %cst_5 = arith.constant 2.000000e-01 : f32
    %9 = vector.broadcast %cst_5 : f32 to vector<128x128xf32>
    %10 = arith.mulf %9, %6 : vector<128x128xf32>
    %11 = arith.select %8, %6, %10 : vector<128x128xi1>, vector<128x128xf32>
    %c0_6 = arith.constant 0 : index
    %c0_7 = arith.constant 0 : index
    %12 = vector.load %arg4[%c0_6, %c0_7] : memref<128x128xf32, #tpu.memory_space<vmem>>, vector<128x128xf32>
    tpu.vector_store %arg4[%c0_6, %c0_7], %11 {strides = array<i32>} : memref<128x128xf32, #tpu.memory_space<vmem>>, vector<128x128xf32>,
    return
  }
  func.func @transform_0(%arg0: i32) -> (i32, i32) {
    %c0_i32 = arith.constant 0 : i32
    %c0_i32_0 = arith.constant 0 : i32
    return %arg0, %c0_i32 : i32, i32
  }
  func.func @transform_1(%arg0: i32) -> (i32, i32) {
    %c0_i32 = arith.constant 0 : i32
    %c0_i32_0 = arith.constant 0 : i32
    %c0_i32_1 = arith.constant 0 : i32
    return %c0_i32, %c0_i32_0 : i32, i32
  }
  func.func @transform_2(%arg0: i32) -> (i32, i32) {
    %c0_i32 = arith.constant 0 : i32
    %c0_i32_0 = arith.constant 0 : i32
    %c0_i32_1 = arith.constant 0 : i32
    return %c0_i32, %c0_i32_0 : i32, i32
  }
  func.func @transform_3(%arg0: i32) -> (i32, i32) {
    %c0_i32 = arith.constant 0 : i32
    %c0_i32_0 = arith.constant 0 : i32
    return %arg0, %c0_i32 : i32, i32
  }
}

module attributes {stable_mosaic.version = 11 : i64} {
  func.func @_channel_stats_kernel(%arg0: i32, %arg1: memref<32x256xf32, #tpu.memory_space<vmem>>, %arg2: memref<1x256xf32, #tpu.memory_space<vmem>>, %arg3: memref<1x256xf32, #tpu.memory_space<vmem>>) attributes {dimension_semantics = [#tpu.dimension_semantics<arbitrary>], iteration_bounds = array<i64: 1>, scalar_prefetch = 0 : i64, scratch_operands = 0 : i64, tpu.core_type = #tpu.core_type<tc>, window_params = [{transform_indices = @transform_0, window_bounds = array<i64: 32, 256>}, {pipeline_mode = #tpu.pipeline_mode<synchronous>, transform_indices = @transform_1, window_bounds = array<i64: 1, 256>}, {pipeline_mode = #tpu.pipeline_mode<synchronous>, transform_indices = @transform_2, window_bounds = array<i64: 1, 256>}]} {
    %c0_i32 = arith.constant 0 : i32
    %0 = arith.cmpi eq, %arg0, %c0_i32 : i32
    %1 = arith.extui %0 : i1 to i32
    %c0_i32_0 = arith.constant 0 : i32
    %2 = arith.cmpi ne, %1, %c0_i32_0 : i32
    scf.if %2 {
      %cst_12 = arith.constant 0.000000e+00 : f32
      %25 = vector.broadcast %cst_12 : f32 to vector<1x256xf32>
      %c0_13 = arith.constant 0 : index
      %c0_14 = arith.constant 0 : index
      %26 = vector.load %arg2[%c0_13, %c0_14] : memref<1x256xf32, #tpu.memory_space<vmem>>, vector<1x256xf32>
      tpu.vector_store %arg2[%c0_13, %c0_14], %25 {strides = array<i32>} : memref<1x256xf32, #tpu.memory_space<vmem>>, vector<1x256xf32>,
      %cst_15 = arith.constant 0.000000e+00 : f32
      %27 = vector.broadcast %cst_15 : f32 to vector<1x256xf32>
      %c0_16 = arith.constant 0 : index
      %c0_17 = arith.constant 0 : index
      %28 = vector.load %arg3[%c0_16, %c0_17] : memref<1x256xf32, #tpu.memory_space<vmem>>, vector<1x256xf32>
      tpu.vector_store %arg3[%c0_16, %c0_17], %27 {strides = array<i32>} : memref<1x256xf32, #tpu.memory_space<vmem>>, vector<1x256xf32>,
    } else {
    }
    %3 = tpu.iota {dimensions = array<i32: 0>} : vector<32x1xi32>
    %c32_i32 = arith.constant 32 : i32
    %4 = arith.muli %arg0, %c32_i32 : i32
    %5 = vector.broadcast %4 : i32 to vector<32x1xi32>
    %6 = arith.addi %3, %5 : vector<32x1xi32>
    %c32_i32_1 = arith.constant 32 : i32
    %7 = vector.broadcast %c32_i32_1 : i32 to vector<32x1xi32>
    %8 = arith.cmpi slt, %6, %7 : vector<32x1xi32>
    %9 = arith.extui %8 : vector<32x1xi1> to vector<32x1xi32>
    %10 = arith.sitofp %9 : vector<32x1xi32> to vector<32x1xf32>
    %c0 = arith.constant 0 : index
    %c0_2 = arith.constant 0 : index
    %11 = vector.load %arg1[%c0, %c0_2] : memref<32x256xf32, #tpu.memory_space<vmem>>, vector<32x256xf32>
    %12 = vector.broadcast %10 : vector<32x1xf32> to vector<32x256xf32>
    %13 = arith.mulf %11, %12 : vector<32x256xf32>
    %c0_3 = arith.constant 0 : index
    %c0_4 = arith.constant 0 : index
    %14 = vector.load %arg2[%c0_3, %c0_4] : memref<1x256xf32, #tpu.memory_space<vmem>>, vector<1x256xf32>
    %cst = arith.constant dense<0.000000e+00> : vector<256xf32>
    %15 = vector.multi_reduction <add>, %13, %cst [0] : vector<32x256xf32> to vector<256xf32>
    %16 = vector.shape_cast %15 : vector<256xf32> to vector<1x256xf32>
    %17 = arith.addf %14, %16 : vector<1x256xf32>
    %c0_5 = arith.constant 0 : index
    %c0_6 = arith.constant 0 : index
    %18 = vector.load %arg2[%c0_5, %c0_6] : memref<1x256xf32, #tpu.memory_space<vmem>>, vector<1x256xf32>
    tpu.vector_store %arg2[%c0_5, %c0_6], %17 {strides = array<i32>} : memref<1x256xf32, #tpu.memory_space<vmem>>, vector<1x256xf32>,
    %c0_7 = arith.constant 0 : index
    %c0_8 = arith.constant 0 : index
    %19 = vector.load %arg3[%c0_7, %c0_8] : memref<1x256xf32, #tpu.memory_space<vmem>>, vector<1x256xf32>
    %20 = arith.mulf %13, %13 : vector<32x256xf32>
    %cst_9 = arith.constant dense<0.000000e+00> : vector<256xf32>
    %21 = vector.multi_reduction <add>, %20, %cst_9 [0] : vector<32x256xf32> to vector<256xf32>
    %22 = vector.shape_cast %21 : vector<256xf32> to vector<1x256xf32>
    %23 = arith.addf %19, %22 : vector<1x256xf32>
    %c0_10 = arith.constant 0 : index
    %c0_11 = arith.constant 0 : index
    %24 = vector.load %arg3[%c0_10, %c0_11] : memref<1x256xf32, #tpu.memory_space<vmem>>, vector<1x256xf32>
    tpu.vector_store %arg3[%c0_10, %c0_11], %23 {strides = array<i32>} : memref<1x256xf32, #tpu.memory_space<vmem>>, vector<1x256xf32>,
    return
  }
  func.func @transform_0(%arg0: i32) -> (i32, i32) {
    %c0_i32 = arith.constant 0 : i32
    %c0_i32_0 = arith.constant 0 : i32
    return %arg0, %c0_i32 : i32, i32
  }
  func.func @transform_1(%arg0: i32) -> (i32, i32) {
    %c0_i32 = arith.constant 0 : i32
    %c0_i32_0 = arith.constant 0 : i32
    %c0_i32_1 = arith.constant 0 : i32
    return %c0_i32, %c0_i32_0 : i32, i32
  }
  func.func @transform_2(%arg0: i32) -> (i32, i32) {
    %c0_i32 = arith.constant 0 : i32
    %c0_i32_0 = arith.constant 0 : i32
    %c0_i32_1 = arith.constant 0 : i32
    return %c0_i32, %c0_i32_0 : i32, i32
  }
}

module attributes {stable_mosaic.version = 11 : i64} {
  func.func @_matmul_kernel(%arg0: i32, %arg1: i32, %arg2: i32, %arg3: memref<32x512xbf16, #tpu.memory_space<vmem>>, %arg4: memref<512x256xbf16, #tpu.memory_space<vmem>>, %arg5: memref<1x256xf32, #tpu.memory_space<vmem>>, %arg6: memref<32x256xf32, #tpu.memory_space<vmem>>, %arg7: memref<32x256xf32, #tpu.memory_space<vmem>>) attributes {dimension_semantics = [#tpu.dimension_semantics<parallel>, #tpu.dimension_semantics<parallel>, #tpu.dimension_semantics<arbitrary>], iteration_bounds = array<i64: 1, 1, 4>, scalar_prefetch = 0 : i64, scratch_operands = 1 : i64, tpu.core_type = #tpu.core_type<tc>, window_params = [{transform_indices = @transform_0, window_bounds = array<i64: 32, 512>}, {transform_indices = @transform_1, window_bounds = array<i64: 512, 256>}, {transform_indices = @transform_2, window_bounds = array<i64: 1, 256>}, {transform_indices = @transform_3, window_bounds = array<i64: 32, 256>}]} {
    %c0_i32 = arith.constant 0 : i32
    %0 = arith.cmpi eq, %arg2, %c0_i32 : i32
    %1 = arith.extui %0 : i1 to i32
    %c0_i32_0 = arith.constant 0 : i32
    %2 = arith.cmpi ne, %1, %c0_i32_0 : i32
    scf.if %2 {
      %cst_9 = arith.constant 0.000000e+00 : f32
      %12 = vector.broadcast %cst_9 : f32 to vector<32x256xf32>
      %c0_10 = arith.constant 0 : index
      %c0_11 = arith.constant 0 : index
      %13 = vector.load %arg7[%c0_10, %c0_11] : memref<32x256xf32, #tpu.memory_space<vmem>>, vector<32x256xf32>
      tpu.vector_store %arg7[%c0_10, %c0_11], %12 {strides = array<i32>} : memref<32x256xf32, #tpu.memory_space<vmem>>, vector<32x256xf32>,
    } else {
    }
    %c0 = arith.constant 0 : index
    %c0_1 = arith.constant 0 : index
    %3 = vector.load %arg7[%c0, %c0_1] : memref<32x256xf32, #tpu.memory_space<vmem>>, vector<32x256xf32>
    %c0_2 = arith.constant 0 : index
    %c0_3 = arith.constant 0 : index
    %4 = vector.load %arg3[%c0_2, %c0_3] : memref<32x512xbf16, #tpu.memory_space<vmem>>, vector<32x512xbf16>
    %c0_4 = arith.constant 0 : index
    %c0_5 = arith.constant 0 : index
    %5 = vector.load %arg4[%c0_4, %c0_5] : memref<512x256xbf16, #tpu.memory_space<vmem>>, vector<512x256xbf16>
    %cst = arith.constant dense<0.000000e+00> : vector<32x256xf32>
    %6 = tpu.matmul %4, %5, %cst {dimension_numbers = #tpu.dot_dimension_numbers<[1], [0], [0], [1], [0, 0, 1, 1], [], []>} : vector<32x512xbf16>, vector<512x256xbf16>, vector<32x256xf32> -> vector<32x256xf32>
    %7 = arith.addf %3, %6 : vector<32x256xf32>
    %c0_6 = arith.constant 0 : index
    %c0_7 = arith.constant 0 : index
    %8 = vector.load %arg7[%c0_6, %c0_7] : memref<32x256xf32, #tpu.memory_space<vmem>>, vector<32x256xf32>
    tpu.vector_store %arg7[%c0_6, %c0_7], %7 {strides = array<i32>} : memref<32x256xf32, #tpu.memory_space<vmem>>, vector<32x256xf32>,
    %c3_i32 = arith.constant 3 : i32
    %9 = arith.cmpi eq, %arg2, %c3_i32 : i32
    %10 = arith.extui %9 : i1 to i32
    %c0_i32_8 = arith.constant 0 : i32
    %11 = arith.cmpi ne, %10, %c0_i32_8 : i32
    scf.if %11 {
      %c0_9 = arith.constant 0 : index
      %c0_10 = arith.constant 0 : index
      %12 = vector.load %arg7[%c0_9, %c0_10] : memref<32x256xf32, #tpu.memory_space<vmem>>, vector<32x256xf32>
      %c0_11 = arith.constant 0 : index
      %c0_12 = arith.constant 0 : index
      %13 = vector.load %arg5[%c0_11, %c0_12] : memref<1x256xf32, #tpu.memory_space<vmem>>, vector<1x256xf32>
      %14 = vector.broadcast %13 : vector<1x256xf32> to vector<32x256xf32>
      %15 = arith.addf %12, %14 : vector<32x256xf32>
      %c0_13 = arith.constant 0 : index
      %c0_14 = arith.constant 0 : index
      %16 = vector.load %arg6[%c0_13, %c0_14] : memref<32x256xf32, #tpu.memory_space<vmem>>, vector<32x256xf32>
      tpu.vector_store %arg6[%c0_13, %c0_14], %15 {strides = array<i32>} : memref<32x256xf32, #tpu.memory_space<vmem>>, vector<32x256xf32>,
    } else {
    }
    return
  }
  func.func @transform_0(%arg0: i32, %arg1: i32, %arg2: i32) -> (i32, i32) {
    %c0_i32 = arith.constant 0 : i32
    return %arg0, %arg2 : i32, i32
  }
  func.func @transform_1(%arg0: i32, %arg1: i32, %arg2: i32) -> (i32, i32) {
    %c0_i32 = arith.constant 0 : i32
    return %arg2, %arg1 : i32, i32
  }
  func.func @transform_2(%arg0: i32, %arg1: i32, %arg2: i32) -> (i32, i32) {
    %c0_i32 = arith.constant 0 : i32
    %c0_i32_0 = arith.constant 0 : i32
    return %c0_i32, %arg1 : i32, i32
  }
  func.func @transform_3(%arg0: i32, %arg1: i32, %arg2: i32) -> (i32, i32) {
    %c0_i32 = arith.constant 0 : i32
    return %arg0, %arg1 : i32, i32
  }
}

module attributes {stable_mosaic.version = 11 : i64} {
  func.func @_scale_shift_lrelu_kernel(%arg0: i32, %arg1: memref<32x256xf32, #tpu.memory_space<vmem>>, %arg2: memref<1x256xf32, #tpu.memory_space<vmem>>, %arg3: memref<1x256xf32, #tpu.memory_space<vmem>>, %arg4: memref<32x256xf32, #tpu.memory_space<vmem>>) attributes {dimension_semantics = [#tpu.dimension_semantics<parallel>], iteration_bounds = array<i64: 1>, scalar_prefetch = 0 : i64, scratch_operands = 0 : i64, tpu.core_type = #tpu.core_type<tc>, window_params = [{transform_indices = @transform_0, window_bounds = array<i64: 32, 256>}, {pipeline_mode = #tpu.pipeline_mode<synchronous>, transform_indices = @transform_1, window_bounds = array<i64: 1, 256>}, {pipeline_mode = #tpu.pipeline_mode<synchronous>, transform_indices = @transform_2, window_bounds = array<i64: 1, 256>}, {transform_indices = @transform_3, window_bounds = array<i64: 32, 256>}]} {
    %c0 = arith.constant 0 : index
    %c0_0 = arith.constant 0 : index
    %0 = vector.load %arg1[%c0, %c0_0] : memref<32x256xf32, #tpu.memory_space<vmem>>, vector<32x256xf32>
    %c0_1 = arith.constant 0 : index
    %c0_2 = arith.constant 0 : index
    %1 = vector.load %arg2[%c0_1, %c0_2] : memref<1x256xf32, #tpu.memory_space<vmem>>, vector<1x256xf32>
    %2 = vector.broadcast %1 : vector<1x256xf32> to vector<32x256xf32>
    %3 = arith.mulf %0, %2 : vector<32x256xf32>
    %c0_3 = arith.constant 0 : index
    %c0_4 = arith.constant 0 : index
    %4 = vector.load %arg3[%c0_3, %c0_4] : memref<1x256xf32, #tpu.memory_space<vmem>>, vector<1x256xf32>
    %5 = vector.broadcast %4 : vector<1x256xf32> to vector<32x256xf32>
    %6 = arith.addf %3, %5 : vector<32x256xf32>
    %cst = arith.constant 0.000000e+00 : f32
    %7 = vector.broadcast %cst : f32 to vector<32x256xf32>
    %8 = arith.cmpf oge, %6, %7 : vector<32x256xf32>
    %cst_5 = arith.constant 2.000000e-01 : f32
    %9 = vector.broadcast %cst_5 : f32 to vector<32x256xf32>
    %10 = arith.mulf %9, %6 : vector<32x256xf32>
    %11 = arith.select %8, %6, %10 : vector<32x256xi1>, vector<32x256xf32>
    %c0_6 = arith.constant 0 : index
    %c0_7 = arith.constant 0 : index
    %12 = vector.load %arg4[%c0_6, %c0_7] : memref<32x256xf32, #tpu.memory_space<vmem>>, vector<32x256xf32>
    tpu.vector_store %arg4[%c0_6, %c0_7], %11 {strides = array<i32>} : memref<32x256xf32, #tpu.memory_space<vmem>>, vector<32x256xf32>,
    return
  }
  func.func @transform_0(%arg0: i32) -> (i32, i32) {
    %c0_i32 = arith.constant 0 : i32
    %c0_i32_0 = arith.constant 0 : i32
    return %arg0, %c0_i32 : i32, i32
  }
  func.func @transform_1(%arg0: i32) -> (i32, i32) {
    %c0_i32 = arith.constant 0 : i32
    %c0_i32_0 = arith.constant 0 : i32
    %c0_i32_1 = arith.constant 0 : i32
    return %c0_i32, %c0_i32_0 : i32, i32
  }
  func.func @transform_2(%arg0: i32) -> (i32, i32) {
    %c0_i32 = arith.constant 0 : i32
    %c0_i32_0 = arith.constant 0 : i32
    %c0_i32_1 = arith.constant 0 : i32
    return %c0_i32, %c0_i32_0 : i32, i32
  }
  func.func @transform_3(%arg0: i32) -> (i32, i32) {
    %c0_i32 = arith.constant 0 : i32
    %c0_i32_0 = arith.constant 0 : i32
    return %arg0, %c0_i32 : i32, i32
  }
}

module attributes {stable_mosaic.version = 11 : i64} {
  func.func @_matmul_kernel(%arg0: i32, %arg1: i32, %arg2: i32, %arg3: memref<24x512xbf16, #tpu.memory_space<vmem>>, %arg4: memref<512x256xbf16, #tpu.memory_space<vmem>>, %arg5: memref<1x256xf32, #tpu.memory_space<vmem>>, %arg6: memref<24x256xf32, #tpu.memory_space<vmem>>, %arg7: memref<24x256xf32, #tpu.memory_space<vmem>>) attributes {dimension_semantics = [#tpu.dimension_semantics<parallel>, #tpu.dimension_semantics<parallel>, #tpu.dimension_semantics<arbitrary>], iteration_bounds = array<i64: 1, 2, 8>, scalar_prefetch = 0 : i64, scratch_operands = 1 : i64, tpu.core_type = #tpu.core_type<tc>, window_params = [{transform_indices = @transform_0, window_bounds = array<i64: 24, 512>}, {transform_indices = @transform_1, window_bounds = array<i64: 512, 256>}, {transform_indices = @transform_2, window_bounds = array<i64: 1, 256>}, {transform_indices = @transform_3, window_bounds = array<i64: 24, 256>}]} {
    %c0_i32 = arith.constant 0 : i32
    %0 = arith.cmpi eq, %arg2, %c0_i32 : i32
    %1 = arith.extui %0 : i1 to i32
    %c0_i32_0 = arith.constant 0 : i32
    %2 = arith.cmpi ne, %1, %c0_i32_0 : i32
    scf.if %2 {
      %cst_9 = arith.constant 0.000000e+00 : f32
      %12 = vector.broadcast %cst_9 : f32 to vector<24x256xf32>
      %c0_10 = arith.constant 0 : index
      %c0_11 = arith.constant 0 : index
      %13 = vector.load %arg7[%c0_10, %c0_11] : memref<24x256xf32, #tpu.memory_space<vmem>>, vector<24x256xf32>
      tpu.vector_store %arg7[%c0_10, %c0_11], %12 {strides = array<i32>} : memref<24x256xf32, #tpu.memory_space<vmem>>, vector<24x256xf32>,
    } else {
    }
    %c0 = arith.constant 0 : index
    %c0_1 = arith.constant 0 : index
    %3 = vector.load %arg7[%c0, %c0_1] : memref<24x256xf32, #tpu.memory_space<vmem>>, vector<24x256xf32>
    %c0_2 = arith.constant 0 : index
    %c0_3 = arith.constant 0 : index
    %4 = vector.load %arg3[%c0_2, %c0_3] : memref<24x512xbf16, #tpu.memory_space<vmem>>, vector<24x512xbf16>
    %c0_4 = arith.constant 0 : index
    %c0_5 = arith.constant 0 : index
    %5 = vector.load %arg4[%c0_4, %c0_5] : memref<512x256xbf16, #tpu.memory_space<vmem>>, vector<512x256xbf16>
    %cst = arith.constant dense<0.000000e+00> : vector<24x256xf32>
    %6 = tpu.matmul %4, %5, %cst {dimension_numbers = #tpu.dot_dimension_numbers<[1], [0], [0], [1], [0, 0, 1, 1], [], []>} : vector<24x512xbf16>, vector<512x256xbf16>, vector<24x256xf32> -> vector<24x256xf32>
    %7 = arith.addf %3, %6 : vector<24x256xf32>
    %c0_6 = arith.constant 0 : index
    %c0_7 = arith.constant 0 : index
    %8 = vector.load %arg7[%c0_6, %c0_7] : memref<24x256xf32, #tpu.memory_space<vmem>>, vector<24x256xf32>
    tpu.vector_store %arg7[%c0_6, %c0_7], %7 {strides = array<i32>} : memref<24x256xf32, #tpu.memory_space<vmem>>, vector<24x256xf32>,
    %c7_i32 = arith.constant 7 : i32
    %9 = arith.cmpi eq, %arg2, %c7_i32 : i32
    %10 = arith.extui %9 : i1 to i32
    %c0_i32_8 = arith.constant 0 : i32
    %11 = arith.cmpi ne, %10, %c0_i32_8 : i32
    scf.if %11 {
      %c0_9 = arith.constant 0 : index
      %c0_10 = arith.constant 0 : index
      %12 = vector.load %arg7[%c0_9, %c0_10] : memref<24x256xf32, #tpu.memory_space<vmem>>, vector<24x256xf32>
      %c0_11 = arith.constant 0 : index
      %c0_12 = arith.constant 0 : index
      %13 = vector.load %arg5[%c0_11, %c0_12] : memref<1x256xf32, #tpu.memory_space<vmem>>, vector<1x256xf32>
      %14 = vector.broadcast %13 : vector<1x256xf32> to vector<24x256xf32>
      %15 = arith.addf %12, %14 : vector<24x256xf32>
      %c0_13 = arith.constant 0 : index
      %c0_14 = arith.constant 0 : index
      %16 = vector.load %arg6[%c0_13, %c0_14] : memref<24x256xf32, #tpu.memory_space<vmem>>, vector<24x256xf32>
      tpu.vector_store %arg6[%c0_13, %c0_14], %15 {strides = array<i32>} : memref<24x256xf32, #tpu.memory_space<vmem>>, vector<24x256xf32>,
    } else {
    }
    return
  }
  func.func @transform_0(%arg0: i32, %arg1: i32, %arg2: i32) -> (i32, i32) {
    %c0_i32 = arith.constant 0 : i32
    return %arg0, %arg2 : i32, i32
  }
  func.func @transform_1(%arg0: i32, %arg1: i32, %arg2: i32) -> (i32, i32) {
    %c0_i32 = arith.constant 0 : i32
    return %arg2, %arg1 : i32, i32
  }
  func.func @transform_2(%arg0: i32, %arg1: i32, %arg2: i32) -> (i32, i32) {
    %c0_i32 = arith.constant 0 : i32
    %c0_i32_0 = arith.constant 0 : i32
    return %c0_i32, %arg1 : i32, i32
  }
  func.func @transform_3(%arg0: i32, %arg1: i32, %arg2: i32) -> (i32, i32) {
    %c0_i32 = arith.constant 0 : i32
    return %arg0, %arg1 : i32, i32
  }
}

module attributes {stable_mosaic.version = 11 : i64} {
  func.func @_channel_stats_kernel(%arg0: i32, %arg1: memref<24x512xf32, #tpu.memory_space<vmem>>, %arg2: memref<1x512xf32, #tpu.memory_space<vmem>>, %arg3: memref<1x512xf32, #tpu.memory_space<vmem>>) attributes {dimension_semantics = [#tpu.dimension_semantics<arbitrary>], iteration_bounds = array<i64: 1>, scalar_prefetch = 0 : i64, scratch_operands = 0 : i64, tpu.core_type = #tpu.core_type<tc>, window_params = [{transform_indices = @transform_0, window_bounds = array<i64: 24, 512>}, {pipeline_mode = #tpu.pipeline_mode<synchronous>, transform_indices = @transform_1, window_bounds = array<i64: 1, 512>}, {pipeline_mode = #tpu.pipeline_mode<synchronous>, transform_indices = @transform_2, window_bounds = array<i64: 1, 512>}]} {
    %c0_i32 = arith.constant 0 : i32
    %0 = arith.cmpi eq, %arg0, %c0_i32 : i32
    %1 = arith.extui %0 : i1 to i32
    %c0_i32_0 = arith.constant 0 : i32
    %2 = arith.cmpi ne, %1, %c0_i32_0 : i32
    scf.if %2 {
      %cst_11 = arith.constant 0.000000e+00 : f32
      %25 = vector.broadcast %cst_11 : f32 to vector<1x512xf32>
      %c0_12 = arith.constant 0 : index
      %c0_13 = arith.constant 0 : index
      %26 = vector.load %arg2[%c0_12, %c0_13] : memref<1x512xf32, #tpu.memory_space<vmem>>, vector<1x512xf32>
      tpu.vector_store %arg2[%c0_12, %c0_13], %25 {strides = array<i32>} : memref<1x512xf32, #tpu.memory_space<vmem>>, vector<1x512xf32>,
      %cst_14 = arith.constant 0.000000e+00 : f32
      %27 = vector.broadcast %cst_14 : f32 to vector<1x512xf32>
      %c0_15 = arith.constant 0 : index
      %c0_16 = arith.constant 0 : index
      %28 = vector.load %arg3[%c0_15, %c0_16] : memref<1x512xf32, #tpu.memory_space<vmem>>, vector<1x512xf32>
      tpu.vector_store %arg3[%c0_15, %c0_16], %27 {strides = array<i32>} : memref<1x512xf32, #tpu.memory_space<vmem>>, vector<1x512xf32>,
    } else {
    }
    %3 = tpu.iota {dimensions = array<i32: 0>} : vector<24x1xi32>
    %c24_i32 = arith.constant 24 : i32
    %4 = arith.muli %arg0, %c24_i32 : i32
    %5 = vector.broadcast %4 : i32 to vector<24x1xi32>
    %6 = arith.addi %3, %5 : vector<24x1xi32>
    %c18_i32 = arith.constant 18 : i32
    %7 = vector.broadcast %c18_i32 : i32 to vector<24x1xi32>
    %8 = arith.cmpi slt, %6, %7 : vector<24x1xi32>
    %9 = arith.extui %8 : vector<24x1xi1> to vector<24x1xi32>
    %10 = arith.sitofp %9 : vector<24x1xi32> to vector<24x1xf32>
    %c0 = arith.constant 0 : index
    %c0_1 = arith.constant 0 : index
    %11 = vector.load %arg1[%c0, %c0_1] : memref<24x512xf32, #tpu.memory_space<vmem>>, vector<24x512xf32>
    %12 = vector.broadcast %10 : vector<24x1xf32> to vector<24x512xf32>
    %13 = arith.mulf %11, %12 : vector<24x512xf32>
    %c0_2 = arith.constant 0 : index
    %c0_3 = arith.constant 0 : index
    %14 = vector.load %arg2[%c0_2, %c0_3] : memref<1x512xf32, #tpu.memory_space<vmem>>, vector<1x512xf32>
    %cst = arith.constant dense<0.000000e+00> : vector<512xf32>
    %15 = vector.multi_reduction <add>, %13, %cst [0] : vector<24x512xf32> to vector<512xf32>
    %16 = vector.shape_cast %15 : vector<512xf32> to vector<1x512xf32>
    %17 = arith.addf %14, %16 : vector<1x512xf32>
    %c0_4 = arith.constant 0 : index
    %c0_5 = arith.constant 0 : index
    %18 = vector.load %arg2[%c0_4, %c0_5] : memref<1x512xf32, #tpu.memory_space<vmem>>, vector<1x512xf32>
    tpu.vector_store %arg2[%c0_4, %c0_5], %17 {strides = array<i32>} : memref<1x512xf32, #tpu.memory_space<vmem>>, vector<1x512xf32>,
    %c0_6 = arith.constant 0 : index
    %c0_7 = arith.constant 0 : index
    %19 = vector.load %arg3[%c0_6, %c0_7] : memref<1x512xf32, #tpu.memory_space<vmem>>, vector<1x512xf32>
    %20 = arith.mulf %13, %13 : vector<24x512xf32>
    %cst_8 = arith.constant dense<0.000000e+00> : vector<512xf32>
    %21 = vector.multi_reduction <add>, %20, %cst_8 [0] : vector<24x512xf32> to vector<512xf32>
    %22 = vector.shape_cast %21 : vector<512xf32> to vector<1x512xf32>
    %23 = arith.addf %19, %22 : vector<1x512xf32>
    %c0_9 = arith.constant 0 : index
    %c0_10 = arith.constant 0 : index
    %24 = vector.load %arg3[%c0_9, %c0_10] : memref<1x512xf32, #tpu.memory_space<vmem>>, vector<1x512xf32>
    tpu.vector_store %arg3[%c0_9, %c0_10], %23 {strides = array<i32>} : memref<1x512xf32, #tpu.memory_space<vmem>>, vector<1x512xf32>,
    return
  }
  func.func @transform_0(%arg0: i32) -> (i32, i32) {
    %c0_i32 = arith.constant 0 : i32
    %c0_i32_0 = arith.constant 0 : i32
    return %arg0, %c0_i32 : i32, i32
  }
  func.func @transform_1(%arg0: i32) -> (i32, i32) {
    %c0_i32 = arith.constant 0 : i32
    %c0_i32_0 = arith.constant 0 : i32
    %c0_i32_1 = arith.constant 0 : i32
    return %c0_i32, %c0_i32_0 : i32, i32
  }
  func.func @transform_2(%arg0: i32) -> (i32, i32) {
    %c0_i32 = arith.constant 0 : i32
    %c0_i32_0 = arith.constant 0 : i32
    %c0_i32_1 = arith.constant 0 : i32
    return %c0_i32, %c0_i32_0 : i32, i32
  }
}

module attributes {stable_mosaic.version = 11 : i64} {
  func.func @_scale_shift_lrelu_kernel(%arg0: i32, %arg1: memref<24x512xf32, #tpu.memory_space<vmem>>, %arg2: memref<1x512xf32, #tpu.memory_space<vmem>>, %arg3: memref<1x512xf32, #tpu.memory_space<vmem>>, %arg4: memref<24x512xf32, #tpu.memory_space<vmem>>) attributes {dimension_semantics = [#tpu.dimension_semantics<parallel>], iteration_bounds = array<i64: 1>, scalar_prefetch = 0 : i64, scratch_operands = 0 : i64, tpu.core_type = #tpu.core_type<tc>, window_params = [{transform_indices = @transform_0, window_bounds = array<i64: 24, 512>}, {pipeline_mode = #tpu.pipeline_mode<synchronous>, transform_indices = @transform_1, window_bounds = array<i64: 1, 512>}, {pipeline_mode = #tpu.pipeline_mode<synchronous>, transform_indices = @transform_2, window_bounds = array<i64: 1, 512>}, {transform_indices = @transform_3, window_bounds = array<i64: 24, 512>}]} {
    %c0 = arith.constant 0 : index
    %c0_0 = arith.constant 0 : index
    %0 = vector.load %arg1[%c0, %c0_0] : memref<24x512xf32, #tpu.memory_space<vmem>>, vector<24x512xf32>
    %c0_1 = arith.constant 0 : index
    %c0_2 = arith.constant 0 : index
    %1 = vector.load %arg2[%c0_1, %c0_2] : memref<1x512xf32, #tpu.memory_space<vmem>>, vector<1x512xf32>
    %2 = vector.broadcast %1 : vector<1x512xf32> to vector<24x512xf32>
    %3 = arith.mulf %0, %2 : vector<24x512xf32>
    %c0_3 = arith.constant 0 : index
    %c0_4 = arith.constant 0 : index
    %4 = vector.load %arg3[%c0_3, %c0_4] : memref<1x512xf32, #tpu.memory_space<vmem>>, vector<1x512xf32>
    %5 = vector.broadcast %4 : vector<1x512xf32> to vector<24x512xf32>
    %6 = arith.addf %3, %5 : vector<24x512xf32>
    %cst = arith.constant 0.000000e+00 : f32
    %7 = vector.broadcast %cst : f32 to vector<24x512xf32>
    %8 = arith.cmpf oge, %6, %7 : vector<24x512xf32>
    %cst_5 = arith.constant 2.000000e-01 : f32
    %9 = vector.broadcast %cst_5 : f32 to vector<24x512xf32>
    %10 = arith.mulf %9, %6 : vector<24x512xf32>
    %11 = arith.select %8, %6, %10 : vector<24x512xi1>, vector<24x512xf32>
    %c0_6 = arith.constant 0 : index
    %c0_7 = arith.constant 0 : index
    %12 = vector.load %arg4[%c0_6, %c0_7] : memref<24x512xf32, #tpu.memory_space<vmem>>, vector<24x512xf32>
    tpu.vector_store %arg4[%c0_6, %c0_7], %11 {strides = array<i32>} : memref<24x512xf32, #tpu.memory_space<vmem>>, vector<24x512xf32>,
    return
  }
  func.func @transform_0(%arg0: i32) -> (i32, i32) {
    %c0_i32 = arith.constant 0 : i32
    %c0_i32_0 = arith.constant 0 : i32
    return %arg0, %c0_i32 : i32, i32
  }
  func.func @transform_1(%arg0: i32) -> (i32, i32) {
    %c0_i32 = arith.constant 0 : i32
    %c0_i32_0 = arith.constant 0 : i32
    %c0_i32_1 = arith.constant 0 : i32
    return %c0_i32, %c0_i32_0 : i32, i32
  }
  func.func @transform_2(%arg0: i32) -> (i32, i32) {
    %c0_i32 = arith.constant 0 : i32
    %c0_i32_0 = arith.constant 0 : i32
    %c0_i32_1 = arith.constant 0 : i32
    return %c0_i32, %c0_i32_0 : i32, i32
  }
  func.func @transform_3(%arg0: i32) -> (i32, i32) {
    %c0_i32 = arith.constant 0 : i32
    %c0_i32_0 = arith.constant 0 : i32
    return %arg0, %c0_i32 : i32, i32
  }
}

module attributes {stable_mosaic.version = 11 : i64} {
  func.func @_matmul_kernel(%arg0: i32, %arg1: i32, %arg2: i32, %arg3: memref<8x512xbf16, #tpu.memory_space<vmem>>, %arg4: memref<512x128xbf16, #tpu.memory_space<vmem>>, %arg5: memref<1x128xf32, #tpu.memory_space<vmem>>, %arg6: memref<8x128xf32, #tpu.memory_space<vmem>>, %arg7: memref<8x128xf32, #tpu.memory_space<vmem>>) attributes {dimension_semantics = [#tpu.dimension_semantics<parallel>, #tpu.dimension_semantics<parallel>, #tpu.dimension_semantics<arbitrary>], iteration_bounds = array<i64: 1, 1, 16>, scalar_prefetch = 0 : i64, scratch_operands = 1 : i64, tpu.core_type = #tpu.core_type<tc>, window_params = [{transform_indices = @transform_0, window_bounds = array<i64: 8, 512>}, {transform_indices = @transform_1, window_bounds = array<i64: 512, 128>}, {transform_indices = @transform_2, window_bounds = array<i64: 1, 128>}, {transform_indices = @transform_3, window_bounds = array<i64: 8, 128>}]} {
    %c0_i32 = arith.constant 0 : i32
    %0 = arith.cmpi eq, %arg2, %c0_i32 : i32
    %1 = arith.extui %0 : i1 to i32
    %c0_i32_0 = arith.constant 0 : i32
    %2 = arith.cmpi ne, %1, %c0_i32_0 : i32
    scf.if %2 {
      %cst_9 = arith.constant 0.000000e+00 : f32
      %12 = vector.broadcast %cst_9 : f32 to vector<8x128xf32>
      %c0_10 = arith.constant 0 : index
      %c0_11 = arith.constant 0 : index
      %13 = vector.load %arg7[%c0_10, %c0_11] : memref<8x128xf32, #tpu.memory_space<vmem>>, vector<8x128xf32>
      tpu.vector_store %arg7[%c0_10, %c0_11], %12 {strides = array<i32>} : memref<8x128xf32, #tpu.memory_space<vmem>>, vector<8x128xf32>,
    } else {
    }
    %c0 = arith.constant 0 : index
    %c0_1 = arith.constant 0 : index
    %3 = vector.load %arg7[%c0, %c0_1] : memref<8x128xf32, #tpu.memory_space<vmem>>, vector<8x128xf32>
    %c0_2 = arith.constant 0 : index
    %c0_3 = arith.constant 0 : index
    %4 = vector.load %arg3[%c0_2, %c0_3] : memref<8x512xbf16, #tpu.memory_space<vmem>>, vector<8x512xbf16>
    %c0_4 = arith.constant 0 : index
    %c0_5 = arith.constant 0 : index
    %5 = vector.load %arg4[%c0_4, %c0_5] : memref<512x128xbf16, #tpu.memory_space<vmem>>, vector<512x128xbf16>
    %cst = arith.constant dense<0.000000e+00> : vector<8x128xf32>
    %6 = tpu.matmul %4, %5, %cst {dimension_numbers = #tpu.dot_dimension_numbers<[1], [0], [0], [1], [0, 0, 1, 1], [], []>} : vector<8x512xbf16>, vector<512x128xbf16>, vector<8x128xf32> -> vector<8x128xf32>
    %7 = arith.addf %3, %6 : vector<8x128xf32>
    %c0_6 = arith.constant 0 : index
    %c0_7 = arith.constant 0 : index
    %8 = vector.load %arg7[%c0_6, %c0_7] : memref<8x128xf32, #tpu.memory_space<vmem>>, vector<8x128xf32>
    tpu.vector_store %arg7[%c0_6, %c0_7], %7 {strides = array<i32>} : memref<8x128xf32, #tpu.memory_space<vmem>>, vector<8x128xf32>,
    %c15_i32 = arith.constant 15 : i32
    %9 = arith.cmpi eq, %arg2, %c15_i32 : i32
    %10 = arith.extui %9 : i1 to i32
    %c0_i32_8 = arith.constant 0 : i32
    %11 = arith.cmpi ne, %10, %c0_i32_8 : i32
    scf.if %11 {
      %c0_9 = arith.constant 0 : index
      %c0_10 = arith.constant 0 : index
      %12 = vector.load %arg7[%c0_9, %c0_10] : memref<8x128xf32, #tpu.memory_space<vmem>>, vector<8x128xf32>
      %c0_11 = arith.constant 0 : index
      %c0_12 = arith.constant 0 : index
      %13 = vector.load %arg5[%c0_11, %c0_12] : memref<1x128xf32, #tpu.memory_space<vmem>>, vector<1x128xf32>
      %14 = vector.broadcast %13 : vector<1x128xf32> to vector<8x128xf32>
      %15 = arith.addf %12, %14 : vector<8x128xf32>
      %16 = arith.negf %15 : vector<8x128xf32>
      %17 = math.exp %16 : vector<8x128xf32>
      %cst_13 = arith.constant 1.000000e+00 : f32
      %18 = vector.broadcast %cst_13 : f32 to vector<8x128xf32>
      %19 = arith.addf %18, %17 : vector<8x128xf32>
      %20 = arith.divf %18, %19 : vector<8x128xf32>
      %c0_14 = arith.constant 0 : index
      %c0_15 = arith.constant 0 : index
      %21 = vector.load %arg6[%c0_14, %c0_15] : memref<8x128xf32, #tpu.memory_space<vmem>>, vector<8x128xf32>
      tpu.vector_store %arg6[%c0_14, %c0_15], %20 {strides = array<i32>} : memref<8x128xf32, #tpu.memory_space<vmem>>, vector<8x128xf32>,
    } else {
    }
    return
  }
  func.func @transform_0(%arg0: i32, %arg1: i32, %arg2: i32) -> (i32, i32) {
    %c0_i32 = arith.constant 0 : i32
    return %arg0, %arg2 : i32, i32
  }
  func.func @transform_1(%arg0: i32, %arg1: i32, %arg2: i32) -> (i32, i32) {
    %c0_i32 = arith.constant 0 : i32
    return %arg2, %arg1 : i32, i32
  }
  func.func @transform_2(%arg0: i32, %arg1: i32, %arg2: i32) -> (i32, i32) {
    %c0_i32 = arith.constant 0 : i32
    %c0_i32_0 = arith.constant 0 : i32
    return %c0_i32, %arg1 : i32, i32
  }
  func.func @transform_3(%arg0: i32, %arg1: i32, %arg2: i32) -> (i32, i32) {
    %c0_i32 = arith.constant 0 : i32
    return %arg0, %arg1 : i32, i32
  }
}

</mosaic_0001>

<bundles_post_ra>
// kernel: patchgan_forward.11
= control target key start
LH: loop header
LB: loop body
LE: loop exit
PB: predicated region body
PF: predicated region fallthrough
CT: control target
= control target key end

     0   :  { %s1993_s12 = smov 0   ;;  %s1995_s13 = smov 0   ;;  %s2262_s0 = inlined_call_operand.vmem [shape: bf16[512,384], index: 0, kind: input, shape index: {}]   ;;  %s2263_s1 = inlined_call_operand.vmem [shape: bf16[384,128], index: 1, kind: input, shape index: {}]   ;;  %s2264_s2 = inlined_call_operand.vmem [shape: f32[1,128], index: 2, kind: input, shape index: {}]   ;;  %s2265_s3 = inlined_call_operand.vmem [shape: f32[512,128], index: 3, kind: output, shape index: {}]  }
   0x1   :  { %s1997_s14 = smov 0  }
   0x2 LB: > { %s32_s15 = sadd.s32 1, %s1967_s13  ;;  %p1556_p0 = scmp.ge.s32.totalorder %s1971_s14, 1  ;;  %s1971_s14 = sphi %s1997_s14, %s13_s14   ;;  %s1967_s13 = sphi %s1995_s13, %s2267_s13   ;;  %s1963_s12 = sphi %s1993_s12, %s2266_s12  }
   0x3   : > { %p34_p1 = scmp.ge.s32.totalorder %s32_s15, 2  ;;  %p191_p2 = scmp.lt.s32.totalorder %s1971_s14, 3 }
   0x5   : > { %s2269_s15 = smov (%p34_p1, %s32_s15), 0  ;;  %p192_p3 = pnand %p1556_p0, %p191_p2 }
   0x6   : > { %v1861_v0 = vld [vmem:[%s2263_s1 + $0x40] sm:$0xff] (!%p192_p3)   ;;  %s1557_s18 = sshll.u32 (!%p192_p3), %s1963_s12, 5  ;;  %v1863_v2 = vld [vmem:[%s2263_s1 + $0x48] sm:$0xff] (!%p192_p3)   ;;  %v1865_v4 = vld [vmem:[%s2263_s1 + $0x50] sm:$0xff] (!%p192_p3)  }
   0x7   : > { %195 = sbr.rel (%p192_p3) target bundleno = 354 (0x162), region = 32  ;;  %v1862_v1 = vld [vmem:[%s2263_s1] sm:$0xff] (!%p192_p3)   ;;  %1636 = vmatprep.subr.bf16.mxu0 (!%p192_p3), %v1861_v0  ;;  %1820 = vmatprep.subr.bf16.mxu1 (!%p192_p3), %v1861_v0  ;;  %p236_p4 = scmp.lt.s32.totalorder (!%p192_p3), %s1557_s18, 63  ;;  %v1864_v3 = vld [vmem:[%s2263_s1 + $0x8] sm:$0xff] (!%p192_p3)   ;;  %v1866_v5 = vld [vmem:[%s2263_s1 + $0x10] sm:$0xff] (!%p192_p3)  }
   0x8   : > { %1637 = vmatpush3.bf16.msra.mxu0 (!%p192_p3), %v1862_v1  ;;  %1828 = vmatpush3.bf16.msra.mxu1 (!%p192_p3), %v1862_v1  ;;  %v1867_v6 = vld [vmem:[%s2263_s1 + $0x58] sm:$0xff] (!%p192_p3)   ;;  %v1869_v8 = vld [vmem:[%s2263_s1 + $0x60] sm:$0xff] (!%p192_p3)   ;;  %v1871_v10 = vld [vmem:[%s2263_s1 + $0x68] sm:$0xff] (!%p192_p3)  }
   0x9   : > { %1638 = vmatprep.subr.bf16.mxu0 (!%p192_p3), %v1863_v2  ;;  %1821 = vmatprep.subr.bf16.mxu1 (!%p192_p3), %v1863_v2  ;;  %v1868_v7 = vld [vmem:[%s2263_s1 + $0x18] sm:$0xff] (!%p192_p3)   ;;  %v1870_v9 = vld [vmem:[%s2263_s1 + $0x20] sm:$0xff] (!%p192_p3)   ;;  %v1872_v13 = vld [vmem:[%s2263_s1 + $0x28] sm:$0xff] (!%p192_p3)  }
   0xa   : > { %v1873_v14 = vld [vmem:[%s2263_s1 + $0x70] sm:$0xff] (!%p192_p3)   ;;  %v1875_v16 = vld [vmem:[%s2263_s1 + $0x78] sm:$0xff] (!%p192_p3)   ;;  %v1883_v18 = vld [vmem:[%s2263_s1 + $0x80] sm:$0xff] (!%p192_p3)  }
   0xb   : > { %v1874_v15 = vld [vmem:[%s2263_s1 + $0x30] sm:$0xff] (!%p192_p3)   ;;  %v1876_v17 = vld [vmem:[%s2263_s1 + $0x38] sm:$0xff] (!%p192_p3)   ;;  %v1884_v22 = vld [vmem:[%s2263_s1 + $0x88] sm:$0xff] (!%p192_p3)  }
   0xc   : > { %1639 = vmatpush3.bf16.msra.mxu0 (!%p192_p3), %v1864_v3  ;;  %1829 = vmatpush3.bf16.msra.mxu1 (!%p192_p3), %v1864_v3  ;;  %v1891_v25 = vld [vmem:[%s2263_s1 + $0x90] sm:$0xff] (!%p192_p3)   ;;  %v1892_v27 = vld [vmem:[%s2263_s1 + $0x98] sm:$0xff] (!%p192_p3)   ;;  %v1899_v30 = vld [vmem:[%s2263_s1 + $0xa0] sm:$0xff] (!%p192_p3)  }
   0xd   : > { %1640 = vmatprep.subr.bf16.mxu0 (!%p192_p3), %v1865_v4  ;;  %1822 = vmatprep.subr.bf16.mxu1 (!%p192_p3), %v1865_v4  ;;  %v1900_v33 = vld [vmem:[%s2263_s1 + $0xa8] sm:$0xff] (!%p192_p3)   ;;  %v1907_v36 = vld [vmem:[%s2263_s1 + $0xb0] sm:$0xff] (!%p192_p3)   ;;  %v1908_v40 = vld [vmem:[%s2263_s1 + $0xb8] sm:$0xff] (!%p192_p3)  }
   0xe   : > { %s2271_s18 = smov (!%p236_p4, %s1557_s18), 63 }
   0xf   : > { %s1836_s4 = smul.u32 12, %s2271_s18  ;;  %s1560_s25 = sshll.u32 %s2271_s18, 3 }
  0x10   : > { %1641 = vmatpush3.bf16.msra.mxu0 %v1866_v5  ;;  %1830 = vmatpush3.bf16.msra.mxu1 %v1866_v5  ;;  %s2172_s28 = scalar_lea.vmem %s2265_s3, %s1560_s25 }
  0x11   : > { %1642 = vmatprep.subr.bf16.mxu0 %v1867_v6  ;;  %1823 = vmatprep.subr.bf16.mxu1 %v1867_v6  ;;  %s2044_s11 = scalar_lea.vmem %s2262_s0, %s1836_s4 }
  0x12   : > { %v1879_v11 = vld [vmem:[%s2044_s11 + $0x4] ss:$12 sps:$4 sm:$0xff]   ;;  %v1877_v19 = vld [vmem:[%s2044_s11] ss:$12 sps:$4 sm:$0xff]   ;;  %v1885_v21 = vld [vmem:[%s2044_s11 + $0x1c] ss:$12 sps:$4 sm:$0xff]  }
  0x13   : > { %v1882_v12 = vld [vmem:[%s2044_s11 + $0x124] ss:$12 sps:$4 sm:$0xff]   ;;  %880 = vmatprep.mubr.bf16.mxu0 %v1879_v11  ;;  %v1880_v20 = vld [vmem:[%s2044_s11 + $0x120] ss:$12 sps:$4 sm:$0xff]   ;;  %v1887_v23 = vld [vmem:[%s2044_s11 + $0x13c] ss:$12 sps:$4 sm:$0xff]  }
  0x14   : > { %1643 = vmatpush3.bf16.msra.mxu0 %v1868_v7  ;;  %1831 = vmatpush3.bf16.msra.mxu1 %v1868_v7  ;;  %v1889_v24 = vld [vmem:[%s2044_s11 + $0x18] ss:$12 sps:$4 sm:$0xff]   ;;  %v1893_v28 = vld [vmem:[%s2044_s11 + $0x34] ss:$12 sps:$4 sm:$0xff]   ;;  %v1897_v31 = vld [vmem:[%s2044_s11 + $0x30] ss:$12 sps:$4 sm:$0xff]  }
  0x15   : > { %1644 = vmatprep.subr.bf16.mxu0 %v1869_v8  ;;  %1824 = vmatprep.subr.bf16.mxu1 %v1869_v8  ;;  %v1890_v26 = vld [vmem:[%s2044_s11 + $0x138] ss:$12 sps:$4 sm:$0xff]   ;;  %v1895_v29 = vld [vmem:[%s2044_s11 + $0x154] ss:$12 sps:$4 sm:$0xff]   ;;  %v1898_v32 = vld [vmem:[%s2044_s11 + $0x150] ss:$12 sps:$4 sm:$0xff]  }
  0x16   : > { %976 = vmatprep.mubr.bf16.mxu1 %v1882_v12  ;;  %v1901_v34 = vld [vmem:[%s2044_s11 + $0x4c] ss:$12 sps:$4 sm:$0xff]   ;;  %v1905_v37 = vld [vmem:[%s2044_s11 + $0x48] ss:$12 sps:$4 sm:$0xff]   ;;  %v1909_v39 = vld [vmem:[%s2044_s11 + $0x64] ss:$12 sps:$4 sm:$0xff]  }
  0x17   : > { %v1903_v35 = vld [vmem:[%s2044_s11 + $0x16c] ss:$12 sps:$4 sm:$0xff]   ;;  %v1906_v38 = vld [vmem:[%s2044_s11 + $0x168] ss:$12 sps:$4 sm:$0xff]   ;;  %v1918_v47 = vld [vmem:[%s2044_s11 + $0x50] ss:$12 sps:$4 sm:$0xff]  }
  0x18   : > { %1645 = vmatpush3.bf16.msra.mxu0 %v1870_v9  ;;  %1832 = vmatpush3.bf16.msra.mxu1 %v1870_v9  ;;  %v1911_v41 = vld [vmem:[%s2044_s11 + $0x8] ss:$12 sps:$4 sm:$0xff]   ;;  %v1912_v42 = vld [vmem:[%s2044_s11 + $0x60] ss:$12 sps:$4 sm:$0xff]   ;;  %v1916_v45 = vld [vmem:[%s2044_s11 + $0x38] ss:$12 sps:$4 sm:$0xff]  }
  0x19   : > { %1646 = vmatprep.subr.bf16.mxu0 %v1871_v10  ;;  %1825 = vmatprep.subr.bf16.mxu1 %v1871_v10  ;;  %v1913_v43 = vld [vmem:[%s2044_s11 + $0x20] ss:$12 sps:$4 sm:$0xff]   ;;  %v1914_v44 = vld [vmem:[%s2044_s11 + $0x7c] ss:$12 sps:$4 sm:$0xff]   ;;  %v1917_v46 = vld [vmem:[%s2044_s11 + $0x78] ss:$12 sps:$4 sm:$0xff]  }
  0x1a   : > { %v1919_v48 = vld [vmem:[%s2044_s11 + $0x94] ss:$12 sps:$4 sm:$0xff]   ;;  %v1922_v50 = vld [vmem:[%s2044_s11 + $0x90] ss:$12 sps:$4 sm:$0xff]   ;;  %v1924_v52 = vld [vmem:[%s2044_s11 + $0xac] ss:$12 sps:$4 sm:$0xff]  }
  0x1b   : > { %v1921_v49 = vld [vmem:[%s2044_s11 + $0x68] ss:$12 sps:$4 sm:$0xff]   ;;  %v1923_v51 = vld [vmem:[%s2044_s11 + $0x80] ss:$12 sps:$4 sm:$0xff]   ;;  %v1926_v53 = vld [vmem:[%s2044_s11 + $0x98] ss:$12 sps:$4 sm:$0xff]  }
  0x1c   : > { %1647 = vmatpush3.bf16.msra.mxu0 %v1872_v13  ;;  %1833 = vmatpush3.bf16.msra.mxu1 %v1872_v13  ;;  %v1927_v54 = vld [vmem:[%s2044_s11 + $0xa8] ss:$12 sps:$4 sm:$0xff]   ;;  %v1928_v55 = vld [vmem:[%s2044_s11 + $0xb0] ss:$12 sps:$4 sm:$0xff]   ;;  %v1932_v58 = vld [vmem:[%s2044_s11 + $0xc0] ss:$12 sps:$4 sm:$0xff]  }
  0x1d   : > { %1648 = vmatprep.subr.bf16.mxu0 %v1873_v14  ;;  %1826 = vmatprep.subr.bf16.mxu1 %v1873_v14  ;;  %v1929_v56 = vld [vmem:[%s2044_s11 + $0xc4] ss:$12 sps:$4 sm:$0xff]   ;;  %v1931_v57 = vld [vmem:[%s2044_s11 + $0xc8] ss:$12 sps:$4 sm:$0xff]   ;;  %v1933_v59 = vld [vmem:[%s2044_s11 + $0xe0] ss:$12 sps:$4 sm:$0xff]  }
  0x1e   : > { %v1934_v60 = vld [vmem:[%s2044_s11 + $0xdc] ss:$12 sps:$4 sm:$0xff]   ;;  %v1936_v61 = vld [vmem:[%s2044_s11 + $0xf8] ss:$12 sps:$4 sm:$0xff]   ;;  %v1939_v0 = vld [vmem:[%s2044_s11 + $0xf4] ss:$12 sps:$4 sm:$0xff]  }
  0x1f   : > { %v1937_v62 = vld [vmem:[%s2044_s11 + $0xd8] ss:$12 sps:$4 sm:$0xff]   ;;  %v1938_v63 = vld [vmem:[%s2044_s11 + $0x110] ss:$12 sps:$4 sm:$0xff]   ;;  %v1941_v1 = vld [vmem:[%s2044_s11 + $0x128] ss:$12 sps:$4 sm:$0xff]  }
  0x20   : > { %1649 = vmatpush3.bf16.msra.mxu0 %v1874_v15  ;;  %1834 = vmatpush3.bf16.msra.mxu1 %v1874_v15  ;;  %v1942_v2 = vld [vmem:[%s2044_s11 + $0xf0] ss:$12 sps:$4 sm:$0xff]   ;;  %v1943_v3 = vld [vmem:[%s2044_s11 + $0x140] ss:$12 sps:$4 sm:$0xff]   ;;  %v1946_v5 = vld [vmem:[%s2044_s11 + $0x158] ss:$12 sps:$4 sm:$0xff]  }
  0x21   : > { %1650 = vmatprep.subr.bf16.mxu0 %v1875_v16  ;;  %1827 = vmatprep.subr.bf16.mxu1 %v1875_v16  ;;  %v1944_v4 = vld [vmem:[%s2044_s11 + $0x10c] ss:$12 sps:$4 sm:$0xff]   ;;  %v1947_v6 = vld [vmem:[%s2044_s11 + $0x108] ss:$12 sps:$4 sm:$0xff]   ;;  %v1948_v7 = vld [vmem:[%s2044_s11 + $0x170] ss:$12 sps:$4 sm:$0xff]  }
  0x24   : > { %1651 = vmatpush3.bf16.msra.mxu0 %v1876_v17  ;;  %1835 = vmatpush3.bf16.msra.mxu1 %v1876_v17 }
  0x25   : > { %1772 = vmatprep.subr.bf16.mxu1 %v1883_v18 }
  0x27   : > { %881 = vmatmul.mubr.bf16.vlgmr.msra.gmra.mrb[0].mxu0 %v1877_v19  ;;  %977 = vmatmul.mubr.bf16.vlgmr.msra.gmra.mrb[0].mxu1 %v1880_v20 }
  0x28   : > { %1773 = vmatpush3.bf16.msra.mxu1 %v1883_v18  ;;  %888 = vmatprep.mubr.bf16.mxu0 %v1885_v21 }
  0x29   : > { %1774 = vmatprep.subr.bf16.mxu1 %v1884_v22  ;;  %984 = vmatprep.mubr.bf16.mxu1 %v1887_v23 }
  0x2c   : > { %1775 = vmatpush3.bf16.msra.mxu1 %v1884_v22 }
  0x2d   : > { %1776 = vmatprep.subr.bf16.mxu1 %v1891_v25 }
  0x2f   : > { %889 = vmatmul.mubr.bf16.gmra.mrb[4].mxu0 %v1889_v24  ;;  %985 = vmatmul.mubr.bf16.gmra.mrb[4].mxu1 %v1890_v26 }
  0x30   : > { %1777 = vmatpush3.bf16.msra.mxu1 %v1891_v25  ;;  %896 = vmatprep.mubr.bf16.mxu0 %v1893_v28 }
  0x31   : > { %1778 = vmatprep.subr.bf16.mxu1 %v1892_v27  ;;  %992 = vmatprep.mubr.bf16.mxu1 %v1895_v29 }
  0x34   : > { %1779 = vmatpush3.bf16.msra.mxu1 %v1892_v27 }
  0x35   : > { %1780 = vmatprep.subr.bf16.mxu1 %v1899_v30 }
  0x37   : > { %897 = vmatmul.mubr.bf16.gmra.mrb[8].mxu0 %v1897_v31  ;;  %993 = vmatmul.mubr.bf16.gmra.mrb[8].mxu1 %v1898_v32 }
  0x38   : > { %1781 = vmatpush3.bf16.msra.mxu1 %v1899_v30  ;;  %904 = vmatprep.mubr.bf16.mxu0 %v1901_v34 }
  0x39   : > { %1782 = vmatprep.subr.bf16.mxu1 %v1900_v33  ;;  %1000 = vmatprep.mubr.bf16.mxu1 %v1903_v35 }
  0x3c   : > { %1783 = vmatpush3.bf16.msra.mxu1 %v1900_v33 }
  0x3d   : > { %1784 = vmatprep.subr.bf16.mxu1 %v1907_v36 }
  0x3f   : > { %905 = vmatmul.mubr.bf16.gmra.mrb[12].mxu0 %v1905_v37  ;;  %1001 = vmatmul.mubr.bf16.gmra.mrb[12].mxu1 %v1906_v38 }
  0x40   : > { %1785 = vmatpush3.bf16.msra.mxu1 %v1907_v36  ;;  %912 = vmatprep.mubr.bf16.mxu0 %v1909_v39 }
  0x41   : > { %1786 = vmatprep.subr.bf16.mxu1 %v1908_v40  ;;  %1788 = vmatprep.mubr.bf16.mxu1 %v1911_v41 }
  0x44   : > { %1787 = vmatpush3.bf16.msra.mxu1 %v1908_v40 }
  0x47   : > { %913 = vmatmul.mubr.bf16.gmra.mrb[16].mxu0 %v1912_v42  ;;  %1789 = vmatmul.mubr.bf16.vlgmr.msra.gmra.mrb[16].mxu1 %v1913_v43 }
  0x48   : > { %920 = vmatprep.mubr.bf16.mxu0 %v1914_v44  ;;  %1792 = vmatprep.mubr.bf16.mxu1 %v1916_v45 }
  0x4f   : > { %921 = vmatmul.mubr.bf16.gmra.mrb[20].mxu0 %v1917_v46  ;;  %1793 = vmatmul.mubr.bf16.gmra.mrb[20].mxu1 %v1918_v47 }
  0x50   : > { %928 = vmatprep.mubr.bf16.mxu0 %v1919_v48  ;;  %1796 = vmatprep.mubr.bf16.mxu1 %v1921_v49 }
  0x57   : > { %929 = vmatmul.mubr.bf16.gmra.mrb[24].mxu0 %v1922_v50  ;;  %1797 = vmatmul.mubr.bf16.gmra.mrb[24].mxu1 %v1923_v51 }
  0x58   : > { %936 = vmatprep.mubr.bf16.mxu0 %v1924_v52  ;;  %1800 = vmatprep.mubr.bf16.mxu1 %v1926_v53 }
  0x5f   : > { %937 = vmatmul.mubr.bf16.gmra.mrb[28].mxu0 %v1927_v54  ;;  %1801 = vmatmul.mubr.bf16.gmra.mrb[28].mxu1 %v1928_v55 }
  0x60   : > { %944 = vmatprep.mubr.bf16.mxu0 %v1929_v56  ;;  %1804 = vmatprep.mubr.bf16.mxu1 %v1931_v57 }
  0x67   : > { %945 = vmatmul.mubr.bf16.gmra.mrb[32].mxu0 %v1932_v58  ;;  %1805 = vmatmul.mubr.bf16.gmra.mrb[32].mxu1 %v1933_v59  ;;  %v2160_v58 = vld [vmem:[%s2264_s2] ss:$0 sm:$0xff] }
  0x68   : > { %952 = vmatprep.mubr.bf16.mxu0 %v1934_v60  ;;  %1808 = vmatprep.mubr.bf16.mxu1 %v1936_v61 }
  0x6f   : > { %953 = vmatmul.mubr.bf16.gmra.mrb[36].mxu0 %v1937_v62  ;;  %1809 = vmatmul.mubr.bf16.gmra.mrb[36].mxu1 %v1938_v63 }
  0x70   : > { %960 = vmatprep.mubr.bf16.mxu0 %v1939_v0  ;;  %1812 = vmatprep.mubr.bf16.mxu1 %v1941_v1 }
  0x77   : > { %961 = vmatmul.mubr.bf16.gmra.mrb[40].mxu0 %v1942_v2  ;;  %1813 = vmatmul.mubr.bf16.gmra.mrb[40].mxu1 %v1943_v3 }
  0x78   : > { %968 = vmatprep.mubr.bf16.mxu0 %v1944_v4  ;;  %1816 = vmatprep.mubr.bf16.mxu1 %v1946_v5 }
  0x7f   : > { %969 = vmatmul.mubr.bf16.gmra.mrb[44].mxu0 %v1947_v6  ;;  %1817 = vmatmul.mubr.bf16.gmra.mrb[44].mxu1 %v1948_v7 }
  0xfa   : > { %v1652_v8 = vpop.f32.mrb[0].mxu0  ;;  %v1724_v9 = vpop.f32.mrb[0].mxu1 }
  0xfb   : > { %v1653_v10 = vpop.f32.mrb[1].mxu0  ;;  %v1725_v11 = vpop.f32.mrb[1].mxu1 }
  0xfc   : > { %v1654_v12 = vadd.f32 %v1653_v10, %v1652_v8  ;;  %v2139_v13 = vadd.f32 %v1725_v11, %v1724_v9  ;;  %v1655_v14 = vpop.f32.mrb[2].mxu0  ;;  %v1727_v15 = vpop.f32.mrb[2].mxu1 }
  0xfd   : > { %v1656_v16 = vpop.f32.mrb[3].mxu0  ;;  %v1728_v17 = vpop.f32.mrb[3].mxu1 }
  0xfe   : > { %v1657_v18 = vadd.f32 %v1656_v16, %v1655_v14  ;;  %v2141_v19 = vadd.f32 %v1728_v17, %v1727_v15 }
 0x102   : > { %v1658_v20 = vpop.f32.mrb[4].mxu0  ;;  %v1730_v21 = vpop.f32.mrb[4].mxu1 }
 0x103   : > { %v1659_v22 = vpop.f32.mrb[5].mxu0  ;;  %v1731_v23 = vpop.f32.mrb[5].mxu1 }
 0x104   : > { %v1660_v24 = vadd.f32 %v1659_v22, %v1658_v20  ;;  %v2143_v25 = vadd.f32 %v1731_v23, %v1730_v21  ;;  %v1661_v26 = vpop.f32.mrb[6].mxu0  ;;  %v1733_v27 = vpop.f32.mrb[6].mxu1 }
 0x105   : > { %v1662_v28 = vpop.f32.mrb[7].mxu0  ;;  %v1734_v29 = vpop.f32.mrb[7].mxu1 }
 0x106   : > { %v1663_v30 = vadd.f32 %v1662_v28, %v1661_v26  ;;  %v2145_v31 = vadd.f32 %v1734_v29, %v1733_v27 }
 0x10a   : > { %v1664_v32 = vpop.f32.mrb[8].mxu0  ;;  %v1736_v33 = vpop.f32.mrb[8].mxu1 }
 0x10b   : > { %v1665_v34 = vpop.f32.mrb[9].mxu0  ;;  %v1737_v35 = vpop.f32.mrb[9].mxu1 }
 0x10c   : > { %v1666_v36 = vadd.f32 %v1665_v34, %v1664_v32  ;;  %v2147_v37 = vadd.f32 %v1737_v35, %v1736_v33  ;;  %v1667_v38 = vpop.f32.mrb[10].mxu0  ;;  %v1739_v39 = vpop.f32.mrb[10].mxu1 }
 0x10d   : > { %v1668_v40 = vpop.f32.mrb[11].mxu0  ;;  %v1740_v41 = vpop.f32.mrb[11].mxu1 }
 0x10e   : > { %v2149_v42 = vadd.f32 %v1668_v40, %v1667_v38  ;;  %v2151_v43 = vadd.f32 %v1740_v41, %v1739_v39 }
 0x112   : > { %v1670_v44 = vpop.f32.mrb[12].mxu0  ;;  %v1742_v45 = vpop.f32.mrb[12].mxu1 }
 0x113   : > { %v1671_v46 = vpop.f32.mrb[13].mxu0  ;;  %v1743_v47 = vpop.f32.mrb[13].mxu1 }
 0x114   : > { %v1672_v48 = vadd.f32 %v1671_v46, %v1670_v44  ;;  %v2153_v49 = vadd.f32 %v1743_v47, %v1742_v45  ;;  %v1673_v50 = vpop.f32.mrb[14].mxu0  ;;  %v1745_v51 = vpop.f32.mrb[14].mxu1 }
 0x115   : > { %v1674_v52 = vpop.f32.mrb[15].mxu0  ;;  %v1746_v53 = vpop.f32.mrb[15].mxu1 }
 0x116   : > { %v1675_v54 = vadd.f32 %v1674_v52, %v1673_v50  ;;  %v2155_v55 = vadd.f32 %v1746_v53, %v1745_v51 }
 0x11a   : > { %v1676_v56 = vpop.f32.mrb[16].mxu0  ;;  %v1790_v57 = vpop.f32.mrb[16].mxu1 }
 0x11b   : > { %v1052_v59 = vadd.f32 %v1790_v57, %v1660_v24  ;;  %v1677_v60 = vpop.f32.mrb[17].mxu0  ;;  %v1043_v61 = vpop.f32.mrb[17].mxu1 }
 0x11c   : > { %v2163_v62 = vadd.f32 %v1677_v60, %v1676_v56  ;;  %v1044_v63 = vadd.f32 %v1654_v12, %v1043_v61  ;;  %v1679_v0 = vpop.f32.mrb[18].mxu0  ;;  %v1791_v1 = vpop.f32.mrb[18].mxu1 }
 0x11d   : > { %v1278_v2 = vadd.f32 %v2160_v58, %v1052_v59  ;;  %v1055_v3 = vadd.f32 %v1791_v1, %v1663_v30  ;;  %v1680_v4 = vpop.f32.mrb[19].mxu0  ;;  %v1046_v5 = vpop.f32.mrb[19].mxu1 }
 0x11e   : > { %v1276_v6 = vadd.f32 %v2160_v58, %v1044_v63  ;;  %v2167_v7 = vadd.f32 %v1680_v4, %v1679_v0  ;;  %v1047_v8 = vadd.f32 %v1657_v18, %v1046_v5 }
 0x11f   : > { %vm1310_vm0 = vcmp.ge.f32.partialorder %v1278_v2, 0.0  ;;  %v1342_v9 = vmul.f32 0.2, %v1278_v2  ;;  %v1279_v10 = vadd.f32 %v2160_v58, %v1055_v3 }
 0x120   : > { %vm1308_vm1 = vcmp.ge.f32.partialorder %v1276_v6, 0.0  ;;  %v1340_v11 = vmul.f32 0.2, %v1276_v6  ;;  %v1277_v12 = vadd.f32 %v2160_v58, %v1047_v8 }
 0x121   : > { %v1374_v14 = vsel %vm1310_vm0, %v1278_v2, %v1342_v9  ;;  %vm1311_vm2 = vcmp.ge.f32.partialorder %v1279_v10, 0.0  ;;  %v1343_v15 = vmul.f32 0.2, %v1279_v10 }
 0x122   : > { %1406 = vst [vmem:[%s2172_s28 + $0x10] sm:$0xff] %v1374_v14  ;;  %v1372_v16 = vsel %vm1308_vm1, %v1276_v6, %v1340_v11  ;;  %vm1309_vm3 = vcmp.ge.f32.partialorder %v1277_v12, 0.0  ;;  %v1341_v17 = vmul.f32 0.2, %v1277_v12  ;;  %v1682_v18 = vpop.f32.mrb[20].mxu0  ;;  %v1794_v20 = vpop.f32.mrb[20].mxu1 }
 0x123   : > { %1404 = vst [vmem:[%s2172_s28] sm:$0xff] %v1372_v16  ;;  %v1375_v21 = vsel %vm1311_vm2, %v1279_v10, %v1343_v15  ;;  %v1068_v22 = vadd.f32 %v1794_v20, %v1672_v48  ;;  %v1683_v23 = vpop.f32.mrb[21].mxu0  ;;  %v1059_v24 = vpop.f32.mrb[21].mxu1 }
 0x124   : > { %1407 = vst [vmem:[%s2172_s28 + $0x18] sm:$0xff] %v1375_v21  ;;  %v1373_v26 = vsel %vm1309_vm3, %v1277_v12, %v1341_v17  ;;  %v1684_v27 = vadd.f32 %v1683_v23, %v1682_v18  ;;  %v1060_v28 = vadd.f32 %v1666_v36, %v1059_v24  ;;  %v1685_v29 = vpop.f32.mrb[22].mxu0  ;;  %v1795_v30 = vpop.f32.mrb[22].mxu1 }
 0x125   : > { %1405 = vst [vmem:[%s2172_s28 + $0x8] sm:$0xff] %v1373_v26  ;;  %v1282_v32 = vadd.f32 %v2160_v58, %v1068_v22  ;;  %v1071_v33 = vadd.f32 %v1795_v30, %v1675_v54  ;;  %v1686_v34 = vpop.f32.mrb[23].mxu0  ;;  %v1062_v35 = vpop.f32.mrb[23].mxu1 }
 0x126   : > { %v1280_v38 = vadd.f32 %v2160_v58, %v1060_v28  ;;  %v1687_v39 = vadd.f32 %v1686_v34, %v1685_v29  ;;  %v1063_v40 = vadd.f32 %v2149_v42, %v1062_v35 }
 0x127   : > { %vm1314_vm4 = vcmp.ge.f32.partialorder %v1282_v32, 0.0  ;;  %v1346_v41 = vmul.f32 0.2, %v1282_v32  ;;  %v1283_v44 = vadd.f32 %v2160_v58, %v1071_v33 }
 0x128   : > { %vm1312_vm5 = vcmp.ge.f32.partialorder %v1280_v38, 0.0  ;;  %v1344_v36 = vmul.f32 0.2, %v1280_v38  ;;  %v1281_v45 = vadd.f32 %v2160_v58, %v1063_v40 }
 0x129   : > { %v1378_v46 = vsel %vm1314_vm4, %v1282_v32, %v1346_v41  ;;  %vm1315_vm6 = vcmp.ge.f32.partialorder %v1283_v44, 0.0  ;;  %v1347_v47 = vmul.f32 0.2, %v1283_v44 }
 0x12a   : > { %1410 = vst [vmem:[%s2172_s28 + $0x30] sm:$0xff] %v1378_v46  ;;  %v1376_v48 = vsel %vm1312_vm5, %v1280_v38, %v1344_v36  ;;  %vm1313_vm7 = vcmp.ge.f32.partialorder %v1281_v45, 0.0  ;;  %v1345_v50 = vmul.f32 0.2, %v1281_v45  ;;  %v1688_v51 = vpop.f32.mrb[24].mxu0  ;;  %v1798_v42 = vpop.f32.mrb[24].mxu1 }
 0x12b   : > { %1408 = vst [vmem:[%s2172_s28 + $0x20] sm:$0xff] %v1376_v48  ;;  %v1379_v52 = vsel %vm1315_vm6, %v1283_v44, %v1347_v47  ;;  %v1084_v53 = vadd.f32 %v1798_v42, %v1684_v27  ;;  %v1689_v54 = vpop.f32.mrb[25].mxu0  ;;  %v1075_v56 = vpop.f32.mrb[25].mxu1 }
 0x12c   : > { %1411 = vst [vmem:[%s2172_s28 + $0x38] sm:$0xff] %v1379_v52  ;;  %v1377_v57 = vsel %vm1313_vm7, %v1281_v45, %v1345_v50  ;;  %v1690_v59 = vadd.f32 %v1689_v54, %v1688_v51  ;;  %v1076_v60 = vadd.f32 %v2163_v62, %v1075_v56  ;;  %v1691_v61 = vpop.f32.mrb[26].mxu0  ;;  %v1799_v63 = vpop.f32.mrb[26].mxu1 }
 0x12d   : > { %1409 = vst [vmem:[%s2172_s28 + $0x28] sm:$0xff] %v1377_v57  ;;  %v1286_v0 = vadd.f32 %v2160_v58, %v1084_v53  ;;  %v1087_v1 = vadd.f32 %v1799_v63, %v1687_v39  ;;  %v1692_v2 = vpop.f32.mrb[27].mxu0  ;;  %v1078_v3 = vpop.f32.mrb[27].mxu1 }
 0x12e   : > { %v1284_v4 = vadd.f32 %v2160_v58, %v1076_v60  ;;  %v1693_v5 = vadd.f32 %v1692_v2, %v1691_v61  ;;  %v1079_v6 = vadd.f32 %v2167_v7, %v1078_v3 }
 0x12f   : > { %vm1318_vm8 = vcmp.ge.f32.partialorder %v1286_v0, 0.0  ;;  %v1350_v8 = vmul.f32 0.2, %v1286_v0  ;;  %v1287_v9 = vadd.f32 %v2160_v58, %v1087_v1 }
 0x130   : > { %vm1316_vm9 = vcmp.ge.f32.partialorder %v1284_v4, 0.0  ;;  %v1348_v62 = vmul.f32 0.2, %v1284_v4  ;;  %v1285_v10 = vadd.f32 %v2160_v58, %v1079_v6 }
 0x131   : > { %v1382_v11 = vsel %vm1318_vm8, %v1286_v0, %v1350_v8  ;;  %vm1319_vm10 = vcmp.ge.f32.partialorder %v1287_v9, 0.0  ;;  %v1351_v12 = vmul.f32 0.2, %v1287_v9 }
 0x132   : > { %1414 = vst [vmem:[%s2172_s28 + $0x50] sm:$0xff] %v1382_v11  ;;  %v1380_v14 = vsel %vm1316_vm9, %v1284_v4, %v1348_v62  ;;  %vm1317_vm11 = vcmp.ge.f32.partialorder %v1285_v10, 0.0  ;;  %v1349_v15 = vmul.f32 0.2, %v1285_v10  ;;  %v1694_v16 = vpop.f32.mrb[28].mxu0  ;;  %v1802_v7 = vpop.f32.mrb[28].mxu1 }
 0x133   : > { %1412 = vst [vmem:[%s2172_s28 + $0x40] sm:$0xff] %v1380_v14  ;;  %v1383_v17 = vsel %vm1319_vm10, %v1287_v9, %v1351_v12  ;;  %v1695_v18 = vpop.f32.mrb[29].mxu0  ;;  %v1091_v20 = vpop.f32.mrb[29].mxu1 }
 0x134   : > { %1415 = vst [vmem:[%s2172_s28 + $0x58] sm:$0xff] %v1383_v17  ;;  %v1381_v21 = vsel %vm1317_vm11, %v1285_v10, %v1349_v15  ;;  %v1696_v22 = vadd.f32 %v1695_v18, %v1694_v16  ;;  %v1092_v23 = vadd.f32 %v1690_v59, %v1091_v20  ;;  %v1697_v24 = vpop.f32.mrb[30].mxu0  ;;  %v1803_v26 = vpop.f32.mrb[30].mxu1 }
 0x135   : > { %1413 = vst [vmem:[%s2172_s28 + $0x48] sm:$0xff] %v1381_v21  ;;  %v1698_v27 = vpop.f32.mrb[31].mxu0  ;;  %v1094_v28 = vpop.f32.mrb[31].mxu1 }
 0x136   : > { %v1100_v29 = vadd.f32 %v1802_v7, %v1696_v22  ;;  %v1288_v30 = vadd.f32 %v2160_v58, %v1092_v23  ;;  %v1699_v32 = vadd.f32 %v1698_v27, %v1697_v24  ;;  %v1095_v33 = vadd.f32 %v1693_v5, %v1094_v28 }
 0x138   : > { %v1290_v34 = vadd.f32 %v2160_v58, %v1100_v29  ;;  %vm1320_vm12 = vcmp.ge.f32.partialorder %v1288_v30, 0.0  ;;  %v1352_v35 = vmul.f32 0.2, %v1288_v30  ;;  %v1103_v38 = vadd.f32 %v1803_v26, %v1699_v32 }
 0x139   : > { %v1289_v39 = vadd.f32 %v2160_v58, %v1095_v33 }
 0x13a   : > { %vm1322_vm13 = vcmp.ge.f32.partialorder %v1290_v34, 0.0  ;;  %v1354_v40 = vmul.f32 0.2, %v1290_v34  ;;  %v1384_v41 = vsel %vm1320_vm12, %v1288_v30, %v1352_v35  ;;  %v1291_v44 = vadd.f32 %v2160_v58, %v1103_v38  ;;  %v1700_v36 = vpop.f32.mrb[32].mxu0  ;;  %v1806_v45 = vpop.f32.mrb[32].mxu1 }
 0x13b   : > { %1416 = vst [vmem:[%s2172_s28 + $0x60] sm:$0xff] %v1384_v41  ;;  %vm1321_vm14 = vcmp.ge.f32.partialorder %v1289_v39, 0.0  ;;  %v1353_v46 = vmul.f32 0.2, %v1289_v39  ;;  %v1701_v47 = vpop.f32.mrb[33].mxu0  ;;  %v1107_v48 = vpop.f32.mrb[33].mxu1 }
 0x13c   : > { %v1386_v50 = vsel %vm1322_vm13, %v1290_v34, %v1354_v40  ;;  %vm1323_vm15 = vcmp.ge.f32.partialorder %v1291_v44, 0.0  ;;  %v1355_v51 = vmul.f32 0.2, %v1291_v44  ;;  %v1702_v42 = vadd.f32 %v1701_v47, %v1700_v36  ;;  %v1703_v52 = vpop.f32.mrb[34].mxu0  ;;  %v1807_v53 = vpop.f32.mrb[34].mxu1 }
 0x13d   : > { %1418 = vst [vmem:[%s2172_s28 + $0x70] sm:$0xff] %v1386_v50  ;;  %v1385_v54 = vsel %vm1321_vm14, %v1289_v39, %v1353_v46  ;;  %v1704_v56 = vpop.f32.mrb[35].mxu0  ;;  %v1110_v57 = vpop.f32.mrb[35].mxu1 }
 0x13e   : > { %v1387_v59 = vsel %vm1323_vm15, %v1291_v44, %v1355_v51  ;;  %1417 = vst [vmem:[%s2172_s28 + $0x68] sm:$0xff] %v1385_v54  ;;  %v1108_v60 = vadd.f32 %v1702_v42, %v1107_v48  ;;  %v1705_v61 = vadd.f32 %v1704_v56, %v1703_v52 }
 0x13f   : > { %1419 = vst [vmem:[%s2172_s28 + $0x78] sm:$0xff] %v1387_v59 }
 0x140   : > { %v1292_v63 = vadd.f32 %v2160_v58, %v1108_v60  ;;  %v1111_v0 = vadd.f32 %v1705_v61, %v1110_v57 }
 0x142   : > { %vm1324_vm0 = vcmp.ge.f32.partialorder %v1292_v63, 0.0  ;;  %v1356_v1 = vmul.f32 0.2, %v1292_v63  ;;  %v1293_v2 = vadd.f32 %v2160_v58, %v1111_v0  ;;  %v1706_v3 = vpop.f32.mrb[36].mxu0  ;;  %v2209_v4 = vpop.f32.mrb[36].mxu1 }
 0x143   : > { %v1707_v5 = vpop.f32.mrb[37].mxu0  ;;  %v1123_v6 = vpop.f32.mrb[37].mxu1 }
 0x144   : > { %v1388_v8 = vsel %vm1324_vm0, %v1292_v63, %v1356_v1  ;;  %vm1325_vm1 = vcmp.ge.f32.partialorder %v1293_v2, 0.0  ;;  %v1357_v9 = vmul.f32 0.2, %v1293_v2  ;;  %v1708_v62 = vadd.f32 %v1707_v5, %v1706_v3  ;;  %v1709_v10 = vpop.f32.mrb[38].mxu0  ;;  %v2211_v11 = vpop.f32.mrb[38].mxu1 }
 0x145   : > { %1420 = vst [vmem:[%s2172_s28 + $0x80] sm:$0xff] %v1388_v8  ;;  %v1710_v12 = vpop.f32.mrb[39].mxu0  ;;  %v1126_v14 = vpop.f32.mrb[39].mxu1 }
 0x146   : > { %v1389_v15 = vsel %vm1325_vm1, %v1293_v2, %v1357_v9  ;;  %v1116_v16 = vadd.f32 %v1806_v45, %v1708_v62  ;;  %v1711_v7 = vadd.f32 %v1710_v12, %v1709_v10 }
 0x147   : > { %1421 = vst [vmem:[%s2172_s28 + $0x88] sm:$0xff] %v1389_v15 }
 0x148   : > { %v1294_v17 = vadd.f32 %v2160_v58, %v1116_v16  ;;  %v1119_v18 = vadd.f32 %v1807_v53, %v1711_v7 }
 0x14a   : > { %vm1326_vm2 = vcmp.ge.f32.partialorder %v1294_v17, 0.0  ;;  %v1358_v20 = vmul.f32 0.2, %v1294_v17  ;;  %v1295_v21 = vadd.f32 %v2160_v58, %v1119_v18  ;;  %v1712_v22 = vpop.f32.mrb[40].mxu0  ;;  %v1814_v23 = vpop.f32.mrb[40].mxu1 }
 0x14b   : > { %v1148_v24 = vadd.f32 %v1814_v23, %v2143_v25  ;;  %v1713_v26 = vpop.f32.mrb[41].mxu0  ;;  %v1139_v27 = vpop.f32.mrb[41].mxu1 }
 0x14c   : > { %v1390_v28 = vsel %vm1326_vm2, %v1294_v17, %v1358_v20  ;;  %vm1327_vm3 = vcmp.ge.f32.partialorder %v1295_v21, 0.0  ;;  %v1359_v29 = vmul.f32 0.2, %v1295_v21  ;;  %v1714_v30 = vadd.f32 %v1713_v26, %v1712_v22  ;;  %v1715_v32 = vpop.f32.mrb[42].mxu0  ;;  %v1815_v33 = vpop.f32.mrb[42].mxu1 }
 0x14d   : > { %1422 = vst [vmem:[%s2172_s28 + $0x90] sm:$0xff] %v1390_v28  ;;  %v1302_v34 = vadd.f32 %v2160_v58, %v1148_v24  ;;  %v1140_v35 = vadd.f32 %v2139_v13, %v1139_v27  ;;  %v1151_v38 = vadd.f32 %v1815_v33, %v2145_v31  ;;  %v1716_v39 = vpop.f32.mrb[43].mxu0  ;;  %v1142_v40 = vpop.f32.mrb[43].mxu1 }
 0x14e   : > { %v1391_v41 = vsel %vm1327_vm3, %v1295_v21, %v1359_v29  ;;  %v1124_v25 = vadd.f32 %v1714_v30, %v1123_v6  ;;  %v1717_v44 = vadd.f32 %v1716_v39, %v1715_v32  ;;  %v1143_v36 = vadd.f32 %v2141_v19, %v1142_v40 }
 0x14f   : > { %1423 = vst [vmem:[%s2172_s28 + $0x98] sm:$0xff] %v1391_v41  ;;  %vm1334_vm4 = vcmp.ge.f32.partialorder %v1302_v34, 0.0  ;;  %v1366_v45 = vmul.f32 0.2, %v1302_v34  ;;  %v1300_v46 = vadd.f32 %v2160_v58, %v1140_v35  ;;  %v1303_v47 = vadd.f32 %v2160_v58, %v1151_v38 }
 0x150   : > { %v1296_v48 = vadd.f32 %v2160_v58, %v1124_v25  ;;  %v1127_v13 = vadd.f32 %v1717_v44, %v1126_v14  ;;  %v1301_v31 = vadd.f32 %v2160_v58, %v1143_v36 }
 0x151   : > { %v1398_v50 = vsel %vm1334_vm4, %v1302_v34, %v1366_v45  ;;  %vm1332_vm5 = vcmp.ge.f32.partialorder %v1300_v46, 0.0  ;;  %v1364_v51 = vmul.f32 0.2, %v1300_v46  ;;  %vm1335_vm6 = vcmp.ge.f32.partialorder %v1303_v47, 0.0 }
 0x152   : > { %1430 = vst [vmem:[%s2172_s28 + $0xd0] sm:$0xff] %v1398_v50  ;;  %vm1328_vm7 = vcmp.ge.f32.partialorder %v1296_v48, 0.0  ;;  %v1360_v19 = vmul.f32 0.2, %v1296_v48  ;;  %v1367_v42 = vmul.f32 0.2, %v1303_v47  ;;  %v1297_v52 = vadd.f32 %v2160_v58, %v1127_v13 }
 0x153   : > { %v1718_v53 = vpop.f32.mrb[44].mxu0  ;;  %v1396_v54 = vsel %vm1332_vm5, %v1300_v46, %v1364_v51  ;;  %vm1333_vm8 = vcmp.ge.f32.partialorder %v1301_v31, 0.0  ;;  %v1365_v56 = vmul.f32 0.2, %v1301_v31  ;;  %v1818_v57 = vpop.f32.mrb[44].mxu1 }
 0x154   : > { %v1719_v59 = vpop.f32.mrb[45].mxu0  ;;  %v1392_v60 = vsel %vm1328_vm7, %v1296_v48, %v1360_v19  ;;  %1428 = vst [vmem:[%s2172_s28 + $0xc0] sm:$0xff] %v1396_v54  ;;  %v1399_v61 = vsel %vm1335_vm6, %v1303_v47, %v1367_v42  ;;  %vm1329_vm9 = vcmp.ge.f32.partialorder %v1297_v52, 0.0  ;;  %v1361_v63 = vmul.f32 0.2, %v1297_v52  ;;  %v1155_v0 = vpop.f32.mrb[45].mxu1 }
 0x155   : > { %v1721_v1 = vpop.f32.mrb[46].mxu0  ;;  %1424 = vst [vmem:[%s2172_s28 + $0xa0] sm:$0xff] %v1392_v60  ;;  %1431 = vst [vmem:[%s2172_s28 + $0xd8] sm:$0xff] %v1399_v61  ;;  %v1397_v2 = vsel %vm1333_vm8, %v1301_v31, %v1365_v56  ;;  %v1164_v3 = vadd.f32 %v1818_v57, %v2153_v49  ;;  %v1720_v5 = vadd.f32 %v1719_v59, %v1718_v53  ;;  %v1819_v8 = vpop.f32.mrb[46].mxu1 }
 0x156   : > { %v1156_v6 = vadd.f32 %v2147_v37, %v1155_v0  ;;  %v1722_v9 = vpop.f32.mrb[47].mxu0  ;;  %v1393_v62 = vsel %vm1329_vm9, %v1297_v52, %v1361_v63  ;;  %1429 = vst [vmem:[%s2172_s28 + $0xc8] sm:$0xff] %v1397_v2  ;;  %v1167_v10 = vadd.f32 %v1819_v8, %v2155_v55  ;;  %v1158_v14 = vpop.f32.mrb[47].mxu1 }
 0x157   : > { %v1723_v12 = vadd.f32 %v1722_v9, %v1721_v1  ;;  %1425 = vst [vmem:[%s2172_s28 + $0xa8] sm:$0xff] %v1393_v62  ;;  %v1306_v15 = vadd.f32 %v2160_v58, %v1164_v3  ;;  %v1132_v16 = vadd.f32 %v2209_v4, %v1720_v5  ;;  %v1159_v49 = vadd.f32 %v2151_v43, %v1158_v14 }
 0x158   : > { %v1304_v7 = vadd.f32 %v2160_v58, %v1156_v6  ;;  %v1307_v37 = vadd.f32 %v2160_v58, %v1167_v10 }
 0x159   : > { %v1135_v17 = vadd.f32 %v2211_v11, %v1723_v12  ;;  %vm1338_vm10 = vcmp.ge.f32.partialorder %v1306_v15, 0.0  ;;  %v1370_v18 = vmul.f32 0.2, %v1306_v15  ;;  %v1298_v55 = vadd.f32 %v2160_v58, %v1132_v16 }
 0x15a   : > { %vm1336_vm11 = vcmp.ge.f32.partialorder %v1304_v7, 0.0  ;;  %v1368_v20 = vmul.f32 0.2, %v1304_v7  ;;  %vm1339_vm12 = vcmp.ge.f32.partialorder %v1307_v37, 0.0  ;;  %v1371_v21 = vmul.f32 0.2, %v1307_v37 }
 0x15b   : > { %v1299_v4 = vadd.f32 %v2160_v58, %v1135_v17  ;;  %v1402_v22 = vsel %vm1338_vm10, %v1306_v15, %v1370_v18  ;;  %vm1330_vm13 = vcmp.ge.f32.partialorder %v1298_v55, 0.0  ;;  %v1362_v43 = vmul.f32 0.2, %v1298_v55 }
 0x15c   : > { %v1305_v11 = vadd.f32 %v2160_v58, %v1159_v49  ;;  %1434 = vst [vmem:[%s2172_s28 + $0xf0] sm:$0xff] %v1402_v22  ;;  %v1400_v23 = vsel %vm1336_vm11, %v1304_v7, %v1368_v20  ;;  %v1403_v24 = vsel %vm1339_vm12, %v1307_v37, %v1371_v21 }
 0x15d   : > { %vm1331_vm14 = vcmp.ge.f32.partialorder %v1299_v4, 0.0  ;;  %v1363_v26 = vmul.f32 0.2, %v1299_v4  ;;  %v1394_v27 = vsel %vm1330_vm13, %v1298_v55, %v1362_v43  ;;  %1432 = vst [vmem:[%s2172_s28 + $0xe0] sm:$0xff] %v1400_v23  ;;  %1435 = vst [vmem:[%s2172_s28 + $0xf8] sm:$0xff] %v1403_v24 }
 0x15e   : > { %vm1337_vm15 = vcmp.ge.f32.partialorder %v1305_v11, 0.0  ;;  %v1369_v28 = vmul.f32 0.2, %v1305_v11  ;;  %1426 = vst [vmem:[%s2172_s28 + $0xb0] sm:$0xff] %v1394_v27 }
 0x15f   : > { %v1395_v29 = vsel %vm1331_vm14, %v1299_v4, %v1363_v26 }
 0x160   : > { %1427 = vst [vmem:[%s2172_s28 + $0xb8] sm:$0xff] %v1395_v29  ;;  %v1401_v30 = vsel %vm1337_vm15, %v1305_v11, %v1369_v28 }
 0x161   : > { %1433 = vst [vmem:[%s2172_s28 + $0xe8] sm:$0xff] %v1401_v30 }
 0x162 PF: > { %s13_s14 = sadd.s32 1, %s1971_s14   ;;  %s2266_s12 = smov %s1967_s13 }
 0x163   : > { %p10_p5 = scmp.ge.s32.totalorder %s13_s14, 4   ;;  %s2267_s13 = smov %s2269_s15 }
 0x165   :  { %12 = sbr.rel (!%p10_p5) target bundleno = 2 (0x2), region = 76 }

// kernel: patchgan_forward.13
= control target key start
LH: loop header
LB: loop body
LE: loop exit
PB: predicated region body
PF: predicated region fallthrough
CT: control target
= control target key end

     0   :  { %v204_v0 = vmov 0.0   ;;  %s286_s1 = inlined_call_operand.vmem [shape: f32[1,128], index: 1, kind: output, shape index: {0}]   ;;  %s287_s2 = inlined_call_operand.vmem [shape: f32[1,128], index: 2, kind: output, shape index: {1}]   ;;  %s288_s0 = inlined_call_operand.vmem [shape: f32[128,128], index: 0, kind: input, shape index: {}]  }
   0x1   :  { %14 = vst [vmem:[%s286_s1] sm:$0x1] %v204_v0  ;;  %15 = vst [vmem:[%s287_s2] sm:$0x1] %v204_v0  ;;  %v99_v1 = vld [vmem:[%s288_s0] sm:$0xff]  ;;  %v100_v2 = vld [vmem:[%s288_s0 + $0x8] sm:$0xff] }
   0x2   :  { %v101_v3 = vld [vmem:[%s288_s0 + $0x10] sm:$0xff]  ;;  %v102_v4 = vld [vmem:[%s288_s0 + $0x18] sm:$0xff]  ;;  %v132_v5 = vadd.f32 %v100_v2, %v99_v1  ;;  %v156_v6 = vmul.f32 %v99_v1, %v99_v1  ;;  %v157_v7 = vmul.f32 %v100_v2, %v100_v2  ;;  %v103_v9 = vld [vmem:[%s288_s0 + $0x20] sm:$0xff] }
   0x3   :  { %v158_v8 = vmul.f32 %v101_v3, %v101_v3  ;;  %v159_v11 = vmul.f32 %v102_v4, %v102_v4  ;;  %v104_v13 = vld [vmem:[%s288_s0 + $0x28] sm:$0xff]  ;;  %v160_v15 = vmul.f32 %v103_v9, %v103_v9  ;;  %v105_v17 = vld [vmem:[%s288_s0 + $0x30] sm:$0xff]  ;;  %v106_v21 = vld [vmem:[%s288_s0 + $0x38] sm:$0xff] }
   0x4   :  { %v133_v10 = vadd.f32 %v132_v5, %v101_v3  ;;  %v172_v12 = vadd.f32 %v157_v7, %v156_v6  ;;  %v161_v19 = vmul.f32 %v104_v13, %v104_v13  ;;  %v162_v23 = vmul.f32 %v105_v17, %v105_v17  ;;  %v107_v25 = vld [vmem:[%s288_s0 + $0x40] sm:$0xff]  ;;  %v108_v29 = vld [vmem:[%s288_s0 + $0x48] sm:$0xff]  ;;  %v109_v33 = vld [vmem:[%s288_s0 + $0x50] sm:$0xff] }
   0x5   :  { %v163_v27 = vmul.f32 %v106_v21, %v106_v21  ;;  %v164_v31 = vmul.f32 %v107_v25, %v107_v25  ;;  %v165_v35 = vmul.f32 %v108_v29, %v108_v29  ;;  %v110_v37 = vld [vmem:[%s288_s0 + $0x58] sm:$0xff]  ;;  %v166_v39 = vmul.f32 %v109_v33, %v109_v33  ;;  %v111_v41 = vld [vmem:[%s288_s0 + $0x60] sm:$0xff]  ;;  %v112_v45 = vld [vmem:[%s288_s0 + $0x68] sm:$0xff] }
   0x6   :  { %v134_v14 = vadd.f32 %v133_v10, %v102_v4  ;;  %v173_v16 = vadd.f32 %v172_v12, %v158_v8  ;;  %v167_v43 = vmul.f32 %v110_v37, %v110_v37  ;;  %v168_v47 = vmul.f32 %v111_v41, %v111_v41  ;;  %v113_v49 = vld [vmem:[%s288_s0 + $0x70] sm:$0xff]  ;;  %v114_v53 = vld [vmem:[%s288_s0 + $0x78] sm:$0xff] }
   0x7   :  { %v169_v51 = vmul.f32 %v112_v45, %v112_v45  ;;  %v170_v55 = vmul.f32 %v113_v49, %v113_v49  ;;  %v171_v58 = vmul.f32 %v114_v53, %v114_v53 }
   0x8   :  { %v135_v18 = vadd.f32 %v134_v14, %v103_v9  ;;  %v174_v20 = vadd.f32 %v173_v16, %v159_v11  ;;  %v131_v7 = vld [vmem:[%s286_s1] sm:$0x1] }
   0x9   :  { %v155_v12 = vld [vmem:[%s287_s2] sm:$0x1] }
   0xa   :  { %v136_v22 = vadd.f32 %v135_v18, %v104_v13  ;;  %v175_v24 = vadd.f32 %v174_v20, %v160_v15 }
   0xc   :  { %v137_v26 = vadd.f32 %v136_v22, %v105_v17  ;;  %v176_v28 = vadd.f32 %v175_v24, %v161_v19 }
   0xe   :  { %v138_v30 = vadd.f32 %v137_v26, %v106_v21  ;;  %v177_v32 = vadd.f32 %v176_v28, %v162_v23 }
  0x10   :  { %v139_v34 = vadd.f32 %v138_v30, %v107_v25  ;;  %v178_v36 = vadd.f32 %v177_v32, %v163_v27 }
  0x12   :  { %v140_v38 = vadd.f32 %v139_v34, %v108_v29  ;;  %v179_v40 = vadd.f32 %v178_v36, %v164_v31 }
  0x14   :  { %v141_v42 = vadd.f32 %v140_v38, %v109_v33  ;;  %v180_v44 = vadd.f32 %v179_v40, %v165_v35 }
  0x16   :  { %v142_v46 = vadd.f32 %v141_v42, %v110_v37  ;;  %v181_v48 = vadd.f32 %v180_v44, %v166_v39 }
  0x18   :  { %v143_v50 = vadd.f32 %v142_v46, %v111_v41  ;;  %v182_v52 = vadd.f32 %v181_v48, %v167_v43 }
  0x1a   :  { %v144_v54 = vadd.f32 %v143_v50, %v112_v45  ;;  %v183_v56 = vadd.f32 %v182_v52, %v168_v47 }
  0x1c   :  { %v145_v57 = vadd.f32 %v144_v54, %v113_v49  ;;  %v184_v59 = vadd.f32 %v183_v56, %v169_v51 }
  0x1e   :  { %v146_v60 = vadd.f32 %v145_v57, %v114_v53  ;;  %v185_v61 = vadd.f32 %v184_v59, %v170_v55 }
  0x20   :  { %v147_v62 = vrot.slane %v146_v60, 4  ;;  %v186_v63 = vadd.f32 %v185_v61, %v171_v58 }
  0x22   :  { %v148_v0 = vadd.f32 %v147_v62, %v146_v60  ;;  %v187_v1 = vrot.slane %v186_v63, 4 }
  0x24   :  { %v149_v2 = vrot.slane %v148_v0, 2  ;;  %v188_v3 = vadd.f32 %v187_v1, %v186_v63 }
  0x26   :  { %v150_v4 = vadd.f32 %v149_v2, %v148_v0  ;;  %v189_v5 = vrot.slane %v188_v3, 2 }
  0x28   :  { %v151_v6 = vrot.slane %v150_v4, 1  ;;  %v190_v8 = vadd.f32 %v189_v5, %v188_v3 }
  0x2a   :  { %v152_v9 = vadd.f32 %v151_v6, %v150_v4  ;;  %v191_v10 = vrot.slane %v190_v8, 1 }
  0x2c   :  { %v153_v11 = vadd.f32 %v152_v9, %v131_v7  ;;  %v192_v13 = vadd.f32 %v191_v10, %v190_v8 }
  0x2e   :  { %154 = vst [vmem:[%s286_s1] sm:$0x1] %v153_v11  ;;  %v193_v14 = vadd.f32 %v192_v13, %v155_v12 }
  0x30   :  { %194 = vst [vmem:[%s287_s2] sm:$0x1] %v193_v14 }

// kernel: patchgan_forward.12
= control target key start
LH: loop header
LB: loop body
LE: loop exit
PB: predicated region body
PF: predicated region fallthrough
CT: control target
= control target key end

     0   :  { %s1609_s12 = smov 0   ;;  %s1611_s13 = smov 0   ;;  %s1863_s0 = inlined_call_operand.vmem [shape: bf16[128,1024], index: 0, kind: input, shape index: {}]   ;;  %s1864_s1 = inlined_call_operand.vmem [shape: bf16[1024,128], index: 1, kind: input, shape index: {}]   ;;  %s1865_s2 = inlined_call_operand.vmem [shape: f32[1,128], index: 2, kind: input, shape index: {}]   ;;  %s1866_s3 = inlined_call_operand.vmem [shape: f32[128,128], index: 3, kind: output, shape index: {}]  }
   0x1   :  { %s1613_s14 = smov 0   ;;  %s1615_s15 = smov 0  }
   0x2   :  { %s1617_s16 = smov 0  }
   0x3 LB: > { %s25_s17 = sadd.s32 1, %s1582_s15  ;;  %p48_p1 = scmp.ne.s32.totalorder %s1574_s13, %s1570_s12  ;;  %s1586_s16 = sphi %s1617_s16, %s13_s16   ;;  %s1582_s15 = sphi %s1615_s15, %s1870_s15   ;;  %s1578_s14 = sphi %s1613_s14, %s1869_s14   ;;  %s1574_s13 = sphi %s1611_s13, %s1868_s13   ;;  %s1570_s12 = sphi %s1609_s12, %s1867_s12  }
   0x4   : > { %p26_p0 = scmp.ge.s32.totalorder %s25_s17, 2  ;;  %p49_p2 = scmp.eq.s32.totalorder %s1586_s16, 0 }
   0x5   : > { %s41_s19 = sadd.s32 1, %s1574_s13  ;;  %p1219_p5 = scmp.ge.s32.totalorder %s1586_s16, 2 }
   0x6   : > { %s1872_s17 = smov (%p26_p0, %s25_s17), 0  ;;  %p50_p3 = por %p49_p2, %p48_p1 }
   0x7   : > { %s37_s18 = ssub.s32 %s1582_s15, %s1872_s17  ;;  %162 = sbr.rel (%p1219_p5) target bundleno = 34 (0x22), region = 20 }
   0x8   : > { %p39_p4 = scmp.eq.s32.totalorder %s37_s18, 0 }
   0xa   : > { %s1644_s20 = scalar_select %p39_p4, %s1574_s13, %s41_s19  }
   0xe   : > { %165 = sbr.rel (!%p50_p3) target bundleno = 34 (0x22), region = 24  ;;  %s167_s21 = sand.u32 (%p50_p3), 1, %s1574_s13  }
   0xf   : > { %s1298_s22 = sshll.u32 (%p50_p3), %s1582_s15, 4  ;;  %s1220_s23 = sshll.u32 (%p50_p3), %s167_s21, 8 }
  0x10   : > { %s1652_s26 = scalar_lea.vmem (%p50_p3), %s1863_s0, %s1298_s22  ;;  %s1657_s27 = scalar_lea.vmem (%p50_p3), [#allocation3], %s1220_s23 }
  0x11   : > { %v188_v0 = vld [vmem:[%s1652_s26] sm:$0xff] (%p50_p3)  ;;  %v190_v1 = vld [vmem:[%s1652_s26 + $0x8] sm:$0xff] (%p50_p3) }
  0x12   : > { %v192_v2 = vld [vmem:[%s1652_s26 + $0x20] sm:$0xff] (%p50_p3)  ;;  %189 = vst [vmem:[%s1657_s27] sm:$0xff] (%p50_p3), %v188_v0  ;;  %191 = vst [vmem:[%s1657_s27 + $0x8] sm:$0xff] (%p50_p3), %v190_v1  ;;  %v194_v3 = vld [vmem:[%s1652_s26 + $0x28] sm:$0xff] (%p50_p3) }
  0x13   : > { %193 = vst [vmem:[%s1657_s27 + $0x10] sm:$0xff] (%p50_p3), %v192_v2  ;;  %v196_v4 = vld [vmem:[%s1652_s26 + $0x40] sm:$0xff] (%p50_p3)  ;;  %v198_v5 = vld [vmem:[%s1652_s26 + $0x48] sm:$0xff] (%p50_p3)  ;;  %195 = vst [vmem:[%s1657_s27 + $0x18] sm:$0xff] (%p50_p3), %v194_v3 }
  0x14   : > { %197 = vst [vmem:[%s1657_s27 + $0x20] sm:$0xff] (%p50_p3), %v196_v4  ;;  %199 = vst [vmem:[%s1657_s27 + $0x28] sm:$0xff] (%p50_p3), %v198_v5  ;;  %v200_v6 = vld [vmem:[%s1652_s26 + $0x60] sm:$0xff] (%p50_p3)  ;;  %v202_v7 = vld [vmem:[%s1652_s26 + $0x68] sm:$0xff] (%p50_p3) }
  0x15   : > { %v204_v8 = vld [vmem:[%s1652_s26 + $0x80] sm:$0xff]  ;;  %201 = vst [vmem:[%s1657_s27 + $0x30] sm:$0xff] %v200_v6  ;;  %203 = vst [vmem:[%s1657_s27 + $0x38] sm:$0xff] %v202_v7  ;;  %v206_v9 = vld [vmem:[%s1652_s26 + $0x88] sm:$0xff] }
  0x16   : > { %205 = vst [vmem:[%s1657_s27 + $0x40] sm:$0xff] %v204_v8  ;;  %v208_v10 = vld [vmem:[%s1652_s26 + $0xa0] sm:$0xff]  ;;  %v210_v11 = vld [vmem:[%s1652_s26 + $0xa8] sm:$0xff]  ;;  %207 = vst [vmem:[%s1657_s27 + $0x48] sm:$0xff] %v206_v9 }
  0x17   : > { %209 = vst [vmem:[%s1657_s27 + $0x50] sm:$0xff] %v208_v10  ;;  %211 = vst [vmem:[%s1657_s27 + $0x58] sm:$0xff] %v210_v11  ;;  %v212_v12 = vld [vmem:[%s1652_s26 + $0xc0] sm:$0xff]  ;;  %v214_v13 = vld [vmem:[%s1652_s26 + $0xc8] sm:$0xff] }
  0x18   : > { %v216_v14 = vld [vmem:[%s1652_s26 + $0xe0] sm:$0xff]  ;;  %213 = vst [vmem:[%s1657_s27 + $0x60] sm:$0xff] %v212_v12  ;;  %215 = vst [vmem:[%s1657_s27 + $0x68] sm:$0xff] %v214_v13  ;;  %v218_v15 = vld [vmem:[%s1652_s26 + $0xe8] sm:$0xff] }
  0x19   : > { %217 = vst [vmem:[%s1657_s27 + $0x70] sm:$0xff] %v216_v14  ;;  %v220_v16 = vld [vmem:[%s1652_s26 + $0x100] sm:$0xff]  ;;  %v222_v17 = vld [vmem:[%s1652_s26 + $0x108] sm:$0xff]  ;;  %219 = vst [vmem:[%s1657_s27 + $0x78] sm:$0xff] %v218_v15 }
  0x1a   : > { %221 = vst [vmem:[%s1657_s27 + $0x80] sm:$0xff] %v220_v16  ;;  %223 = vst [vmem:[%s1657_s27 + $0x88] sm:$0xff] %v222_v17  ;;  %v224_v18 = vld [vmem:[%s1652_s26 + $0x120] sm:$0xff]  ;;  %v226_v19 = vld [vmem:[%s1652_s26 + $0x128] sm:$0xff] }
  0x1b   : > { %v228_v20 = vld [vmem:[%s1652_s26 + $0x140] sm:$0xff]  ;;  %225 = vst [vmem:[%s1657_s27 + $0x90] sm:$0xff] %v224_v18  ;;  %227 = vst [vmem:[%s1657_s27 + $0x98] sm:$0xff] %v226_v19  ;;  %v230_v21 = vld [vmem:[%s1652_s26 + $0x148] sm:$0xff] }
  0x1c   : > { %229 = vst [vmem:[%s1657_s27 + $0xa0] sm:$0xff] %v228_v20  ;;  %v232_v22 = vld [vmem:[%s1652_s26 + $0x160] sm:$0xff]  ;;  %v234_v23 = vld [vmem:[%s1652_s26 + $0x168] sm:$0xff]  ;;  %231 = vst [vmem:[%s1657_s27 + $0xa8] sm:$0xff] %v230_v21 }
  0x1d   : > { %233 = vst [vmem:[%s1657_s27 + $0xb0] sm:$0xff] %v232_v22  ;;  %235 = vst [vmem:[%s1657_s27 + $0xb8] sm:$0xff] %v234_v23  ;;  %v236_v24 = vld [vmem:[%s1652_s26 + $0x180] sm:$0xff]  ;;  %v238_v25 = vld [vmem:[%s1652_s26 + $0x188] sm:$0xff] }
  0x1e   : > { %v240_v26 = vld [vmem:[%s1652_s26 + $0x1a0] sm:$0xff]  ;;  %237 = vst [vmem:[%s1657_s27 + $0xc0] sm:$0xff] %v236_v24  ;;  %239 = vst [vmem:[%s1657_s27 + $0xc8] sm:$0xff] %v238_v25  ;;  %v242_v27 = vld [vmem:[%s1652_s26 + $0x1a8] sm:$0xff] }
  0x1f   : > { %241 = vst [vmem:[%s1657_s27 + $0xd0] sm:$0xff] %v240_v26  ;;  %v244_v28 = vld [vmem:[%s1652_s26 + $0x1c0] sm:$0xff]  ;;  %v246_v29 = vld [vmem:[%s1652_s26 + $0x1c8] sm:$0xff]  ;;  %243 = vst [vmem:[%s1657_s27 + $0xd8] sm:$0xff] %v242_v27 }
  0x20   : > { %245 = vst [vmem:[%s1657_s27 + $0xe0] sm:$0xff] %v244_v28  ;;  %247 = vst [vmem:[%s1657_s27 + $0xe8] sm:$0xff] %v246_v29  ;;  %v248_v30 = vld [vmem:[%s1652_s26 + $0x1e0] sm:$0xff]  ;;  %v250_v31 = vld [vmem:[%s1652_s26 + $0x1e8] sm:$0xff] }
  0x21   : > { %249 = vst [vmem:[%s1657_s27 + $0xf0] sm:$0xff] %v248_v30  ;;  %251 = vst [vmem:[%s1657_s27 + $0xf8] sm:$0xff] %v250_v31 }
  0x22 PF: > { %p1223_p6 = scmp.ge.s32.totalorder %s1586_s16, 1  ;;  %p268_p7 = scmp.lt.s32.totalorder %s1586_s16, 3 }
  0x24   : > { %p269_p8 = pnand %p1223_p6, %p268_p7 }
  0x25   : > { %s275_s28 = sand.u32 (!%p269_p8), 1, %s1570_s12   ;;  %s1225_s29 = sshll.u32 (!%p269_p8), %s1578_s14, 6 }
  0x26   : > { %272 = sbr.rel (%p269_p8) target bundleno = 378 (0x17a), region = 51  ;;  %s1224_s30 = sshll.u32 (!%p269_p8), %s275_s28, 8 }
  0x27   : > { %p315_p9 = scmp.lt.s32.totalorder (!%p269_p8), %s1225_s29, 127  ;;  %s1729_s8 = scalar_lea.vmem (!%p269_p8), [#allocation3], %s1224_s30 }
  0x28   : > { %p1227_p10 = scmp.ne.s32.totalorder (!%p269_p8), %s1578_s14, 0 }
  0x2d   : > { %s1874_s29 = smov (!%p315_p9, %s1225_s29), 127  ;;  %339 = sbr.rel (%p1227_p10) target bundleno = 55 (0x37), region = 59 }
  0x2e   : > { %s1226_s4 = sshll.u32 %s1874_s29, 2  ;;  %v1588_v32 = vmov (!%p1227_p10), 0.0  }
  0x2f   : > { %s1727_s7 = scalar_lea.vmem %s1864_s1, %s1226_s4  ;;  %340 = vst [vmem:[#allocation2] sm:$0xff] (!%p1227_p10), %v1588_v32  ;;  %341 = vst [vmem:[#allocation2 + $0x8] sm:$0xff] (!%p1227_p10), %v1588_v32 }
  0x30   : > { %342 = vst [vmem:[#allocation2 + $0x10] sm:$0xff] (!%p1227_p10), %v1588_v32  ;;  %343 = vst [vmem:[#allocation2 + $0x18] sm:$0xff] (!%p1227_p10), %v1588_v32 }
  0x31   : > { %344 = vst [vmem:[#allocation2 + $0x20] sm:$0xff] (!%p1227_p10), %v1588_v32  ;;  %345 = vst [vmem:[#allocation2 + $0x28] sm:$0xff] (!%p1227_p10), %v1588_v32 }
  0x32   : > { %346 = vst [vmem:[#allocation2 + $0x30] sm:$0xff] (!%p1227_p10), %v1588_v32  ;;  %347 = vst [vmem:[#allocation2 + $0x38] sm:$0xff] (!%p1227_p10), %v1588_v32 }
  0x33   : > { %348 = vst [vmem:[#allocation2 + $0x40] sm:$0xff] (!%p1227_p10), %v1588_v32  ;;  %349 = vst [vmem:[#allocation2 + $0x48] sm:$0xff] (!%p1227_p10), %v1588_v32 }
  0x34   : > { %350 = vst [vmem:[#allocation2 + $0x50] sm:$0xff] %v1588_v32  ;;  %351 = vst [vmem:[#allocation2 + $0x58] sm:$0xff] %v1588_v32 }
  0x35   : > { %352 = vst [vmem:[#allocation2 + $0x60] sm:$0xff] %v1588_v32  ;;  %353 = vst [vmem:[#allocation2 + $0x68] sm:$0xff] %v1588_v32 }
  0x36   : > { %354 = vst [vmem:[#allocation2 + $0x70] sm:$0xff] %v1588_v32  ;;  %355 = vst [vmem:[#allocation2 + $0x78] sm:$0xff] %v1588_v32 }
  0x37 PF: > { %v1468_v33 = vld [vmem:[%s1727_s7 + $0x40] sm:$0xff]   ;;  %v1472_v37 = vld [vmem:[%s1727_s7 + $0x48] sm:$0xff]   ;;  %v1476_v41 = vld [vmem:[%s1727_s7 + $0x50] sm:$0xff]   ;;  %p1292_p11 = scmp.ne.s32.totalorder %s1578_s14, 1 }
  0x38   : > { %v1469_v34 = vld [vmem:[%s1727_s7 + $0xc0] sm:$0xff]   ;;  %1299 = vmatprep.subr.bf16.mxu0 %v1468_v33  ;;  %v1473_v38 = vld [vmem:[%s1727_s7 + $0xc8] sm:$0xff]   ;;  %v1477_v42 = vld [vmem:[%s1727_s7 + $0xd0] sm:$0xff]  }
  0x39   : > { %v1470_v35 = vld [vmem:[%s1727_s7] sm:$0xff]   ;;  %1363 = vmatprep.subr.bf16.mxu1 %v1469_v34  ;;  %v1474_v39 = vld [vmem:[%s1727_s7 + $0x8] sm:$0xff]   ;;  %v1478_v43 = vld [vmem:[%s1727_s7 + $0x10] sm:$0xff]  }
  0x3a   : > { %v1471_v36 = vld [vmem:[%s1727_s7 + $0x80] sm:$0xff]   ;;  %1300 = vmatpush3.bf16.msra.mxu0 %v1470_v35  ;;  %v1475_v40 = vld [vmem:[%s1727_s7 + $0x88] sm:$0xff]   ;;  %v1479_v44 = vld [vmem:[%s1727_s7 + $0x90] sm:$0xff]  }
  0x3b   : > { %1364 = vmatpush3.bf16.msra.mxu1 %v1471_v36  ;;  %1301 = vmatprep.subr.bf16.mxu0 %v1472_v37  ;;  %v1480_v45 = vld [vmem:[%s1727_s7 + $0x58] sm:$0xff]   ;;  %v1484_v49 = vld [vmem:[%s1727_s7 + $0x60] sm:$0xff]   ;;  %v1488_v53 = vld [vmem:[%s1727_s7 + $0x68] sm:$0xff]  }
  0x3c   : > { %1365 = vmatprep.subr.bf16.mxu1 %v1473_v38  ;;  %v1481_v46 = vld [vmem:[%s1727_s7 + $0xd8] sm:$0xff]   ;;  %v1485_v50 = vld [vmem:[%s1727_s7 + $0xe0] sm:$0xff]   ;;  %v1489_v54 = vld [vmem:[%s1727_s7 + $0xe8] sm:$0xff]  }
  0x3d   : > { %v1482_v47 = vld [vmem:[%s1727_s7 + $0x18] sm:$0xff]   ;;  %v1486_v51 = vld [vmem:[%s1727_s7 + $0x20] sm:$0xff]   ;;  %v1490_v55 = vld [vmem:[%s1727_s7 + $0x28] sm:$0xff]  }
  0x3e   : > { %1302 = vmatpush3.bf16.msra.mxu0 %v1474_v39  ;;  %v1483_v48 = vld [vmem:[%s1727_s7 + $0x98] sm:$0xff]   ;;  %v1487_v52 = vld [vmem:[%s1727_s7 + $0xa0] sm:$0xff]   ;;  %v1491_v56 = vld [vmem:[%s1727_s7 + $0xa8] sm:$0xff]  }
  0x3f   : > { %1366 = vmatpush3.bf16.msra.mxu1 %v1475_v40  ;;  %1303 = vmatprep.subr.bf16.mxu0 %v1476_v41  ;;  %v1492_v57 = vld [vmem:[%s1727_s7 + $0x70] sm:$0xff]   ;;  %v1496_v61 = vld [vmem:[%s1727_s7 + $0x78] sm:$0xff]  }
  0x40   : > { %1367 = vmatprep.subr.bf16.mxu1 %v1477_v42  ;;  %v1493_v58 = vld [vmem:[%s1727_s7 + $0xf0] sm:$0xff]   ;;  %v1497_v62 = vld [vmem:[%s1727_s7 + $0xf8] sm:$0xff]   ;;  %v356_v42 = vld [vmem:[#allocation2] sm:$0xff] }
  0x41   : > { %v1494_v59 = vld [vmem:[%s1727_s7 + $0x30] sm:$0xff]   ;;  %v1498_v63 = vld [vmem:[%s1727_s7 + $0x38] sm:$0xff]  }
  0x42   : > { %1304 = vmatpush3.bf16.msra.mxu0 %v1478_v43  ;;  %v1495_v60 = vld [vmem:[%s1727_s7 + $0xb0] sm:$0xff]   ;;  %v1499_v0 = vld [vmem:[%s1727_s7 + $0xb8] sm:$0xff]  }
  0x43   : > { %1368 = vmatpush3.bf16.msra.mxu1 %v1479_v44  ;;  %1305 = vmatprep.subr.bf16.mxu0 %v1480_v45  ;;  %v1500_v1 = vld [vmem:[%s1729_s8] ss:$16 sps:$4 sm:$0xff]   ;;  %v1502_v2 = vld [vmem:[%s1729_s8 + $0x4] ss:$16 sps:$4 sm:$0xff]   ;;  %v1503_v3 = vld [vmem:[%s1729_s8 + $0x8] ss:$16 sps:$4 sm:$0xff]  }
  0x44   : > { %1369 = vmatprep.subr.bf16.mxu1 %v1481_v46  ;;  %v1505_v4 = vld [vmem:[%s1729_s8 + $0xc] ss:$16 sps:$4 sm:$0xff]   ;;  %852 = vmatprep.mubr.bf16.mxu0 %v1502_v2  ;;  %v1506_v5 = vld [vmem:[%s1729_s8 + $0x24] ss:$16 sps:$4 sm:$0xff]   ;;  %v1510_v7 = vld [vmem:[%s1729_s8 + $0x20] ss:$16 sps:$4 sm:$0xff]  }
  0x45   : > { %949 = vmatprep.mubr.bf16.mxu1 %v1505_v4  ;;  %v1508_v6 = vld [vmem:[%s1729_s8 + $0x2c] ss:$16 sps:$4 sm:$0xff]   ;;  %v1511_v8 = vld [vmem:[%s1729_s8 + $0x28] ss:$16 sps:$4 sm:$0xff]   ;;  %v1512_v9 = vld [vmem:[%s1729_s8 + $0x44] ss:$16 sps:$4 sm:$0xff]  }
  0x46   : > { %1306 = vmatpush3.bf16.msra.mxu0 %v1482_v47  ;;  %v1514_v10 = vld [vmem:[%s1729_s8 + $0x4c] ss:$16 sps:$4 sm:$0xff]   ;;  %v1516_v11 = vld [vmem:[%s1729_s8 + $0x40] ss:$16 sps:$4 sm:$0xff]   ;;  %v1517_v12 = vld [vmem:[%s1729_s8 + $0x48] ss:$16 sps:$4 sm:$0xff]  }
  0x47   : > { %1370 = vmatpush3.bf16.msra.mxu1 %v1483_v48  ;;  %1307 = vmatprep.subr.bf16.mxu0 %v1484_v49  ;;  %v1518_v13 = vld [vmem:[%s1729_s8 + $0x64] ss:$16 sps:$4 sm:$0xff]   ;;  %v1520_v14 = vld [vmem:[%s1729_s8 + $0x6c] ss:$16 sps:$4 sm:$0xff]   ;;  %v1522_v15 = vld [vmem:[%s1729_s8 + $0x60] ss:$16 sps:$4 sm:$0xff]  }
  0x48   : > { %1371 = vmatprep.subr.bf16.mxu1 %v1485_v50  ;;  %v1523_v16 = vld [vmem:[%s1729_s8 + $0x68] ss:$16 sps:$4 sm:$0xff]   ;;  %v1524_v17 = vld [vmem:[%s1729_s8 + $0x84] ss:$16 sps:$4 sm:$0xff]   ;;  %v1526_v18 = vld [vmem:[%s1729_s8 + $0x8c] ss:$16 sps:$4 sm:$0xff]  }
  0x49   : > { %v1528_v19 = vld [vmem:[%s1729_s8 + $0x80] ss:$16 sps:$4 sm:$0xff]   ;;  %v1529_v20 = vld [vmem:[%s1729_s8 + $0x88] ss:$16 sps:$4 sm:$0xff]   ;;  %v1530_v21 = vld [vmem:[%s1729_s8 + $0xa4] ss:$16 sps:$4 sm:$0xff]  }
  0x4a   : > { %1308 = vmatpush3.bf16.msra.mxu0 %v1486_v51  ;;  %v1532_v22 = vld [vmem:[%s1729_s8 + $0xac] ss:$16 sps:$4 sm:$0xff]   ;;  %v1534_v23 = vld [vmem:[%s1729_s8 + $0xa0] ss:$16 sps:$4 sm:$0xff]   ;;  %v1535_v24 = vld [vmem:[%s1729_s8 + $0xa8] ss:$16 sps:$4 sm:$0xff]  }
  0x4b   : > { %1372 = vmatpush3.bf16.msra.mxu1 %v1487_v52  ;;  %1309 = vmatprep.subr.bf16.mxu0 %v1488_v53  ;;  %v1536_v25 = vld [vmem:[%s1729_s8 + $0xc4] ss:$16 sps:$4 sm:$0xff]   ;;  %v1538_v26 = vld [vmem:[%s1729_s8 + $0xcc] ss:$16 sps:$4 sm:$0xff]   ;;  %v1540_v27 = vld [vmem:[%s1729_s8 + $0xc0] ss:$16 sps:$4 sm:$0xff]  }
  0x4c   : > { %1373 = vmatprep.subr.bf16.mxu1 %v1489_v54  ;;  %v1541_v28 = vld [vmem:[%s1729_s8 + $0xc8] ss:$16 sps:$4 sm:$0xff]   ;;  %v1542_v29 = vld [vmem:[%s1729_s8 + $0xe4] ss:$16 sps:$4 sm:$0xff]   ;;  %v1544_v30 = vld [vmem:[%s1729_s8 + $0xec] ss:$16 sps:$4 sm:$0xff]  }
  0x4d   : > { %v1546_v31 = vld [vmem:[%s1729_s8 + $0xe0] ss:$16 sps:$4 sm:$0xff]   ;;  %v1547_v32 = vld [vmem:[%s1729_s8 + $0xe8] ss:$16 sps:$4 sm:$0xff]  }
  0x4e   : > { %1310 = vmatpush3.bf16.msra.mxu0 %v1490_v55  ;;  %v357_v47 = vld [vmem:[#allocation2 + $0x8] sm:$0xff] }
  0x4f   : > { %1374 = vmatpush3.bf16.msra.mxu1 %v1491_v56  ;;  %1311 = vmatprep.subr.bf16.mxu0 %v1492_v57 }
  0x50   : > { %1375 = vmatprep.subr.bf16.mxu1 %v1493_v58 }
  0x52   : > { %1312 = vmatpush3.bf16.msra.mxu0 %v1494_v59 }
  0x53   : > { %1376 = vmatpush3.bf16.msra.mxu1 %v1495_v60  ;;  %1313 = vmatprep.subr.bf16.mxu0 %v1496_v61  ;;  %v358_v60 = vld [vmem:[#allocation2 + $0x10] sm:$0xff] }
  0x54   : > { %1377 = vmatprep.subr.bf16.mxu1 %v1497_v62 }
  0x56   : > { %1314 = vmatpush3.bf16.msra.mxu0 %v1498_v63 }
  0x57   : > { %1378 = vmatpush3.bf16.msra.mxu1 %v1499_v0 }
  0x59   : > { %853 = vmatmul.mubr.bf16.vlgmr.msra.gmra.mrb[0].mxu0 %v1500_v1  ;;  %v359_v1 = vld [vmem:[#allocation2 + $0x18] sm:$0xff] }
  0x5a   : > { %950 = vmatmul.mubr.bf16.vlgmr.msra.gmra.mrb[0].mxu1 %v1503_v3  ;;  %860 = vmatprep.mubr.bf16.mxu0 %v1506_v5 }
  0x5b   : > { %957 = vmatprep.mubr.bf16.mxu1 %v1508_v6 }
  0x61   : > { %861 = vmatmul.mubr.bf16.gmra.mrb[4].mxu0 %v1510_v7 }
  0x62   : > { %958 = vmatmul.mubr.bf16.gmra.mrb[4].mxu1 %v1511_v8  ;;  %868 = vmatprep.mubr.bf16.mxu0 %v1512_v9 }
  0x63   : > { %965 = vmatprep.mubr.bf16.mxu1 %v1514_v10 }
  0x69   : > { %869 = vmatmul.mubr.bf16.gmra.mrb[8].mxu0 %v1516_v11 }
  0x6a   : > { %966 = vmatmul.mubr.bf16.gmra.mrb[8].mxu1 %v1517_v12  ;;  %876 = vmatprep.mubr.bf16.mxu0 %v1518_v13 }
  0x6b   : > { %973 = vmatprep.mubr.bf16.mxu1 %v1520_v14  ;;  %v360_v14 = vld [vmem:[#allocation2 + $0x20] sm:$0xff] }
  0x71   : > { %877 = vmatmul.mubr.bf16.gmra.mrb[12].mxu0 %v1522_v15 }
  0x72   : > { %974 = vmatmul.mubr.bf16.gmra.mrb[12].mxu1 %v1523_v16  ;;  %884 = vmatprep.mubr.bf16.mxu0 %v1524_v17 }
  0x73   : > { %981 = vmatprep.mubr.bf16.mxu1 %v1526_v18 }
  0x79   : > { %885 = vmatmul.mubr.bf16.gmra.mrb[16].mxu0 %v1528_v19  ;;  %v361_v19 = vld [vmem:[#allocation2 + $0x28] sm:$0xff] }
  0x7a   : > { %982 = vmatmul.mubr.bf16.gmra.mrb[16].mxu1 %v1529_v20  ;;  %892 = vmatprep.mubr.bf16.mxu0 %v1530_v21 }
  0x7b   : > { %989 = vmatprep.mubr.bf16.mxu1 %v1532_v22 }
  0x81   : > { %893 = vmatmul.mubr.bf16.gmra.mrb[20].mxu0 %v1534_v23 }
  0x82   : > { %990 = vmatmul.mubr.bf16.gmra.mrb[20].mxu1 %v1535_v24  ;;  %900 = vmatprep.mubr.bf16.mxu0 %v1536_v25 }
  0x83   : > { %997 = vmatprep.mubr.bf16.mxu1 %v1538_v26 }
  0x89   : > { %901 = vmatmul.mubr.bf16.gmra.mrb[24].mxu0 %v1540_v27 }
  0x8a   : > { %998 = vmatmul.mubr.bf16.gmra.mrb[24].mxu1 %v1541_v28  ;;  %908 = vmatprep.mubr.bf16.mxu0 %v1542_v29 }
  0x8b   : > { %1005 = vmatprep.mubr.bf16.mxu1 %v1544_v30 }
  0x91   : > { %909 = vmatmul.mubr.bf16.gmra.mrb[28].mxu0 %v1546_v31 }
  0x92   : > { %1006 = vmatmul.mubr.bf16.gmra.mrb[28].mxu1 %v1547_v32  ;;  %v362_v32 = vld [vmem:[#allocation2 + $0x30] sm:$0xff] }
 0x12c   : > { %v1315_v33 = vpop.f32.mrb[0].mxu0 }
 0x12d   : > { %v1379_v34 = vpop.f32.mrb[0].mxu1  ;;  %v1316_v35 = vpop.f32.mrb[1].mxu0 }
 0x12e   : > { %v1317_v36 = vadd.f32 %v1316_v35, %v1315_v33  ;;  %v1380_v37 = vpop.f32.mrb[1].mxu1  ;;  %v1318_v38 = vpop.f32.mrb[2].mxu0 }
 0x12f   : > { %v1381_v39 = vadd.f32 %v1380_v37, %v1379_v34  ;;  %v1382_v40 = vpop.f32.mrb[2].mxu1  ;;  %v1319_v41 = vpop.f32.mrb[3].mxu0  ;;  %v363_v37 = vld [vmem:[#allocation2 + $0x38] sm:$0xff] }
 0x130   : > { %v1320_v43 = vadd.f32 %v1319_v41, %v1318_v38  ;;  %v1383_v44 = vpop.f32.mrb[3].mxu1 }
 0x131   : > { %v952_v45 = vadd.f32 %v1381_v39, %v1317_v36  ;;  %v1384_v46 = vadd.f32 %v1383_v44, %v1382_v40 }
 0x133   : > { %v1014_v48 = vadd.f32 %v952_v45, %v356_v42  ;;  %v955_v49 = vadd.f32 %v1384_v46, %v1320_v43 }
 0x134   : > { %v1321_v50 = vpop.f32.mrb[4].mxu0 }
 0x135   : > { %1030 = vst [vmem:[#allocation2] sm:$0xff] %v1014_v48  ;;  %v1015_v51 = vadd.f32 %v955_v49, %v357_v47  ;;  %v1385_v52 = vpop.f32.mrb[4].mxu1  ;;  %v1322_v53 = vpop.f32.mrb[5].mxu0 }
 0x136   : > { %v1323_v54 = vadd.f32 %v1322_v53, %v1321_v50  ;;  %v1386_v55 = vpop.f32.mrb[5].mxu1  ;;  %v1324_v56 = vpop.f32.mrb[6].mxu0  ;;  %v364_v50 = vld [vmem:[#allocation2 + $0x40] sm:$0xff] }
 0x137   : > { %1031 = vst [vmem:[#allocation2 + $0x8] sm:$0xff] %v1015_v51  ;;  %v1387_v57 = vadd.f32 %v1386_v55, %v1385_v52  ;;  %v1388_v58 = vpop.f32.mrb[6].mxu1  ;;  %v1325_v59 = vpop.f32.mrb[7].mxu0  ;;  %v365_v55 = vld [vmem:[#allocation2 + $0x48] sm:$0xff] }
 0x138   : > { %v1326_v61 = vadd.f32 %v1325_v59, %v1324_v56  ;;  %v1389_v62 = vpop.f32.mrb[7].mxu1 }
 0x139   : > { %v960_v63 = vadd.f32 %v1387_v57, %v1323_v54  ;;  %v1390_v0 = vadd.f32 %v1389_v62, %v1388_v58 }
 0x13b   : > { %v1016_v2 = vadd.f32 %v960_v63, %v358_v60  ;;  %v963_v3 = vadd.f32 %v1390_v0, %v1326_v61 }
 0x13c   : > { %v1327_v4 = vpop.f32.mrb[8].mxu0 }
 0x13d   : > { %1032 = vst [vmem:[#allocation2 + $0x10] sm:$0xff] %v1016_v2  ;;  %v1017_v5 = vadd.f32 %v963_v3, %v359_v1  ;;  %v1391_v6 = vpop.f32.mrb[8].mxu1  ;;  %v1328_v7 = vpop.f32.mrb[9].mxu0 }
 0x13e   : > { %v1329_v8 = vadd.f32 %v1328_v7, %v1327_v4  ;;  %v1392_v9 = vpop.f32.mrb[9].mxu1  ;;  %v1330_v10 = vpop.f32.mrb[10].mxu0  ;;  %v366_v4 = vld [vmem:[#allocation2 + $0x50] sm:$0xff] }
 0x13f   : > { %1033 = vst [vmem:[#allocation2 + $0x18] sm:$0xff] %v1017_v5  ;;  %v1393_v11 = vadd.f32 %v1392_v9, %v1391_v6  ;;  %v1394_v12 = vpop.f32.mrb[10].mxu1  ;;  %v1331_v13 = vpop.f32.mrb[11].mxu0  ;;  %v367_v9 = vld [vmem:[#allocation2 + $0x58] sm:$0xff] }
 0x140   : > { %v1332_v15 = vadd.f32 %v1331_v13, %v1330_v10  ;;  %v1395_v16 = vpop.f32.mrb[11].mxu1 }
 0x141   : > { %v968_v17 = vadd.f32 %v1393_v11, %v1329_v8  ;;  %v1396_v18 = vadd.f32 %v1395_v16, %v1394_v12 }
 0x143   : > { %v1018_v20 = vadd.f32 %v968_v17, %v360_v14  ;;  %v971_v21 = vadd.f32 %v1396_v18, %v1332_v15 }
 0x144   : > { %v1333_v22 = vpop.f32.mrb[12].mxu0 }
 0x145   : > { %1034 = vst [vmem:[#allocation2 + $0x20] sm:$0xff] %v1018_v20  ;;  %v1019_v23 = vadd.f32 %v971_v21, %v361_v19  ;;  %v1397_v24 = vpop.f32.mrb[12].mxu1  ;;  %v1334_v25 = vpop.f32.mrb[13].mxu0 }
 0x146   : > { %v1335_v26 = vadd.f32 %v1334_v25, %v1333_v22  ;;  %v1398_v27 = vpop.f32.mrb[13].mxu1  ;;  %v1336_v28 = vpop.f32.mrb[14].mxu0  ;;  %v368_v22 = vld [vmem:[#allocation2 + $0x60] sm:$0xff] }
 0x147   : > { %1035 = vst [vmem:[#allocation2 + $0x28] sm:$0xff] %v1019_v23  ;;  %v1399_v29 = vadd.f32 %v1398_v27, %v1397_v24  ;;  %v1400_v30 = vpop.f32.mrb[14].mxu1  ;;  %v1337_v31 = vpop.f32.mrb[15].mxu0  ;;  %v369_v27 = vld [vmem:[#allocation2 + $0x68] sm:$0xff] }
 0x148   : > { %v1338_v33 = vadd.f32 %v1337_v31, %v1336_v28  ;;  %v1401_v34 = vpop.f32.mrb[15].mxu1 }
 0x149   : > { %v976_v35 = vadd.f32 %v1399_v29, %v1335_v26  ;;  %v1402_v36 = vadd.f32 %v1401_v34, %v1400_v30 }
 0x14b   : > { %v1020_v38 = vadd.f32 %v976_v35, %v362_v32  ;;  %v979_v39 = vadd.f32 %v1402_v36, %v1338_v33 }
 0x14c   : > { %v1339_v40 = vpop.f32.mrb[16].mxu0 }
 0x14d   : > { %1036 = vst [vmem:[#allocation2 + $0x30] sm:$0xff] %v1020_v38  ;;  %v1021_v41 = vadd.f32 %v979_v39, %v363_v37  ;;  %v1403_v42 = vpop.f32.mrb[16].mxu1  ;;  %v1340_v43 = vpop.f32.mrb[17].mxu0 }
 0x14e   : > { %v1341_v44 = vadd.f32 %v1340_v43, %v1339_v40  ;;  %v1404_v45 = vpop.f32.mrb[17].mxu1  ;;  %v1342_v46 = vpop.f32.mrb[18].mxu0  ;;  %v370_v40 = vld [vmem:[#allocation2 + $0x70] sm:$0xff] }
 0x14f   : > { %1037 = vst [vmem:[#allocation2 + $0x38] sm:$0xff] %v1021_v41  ;;  %v1405_v47 = vadd.f32 %v1404_v45, %v1403_v42  ;;  %v1406_v48 = vpop.f32.mrb[18].mxu1  ;;  %v1343_v49 = vpop.f32.mrb[19].mxu0  ;;  %v371_v45 = vld [vmem:[#allocation2 + $0x78] sm:$0xff] }
 0x150   : > { %v1344_v51 = vadd.f32 %v1343_v49, %v1342_v46  ;;  %v1407_v52 = vpop.f32.mrb[19].mxu1  ;;  %v1050_v49 = vld [vmem:[#allocation2] sm:$0xff] (!%p1292_p11) }
 0x151   : > { %v984_v53 = vadd.f32 %v1405_v47, %v1341_v44  ;;  %v1408_v54 = vadd.f32 %v1407_v52, %v1406_v48 }
 0x153   : > { %v1022_v56 = vadd.f32 %v984_v53, %v364_v50  ;;  %v987_v57 = vadd.f32 %v1408_v54, %v1344_v51  ;;  %v1293_v50 = vld [vmem:[%s1865_s2] ss:$0 sm:$0xff] (!%p1292_p11)  ;;  %v1051_v51 = vld [vmem:[#allocation2 + $0x8] sm:$0xff] (!%p1292_p11)  ;;  %v1052_v54 = vld [vmem:[#allocation2 + $0x10] sm:$0xff] (!%p1292_p11) }
 0x154   : > { %v1345_v58 = vpop.f32.mrb[20].mxu0  ;;  %v1073_v52 = vadd.f32 (!%p1292_p11), %v1293_v50, %v1050_v49  ;;  %v1074_v53 = vadd.f32 (!%p1292_p11), %v1293_v50, %v1051_v51 }
 0x155   : > { %1038 = vst [vmem:[#allocation2 + $0x40] sm:$0xff] %v1022_v56  ;;  %v1023_v59 = vadd.f32 %v987_v57, %v365_v55  ;;  %v1409_v60 = vpop.f32.mrb[20].mxu1  ;;  %v1346_v61 = vpop.f32.mrb[21].mxu0  ;;  %v1053_v55 = vld [vmem:[#allocation2 + $0x18] sm:$0xff] (!%p1292_p11)  ;;  %v1054_v56 = vld [vmem:[#allocation2 + $0x20] sm:$0xff] (!%p1292_p11)  ;;  %v1075_v57 = vadd.f32 (!%p1292_p11), %v1293_v50, %v1052_v54 }
 0x156   : > { %v1347_v62 = vadd.f32 %v1346_v61, %v1345_v58  ;;  %v1410_v63 = vpop.f32.mrb[21].mxu1  ;;  %v1348_v0 = vpop.f32.mrb[22].mxu0  ;;  %v1076_v58 = vadd.f32 (!%p1292_p11), %v1293_v50, %v1053_v55  ;;  %v1056_v61 = vld [vmem:[#allocation2 + $0x30] sm:$0xff] (!%p1292_p11)  ;;  %1089 = vst [vmem:[%s1866_s3] sm:$0xff] (!%p1292_p11), %v1073_v52  ;;  %1090 = vst [vmem:[%s1866_s3 + $0x8] sm:$0xff] (!%p1292_p11), %v1074_v53 }
 0x157   : > { %1039 = vst [vmem:[#allocation2 + $0x48] sm:$0xff] %v1023_v59  ;;  %v1411_v1 = vadd.f32 %v1410_v63, %v1409_v60  ;;  %v1412_v2 = vpop.f32.mrb[22].mxu1  ;;  %v1349_v3 = vpop.f32.mrb[23].mxu0  ;;  %v1077_v59 = vadd.f32 (!%p1292_p11), %v1293_v50, %v1054_v56  ;;  %v1055_v60 = vld [vmem:[#allocation2 + $0x28] sm:$0xff] (!%p1292_p11)  ;;  %1091 = vst [vmem:[%s1866_s3 + $0x10] sm:$0xff] (!%p1292_p11), %v1075_v57 }
 0x158   : > { %v1350_v5 = vadd.f32 %v1349_v3, %v1348_v0  ;;  %v1413_v6 = vpop.f32.mrb[23].mxu1  ;;  %v1078_v63 = vadd.f32 (!%p1292_p11), %v1293_v50, %v1055_v60  ;;  %v1079_v0 = vadd.f32 (!%p1292_p11), %v1293_v50, %v1056_v61  ;;  %1092 = vst [vmem:[%s1866_s3 + $0x18] sm:$0xff] (!%p1292_p11), %v1076_v58 }
 0x159   : > { %v992_v7 = vadd.f32 %v1411_v1, %v1347_v62  ;;  %v1414_v8 = vadd.f32 %v1413_v6, %v1412_v2  ;;  %v1057_v62 = vld [vmem:[#allocation2 + $0x38] sm:$0xff] (!%p1292_p11)  ;;  %1093 = vst [vmem:[%s1866_s3 + $0x20] sm:$0xff] (!%p1292_p11), %v1077_v59 }
 0x15a   : > { %v1080_v1 = vadd.f32 (!%p1292_p11), %v1293_v50, %v1057_v62  ;;  %1094 = vst [vmem:[%s1866_s3 + $0x28] sm:$0xff] (!%p1292_p11), %v1078_v63  ;;  %1095 = vst [vmem:[%s1866_s3 + $0x30] sm:$0xff] (!%p1292_p11), %v1079_v0 }
 0x15b   : > { %v1024_v10 = vadd.f32 %v992_v7, %v366_v4  ;;  %v995_v11 = vadd.f32 %v1414_v8, %v1350_v5 }
 0x15c   : > { %v1351_v12 = vpop.f32.mrb[24].mxu0  ;;  %v1058_v2 = vld [vmem:[#allocation2 + $0x40] sm:$0xff] (!%p1292_p11)  ;;  %1096 = vst [vmem:[%s1866_s3 + $0x38] sm:$0xff] (!%p1292_p11), %v1080_v1 }
 0x15d   : > { %1040 = vst [vmem:[#allocation2 + $0x50] sm:$0xff] %v1024_v10  ;;  %v1025_v13 = vadd.f32 %v995_v11, %v367_v9  ;;  %v1415_v14 = vpop.f32.mrb[24].mxu1  ;;  %v1352_v15 = vpop.f32.mrb[25].mxu0  ;;  %v1081_v5 = vadd.f32 (!%p1292_p11), %v1293_v50, %v1058_v2 }
 0x15e   : > { %v1353_v16 = vadd.f32 %v1352_v15, %v1351_v12  ;;  %v1416_v17 = vpop.f32.mrb[25].mxu1  ;;  %v1354_v18 = vpop.f32.mrb[26].mxu0  ;;  %v1059_v3 = vld [vmem:[#allocation2 + $0x48] sm:$0xff] (!%p1292_p11) }
 0x15f   : > { %1041 = vst [vmem:[#allocation2 + $0x58] sm:$0xff] %v1025_v13  ;;  %v1417_v19 = vadd.f32 %v1416_v17, %v1415_v14  ;;  %v1418_v20 = vpop.f32.mrb[26].mxu1  ;;  %v1355_v21 = vpop.f32.mrb[27].mxu0  ;;  %v1082_v6 = vadd.f32 (!%p1292_p11), %v1293_v50, %v1059_v3  ;;  %1097 = vst [vmem:[%s1866_s3 + $0x40] sm:$0xff] (!%p1292_p11), %v1081_v5 }
 0x160   : > { %v1356_v23 = vadd.f32 %v1355_v21, %v1354_v18  ;;  %v1419_v24 = vpop.f32.mrb[27].mxu1 }
 0x161   : > { %v1000_v25 = vadd.f32 %v1417_v19, %v1353_v16  ;;  %v1420_v26 = vadd.f32 %v1419_v24, %v1418_v20  ;;  %1098 = vst [vmem:[%s1866_s3 + $0x48] sm:$0xff] (!%p1292_p11), %v1082_v6 }
 0x163   : > { %v1026_v28 = vadd.f32 %v1000_v25, %v368_v22  ;;  %v1003_v29 = vadd.f32 %v1420_v26, %v1356_v23 }
 0x164   : > { %v1357_v30 = vpop.f32.mrb[28].mxu0  ;;  %v1060_v4 = vld [vmem:[#allocation2 + $0x50] sm:$0xff] (!%p1292_p11) }
 0x165   : > { %1042 = vst [vmem:[#allocation2 + $0x60] sm:$0xff] %v1026_v28  ;;  %v1027_v31 = vadd.f32 %v1003_v29, %v369_v27  ;;  %v1421_v32 = vpop.f32.mrb[28].mxu1  ;;  %v1358_v33 = vpop.f32.mrb[29].mxu0  ;;  %v1083_v7 = vadd.f32 (!%p1292_p11), %v1293_v50, %v1060_v4 }
 0x166   : > { %v1359_v34 = vadd.f32 %v1358_v33, %v1357_v30  ;;  %v1422_v35 = vpop.f32.mrb[29].mxu1  ;;  %v1360_v36 = vpop.f32.mrb[30].mxu0  ;;  %v1061_v8 = vld [vmem:[#allocation2 + $0x58] sm:$0xff] (!%p1292_p11) }
 0x167   : > { %1043 = vst [vmem:[#allocation2 + $0x68] sm:$0xff] %v1027_v31  ;;  %v1423_v37 = vadd.f32 %v1422_v35, %v1421_v32  ;;  %v1424_v38 = vpop.f32.mrb[30].mxu1  ;;  %v1361_v39 = vpop.f32.mrb[31].mxu0  ;;  %v1084_v11 = vadd.f32 (!%p1292_p11), %v1293_v50, %v1061_v8  ;;  %1099 = vst [vmem:[%s1866_s3 + $0x50] sm:$0xff] (!%p1292_p11), %v1083_v7 }
 0x168   : > { %v1362_v41 = vadd.f32 %v1361_v39, %v1360_v36  ;;  %v1425_v42 = vpop.f32.mrb[31].mxu1 }
 0x169   : > { %v1008_v43 = vadd.f32 %v1423_v37, %v1359_v34  ;;  %v1426_v44 = vadd.f32 %v1425_v42, %v1424_v38  ;;  %1049 = sbr.rel (%p1292_p11) target bundleno = 378 (0x17a), region = 63  ;;  %1100 = vst [vmem:[%s1866_s3 + $0x58] sm:$0xff] (!%p1292_p11), %v1084_v11 }
 0x16b   : > { %v1028_v46 = vadd.f32 %v1008_v43, %v370_v40  ;;  %v1011_v47 = vadd.f32 %v1426_v44, %v1362_v41 }
 0x16c   : > { %v1062_v9 = vld [vmem:[#allocation2 + $0x60] sm:$0xff] (!%p1292_p11) }
 0x16d   : > { %1044 = vst [vmem:[#allocation2 + $0x70] sm:$0xff] %v1028_v46  ;;  %v1029_v48 = vadd.f32 %v1011_v47, %v371_v45  ;;  %v1085_v12 = vadd.f32 (!%p1292_p11), %v1293_v50, %v1062_v9 }
 0x16e   : > { %v1063_v10 = vld [vmem:[#allocation2 + $0x68] sm:$0xff] (!%p1292_p11) }
 0x16f   : > { %1045 = vst [vmem:[#allocation2 + $0x78] sm:$0xff] %v1029_v48  ;;  %v1086_v13 = vadd.f32 (!%p1292_p11), %v1293_v50, %v1063_v10  ;;  %1101 = vst [vmem:[%s1866_s3 + $0x60] sm:$0xff] (!%p1292_p11), %v1085_v12 }
 0x171   : > { %1102 = vst [vmem:[%s1866_s3 + $0x68] sm:$0xff] %v1086_v13 }
 0x174   : > { %v1064_v14 = vld [vmem:[#allocation2 + $0x70] sm:$0xff] }
 0x175   : > { %v1087_v16 = vadd.f32 %v1293_v50, %v1064_v14 }
 0x176   : > { %v1065_v15 = vld [vmem:[#allocation2 + $0x78] sm:$0xff] }
 0x177   : > { %v1088_v17 = vadd.f32 %v1293_v50, %v1065_v15  ;;  %1103 = vst [vmem:[%s1866_s3 + $0x70] sm:$0xff] %v1087_v16 }
 0x179   : > { %1104 = vst [vmem:[%s1866_s3 + $0x78] sm:$0xff] %v1088_v17 }
 0x17a PF: > { %s13_s16 = sadd.s32 1, %s1586_s16   ;;  %s1867_s12 = smov %s1574_s13 }
 0x17b   : > { %p10_p12 = scmp.ge.s32.totalorder %s13_s16, 4   ;;  %s1868_s13 = smov %s1644_s20 }
 0x17c   : > { %s1869_s14 = smov %s1582_s15  ;;  %s1870_s15 = smov %s1872_s17 }
 0x17d   :  { %12 = sbr.rel (!%p10_p12) target bundleno = 3 (0x3), region = 104 }

// kernel: patchgan_forward.14
= control target key start
LH: loop header
LB: loop body
LE: loop exit
PB: predicated region body
PF: predicated region fallthrough
CT: control target
= control target key end

     0   :  { %s305_s0 = inlined_call_operand.vmem [shape: f32[128,128], index: 0, kind: input, shape index: {}]   ;;  %s306_s1 = inlined_call_operand.vmem [shape: f32[1,128], index: 1, kind: input, shape index: {}]   ;;  %s307_s2 = inlined_call_operand.vmem [shape: f32[1,128], index: 2, kind: input, shape index: {}]   ;;  %s308_s3 = inlined_call_operand.vmem [shape: f32[128,128], index: 3, kind: output, shape index: {}]  }
   0x1   :  { %v14_v0 = vld [vmem:[%s305_s0] sm:$0xff]  ;;  %v15_v4 = vld [vmem:[%s305_s0 + $0x8] sm:$0xff]  ;;  %v16_v5 = vld [vmem:[%s305_s0 + $0x10] sm:$0xff] }
   0x2   :  { %v172_v1 = vld [vmem:[%s306_s1] ss:$0 sm:$0xff]  ;;  %v17_v6 = vld [vmem:[%s305_s0 + $0x18] sm:$0xff]  ;;  %v19_v11 = vld [vmem:[%s305_s0 + $0x28] sm:$0xff] }
   0x3   :  { %v177_v2 = vld [vmem:[%s307_s2] ss:$0 sm:$0xff]  ;;  %v37_v3 = vmul.f32 %v172_v1, %v14_v0  ;;  %v38_v7 = vmul.f32 %v172_v1, %v15_v4  ;;  %v39_v8 = vmul.f32 %v172_v1, %v16_v5  ;;  %v40_v9 = vmul.f32 %v172_v1, %v17_v6  ;;  %v20_v12 = vld [vmem:[%s305_s0 + $0x30] sm:$0xff]  ;;  %v21_v17 = vld [vmem:[%s305_s0 + $0x38] sm:$0xff] }
   0x4   :  { %v18_v10 = vld [vmem:[%s305_s0 + $0x20] sm:$0xff]  ;;  %v42_v15 = vmul.f32 %v172_v1, %v19_v11  ;;  %v43_v16 = vmul.f32 %v172_v1, %v20_v12  ;;  %v44_v21 = vmul.f32 %v172_v1, %v21_v17  ;;  %v23_v30 = vld [vmem:[%s305_s0 + $0x48] sm:$0xff]  ;;  %v24_v31 = vld [vmem:[%s305_s0 + $0x50] sm:$0xff] }
   0x5   :  { %v60_v13 = vadd.f32 %v177_v2, %v37_v3  ;;  %v41_v14 = vmul.f32 %v172_v1, %v18_v10  ;;  %v61_v18 = vadd.f32 %v177_v2, %v38_v7  ;;  %v62_v19 = vadd.f32 %v177_v2, %v39_v8  ;;  %v22_v25 = vld [vmem:[%s305_s0 + $0x40] sm:$0xff]  ;;  %v25_v43 = vld [vmem:[%s305_s0 + $0x58] sm:$0xff]  ;;  %v27_v45 = vld [vmem:[%s305_s0 + $0x68] sm:$0xff] }
   0x6   :  { %v63_v20 = vadd.f32 %v177_v2, %v40_v9  ;;  %v65_v24 = vadd.f32 %v177_v2, %v42_v15  ;;  %v66_v37 = vadd.f32 %v177_v2, %v43_v16  ;;  %v67_v38 = vadd.f32 %v177_v2, %v44_v21  ;;  %v26_v44 = vld [vmem:[%s305_s0 + $0x60] sm:$0xff]  ;;  %v28_v56 = vld [vmem:[%s305_s0 + $0x70] sm:$0xff]  ;;  %v29_v4 = vld [vmem:[%s305_s0 + $0x78] sm:$0xff] }
   0x7   :  { %vm76_vm0 = vcmp.ge.f32.partialorder %v60_v13, 0.0  ;;  %v92_v22 = vmul.f32 0.2, %v60_v13  ;;  %v64_v23 = vadd.f32 %v177_v2, %v41_v14  ;;  %vm77_vm1 = vcmp.ge.f32.partialorder %v61_v18, 0.0 }
   0x8   :  { %v93_v26 = vmul.f32 0.2, %v61_v18  ;;  %vm78_vm2 = vcmp.ge.f32.partialorder %v62_v19, 0.0  ;;  %v94_v27 = vmul.f32 0.2, %v62_v19  ;;  %vm79_vm3 = vcmp.ge.f32.partialorder %v63_v20, 0.0 }
   0x9   :  { %v108_v28 = vsel %vm76_vm0, %v60_v13, %v92_v22  ;;  %v95_v29 = vmul.f32 0.2, %v63_v20  ;;  %vm80_vm4 = vcmp.ge.f32.partialorder %v64_v23, 0.0  ;;  %v96_v34 = vmul.f32 0.2, %v64_v23 }
   0xa   :  { %124 = vst [vmem:[%s308_s3] sm:$0xff] %v108_v28  ;;  %v109_v32 = vsel %vm77_vm1, %v61_v18, %v93_v26  ;;  %v110_v33 = vsel %vm78_vm2, %v62_v19, %v94_v27  ;;  %vm81_vm5 = vcmp.ge.f32.partialorder %v65_v24, 0.0  ;;  %v97_v36 = vmul.f32 0.2, %v65_v24 }
   0xb   :  { %125 = vst [vmem:[%s308_s3 + $0x8] sm:$0xff] %v109_v32  ;;  %126 = vst [vmem:[%s308_s3 + $0x10] sm:$0xff] %v110_v33  ;;  %v111_v35 = vsel %vm79_vm3, %v63_v20, %v95_v29  ;;  %v112_v39 = vsel %vm80_vm4, %v64_v23, %v96_v34  ;;  %v45_v40 = vmul.f32 %v172_v1, %v22_v25  ;;  %vm82_vm6 = vcmp.ge.f32.partialorder %v66_v37, 0.0 }
   0xc   :  { %127 = vst [vmem:[%s308_s3 + $0x18] sm:$0xff] %v111_v35  ;;  %v46_v41 = vmul.f32 %v172_v1, %v23_v30  ;;  %v47_v42 = vmul.f32 %v172_v1, %v24_v31  ;;  %128 = vst [vmem:[%s308_s3 + $0x20] sm:$0xff] %v112_v39  ;;  %v113_v46 = vsel %vm81_vm5, %v65_v24, %v97_v36  ;;  %v98_v47 = vmul.f32 0.2, %v66_v37 }
   0xd   :  { %vm83_vm7 = vcmp.ge.f32.partialorder %v67_v38, 0.0  ;;  %129 = vst [vmem:[%s308_s3 + $0x28] sm:$0xff] %v113_v46  ;;  %v99_v48 = vmul.f32 0.2, %v67_v38  ;;  %v68_v49 = vadd.f32 %v177_v2, %v45_v40  ;;  %v48_v53 = vmul.f32 %v172_v1, %v25_v43 }
   0xe   :  { %v69_v50 = vadd.f32 %v177_v2, %v46_v41  ;;  %v70_v51 = vadd.f32 %v177_v2, %v47_v42  ;;  %v114_v52 = vsel %vm82_vm6, %v66_v37, %v98_v47  ;;  %v49_v54 = vmul.f32 %v172_v1, %v26_v44 }
   0xf   :  { %v50_v55 = vmul.f32 %v172_v1, %v27_v45  ;;  %130 = vst [vmem:[%s308_s3 + $0x30] sm:$0xff] %v114_v52  ;;  %v115_v57 = vsel %vm83_vm7, %v67_v38, %v99_v48  ;;  %vm84_vm8 = vcmp.ge.f32.partialorder %v68_v49, 0.0  ;;  %v100_v58 = vmul.f32 0.2, %v68_v49 }
  0x10   :  { %vm85_vm9 = vcmp.ge.f32.partialorder %v69_v50, 0.0  ;;  %131 = vst [vmem:[%s308_s3 + $0x38] sm:$0xff] %v115_v57  ;;  %v101_v59 = vmul.f32 0.2, %v69_v50  ;;  %vm86_vm10 = vcmp.ge.f32.partialorder %v70_v51, 0.0  ;;  %v71_v61 = vadd.f32 %v177_v2, %v48_v53 }
  0x11   :  { %v102_v60 = vmul.f32 0.2, %v70_v51  ;;  %v116_v62 = vsel %vm84_vm8, %v68_v49, %v100_v58  ;;  %v72_v63 = vadd.f32 %v177_v2, %v49_v54  ;;  %v73_v0 = vadd.f32 %v177_v2, %v50_v55 }
  0x12   :  { %v51_v3 = vmul.f32 %v172_v1, %v28_v56  ;;  %132 = vst [vmem:[%s308_s3 + $0x40] sm:$0xff] %v116_v62  ;;  %v117_v5 = vsel %vm85_vm9, %v69_v50, %v101_v59  ;;  %vm87_vm11 = vcmp.ge.f32.partialorder %v71_v61, 0.0  ;;  %v103_v7 = vmul.f32 0.2, %v71_v61 }
  0x13   :  { %v118_v6 = vsel %vm86_vm10, %v70_v51, %v102_v60  ;;  %133 = vst [vmem:[%s308_s3 + $0x48] sm:$0xff] %v117_v5  ;;  %vm88_vm12 = vcmp.ge.f32.partialorder %v72_v63, 0.0  ;;  %v104_v8 = vmul.f32 0.2, %v72_v63  ;;  %vm89_vm13 = vcmp.ge.f32.partialorder %v73_v0, 0.0 }
  0x14   :  { %134 = vst [vmem:[%s308_s3 + $0x50] sm:$0xff] %v118_v6  ;;  %v105_v9 = vmul.f32 0.2, %v73_v0  ;;  %v119_v10 = vsel %vm87_vm11, %v71_v61, %v103_v7  ;;  %v74_v11 = vadd.f32 %v177_v2, %v51_v3  ;;  %v52_v12 = vmul.f32 %v172_v1, %v29_v4 }
  0x15   :  { %135 = vst [vmem:[%s308_s3 + $0x58] sm:$0xff] %v119_v10  ;;  %v120_v13 = vsel %vm88_vm12, %v72_v63, %v104_v8 }
  0x16   :  { %v121_v14 = vsel %vm89_vm13, %v73_v0, %v105_v9  ;;  %136 = vst [vmem:[%s308_s3 + $0x60] sm:$0xff] %v120_v13  ;;  %vm90_vm14 = vcmp.ge.f32.partialorder %v74_v11, 0.0  ;;  %v106_v15 = vmul.f32 0.2, %v74_v11  ;;  %v75_v16 = vadd.f32 %v177_v2, %v52_v12 }
  0x17   :  { %137 = vst [vmem:[%s308_s3 + $0x68] sm:$0xff] %v121_v14 }
  0x18   :  { %v122_v17 = vsel %vm90_vm14, %v74_v11, %v106_v15  ;;  %vm91_vm15 = vcmp.ge.f32.partialorder %v75_v16, 0.0  ;;  %v107_v1 = vmul.f32 0.2, %v75_v16 }
  0x19   :  { %138 = vst [vmem:[%s308_s3 + $0x70] sm:$0xff] %v122_v17 }
  0x1a   :  { %v123_v18 = vsel %vm91_vm15, %v75_v16, %v107_v1 }
  0x1b   :  { %139 = vst [vmem:[%s308_s3 + $0x78] sm:$0xff] %v123_v18 }

// kernel: patchgan_forward.16
= control target key start
LH: loop header
LB: loop body
LE: loop exit
PB: predicated region body
PF: predicated region fallthrough
CT: control target
= control target key end

     0   :  { %v14_v0 = vlaneseq  ;;  %v159_v10 = vmov 0.0   ;;  %v160_v35 = vmov 1966171168   ;;  %s230_s0 = inlined_call_operand.vmem [shape: f32[32,256], index: 0, kind: input, shape index: {}]   ;;  %s231_s1 = inlined_call_operand.vmem [shape: f32[1,256], index: 1, kind: output, shape index: {0}]   ;;  %s232_s2 = inlined_call_operand.vmem [shape: f32[1,256], index: 2, kind: output, shape index: {1}]  }
   0x1   :  { %v43_v1 = vld [vmem:[%s230_s0] sm:$0xff]  ;;  %v44_v2 = vld [vmem:[%s230_s0 + $0x8] sm:$0xff]  ;;  %v45_v3 = vld [vmem:[%s230_s0 + $0x10] sm:$0xff]  ;;  %v82_v36 = vunpack.c.l.s4 %v160_v35 }
   0x2   :  { %vm185_vm0 = vcmp.lt.s32.totalorder %v14_v0, 256  ;;  %v46_v5 = vld [vmem:[%s230_s0 + $0x18] sm:$0xff]  ;;  %v47_v6 = vld [vmem:[%s230_s0 + $0x20] sm:$0xff]  ;;  %v48_v7 = vld [vmem:[%s230_s0 + $0x28] sm:$0xff]  ;;  %v60_v8 = vadd.f32 %v45_v3, %v43_v1  ;;  %v103_v9 = vmul.f32 %v43_v1, %v43_v1  ;;  %v104_v14 = vmul.f32 %v44_v2, %v44_v2 }
   0x3   :  { %18 = vst.msk [vmem:[%s231_s1] sm:$0x3] %vm185_vm0, %v159_v10  ;;  %v49_v11 = vld [vmem:[%s230_s0 + $0x30] sm:$0xff]  ;;  %v50_v12 = vld [vmem:[%s230_s0 + $0x38] sm:$0xff]  ;;  %v69_v13 = vadd.f32 %v46_v5, %v44_v2  ;;  %19 = vst.msk [vmem:[%s232_s2] sm:$0x3] %vm185_vm0, %v159_v10  ;;  %v105_v15 = vmul.f32 %v45_v3, %v45_v3  ;;  %v106_v17 = vmul.f32 %v46_v5, %v46_v5  ;;  %v83_v45 = vunpack.c.0.s8 %v82_v36 }
   0x4   :  { %v61_v16 = vadd.f32 %v60_v8, %v47_v6  ;;  %v107_v18 = vmul.f32 %v47_v6, %v47_v6  ;;  %v108_v19 = vmul.f32 %v48_v7, %v48_v7  ;;  %v109_v21 = vmul.f32 %v49_v11, %v49_v11 }
   0x5   :  { %v70_v20 = vadd.f32 %v69_v13, %v48_v7  ;;  %v110_v23 = vmul.f32 %v50_v12, %v50_v12  ;;  %v111_v24 = vadd.f32 %v105_v15, %v103_v9  ;;  %v120_v25 = vadd.f32 %v106_v17, %v104_v14 }
   0x6   :  { %v62_v22 = vadd.f32 %v61_v16, %v49_v11  ;;  %v85_v46 = vshrl.u32 %v14_v0, 7 }
   0x7   :  { %v71_v26 = vadd.f32 %v70_v20, %v50_v12  ;;  %v112_v28 = vadd.f32 %v111_v24, %v107_v18  ;;  %v121_v29 = vadd.f32 %v120_v25, %v108_v19 }
   0x8   :  { %v63_v27 = vrot.slane %v62_v22, 4  ;;  %v86_v55 = vsub.s32 %v83_v45, %v85_v46 }
   0x9   :  { %v72_v30 = vrot.slane %v71_v26, 4  ;;  %v113_v32 = vadd.f32 %v112_v28, %v109_v21  ;;  %v122_v33 = vadd.f32 %v121_v29, %v110_v23 }
   0xa   :  { %v64_v31 = vadd.f32 %v63_v27, %v62_v22  ;;  %v59_v62 = vld [vmem:[%s231_s1] sm:$0x3] }
   0xb   :  { %v73_v34 = vadd.f32 %v72_v30, %v71_v26  ;;  %v114_v38 = vrot.slane %v113_v32, 4  ;;  %v123_v39 = vrot.slane %v122_v33, 4  ;;  %v102_v3 = vld [vmem:[%s232_s2] sm:$0x3] }
   0xc   :  { %v65_v37 = vrot.slane %v64_v31, 2 }
   0xd   :  { %v74_v40 = vrot.slane %v73_v34, 2  ;;  %v115_v42 = vadd.f32 %v114_v38, %v113_v32  ;;  %v124_v43 = vadd.f32 %v123_v39, %v122_v33 }
   0xe   :  { %v66_v41 = vadd.f32 %v65_v37, %v64_v31 }
   0xf   :  { %v75_v44 = vadd.f32 %v74_v40, %v73_v34  ;;  %v116_v48 = vrot.slane %v115_v42, 2  ;;  %v125_v49 = vrot.slane %v124_v43, 2 }
  0x10   :  { %v67_v47 = vrot.slane %v66_v41, 1 }
  0x11   :  { %v76_v50 = vrot.slane %v75_v44, 1  ;;  %v117_v52 = vadd.f32 %v116_v48, %v115_v42  ;;  %v126_v53 = vadd.f32 %v125_v49, %v124_v43 }
  0x12   :  { %v68_v51 = vadd.f32 %v67_v47, %v66_v41 }
  0x13   :  { %v77_v54 = vadd.f32 %v76_v50, %v75_v44  ;;  %v118_v56 = vrot.slane %v117_v52, 1  ;;  %v127_v57 = vrot.slane %v126_v53, 1 }
  0x15   :  { %v80_v58 = vcombine.low %v68_v51, %v77_v54  ;;  %v119_v59 = vadd.f32 %v118_v56, %v117_v52  ;;  %v128_v60 = vadd.f32 %v127_v57, %v126_v53 }
  0x17   :  { %v87_v61 = vrot.slane %v80_v58, %v86_v55  ;;  %v131_v63 = vcombine.low %v119_v59, %v128_v60 }
  0x19   :  { %v94_v0 = vrot.slane %v87_v61, %v86_v55  ;;  %v138_v1 = vrot.slane %v131_v63, %v86_v55 }
  0x1b   :  { %v96_v2 = vadd.f32 %v94_v0, %v59_v62  ;;  %v145_v5 = vrot.slane %v138_v1, %v86_v55 }
  0x1d   :  { %101 = vst.msk [vmem:[%s231_s1] sm:$0x3] %vm185_vm0, %v96_v2  ;;  %v147_v6 = vadd.f32 %v145_v5, %v102_v3 }
  0x1f   :  { %148 = vst.msk [vmem:[%s232_s2] sm:$0x3] %vm185_vm0, %v147_v6 }

// kernel: patchgan_forward.15
= control target key start
LH: loop header
LB: loop body
LE: loop exit
PB: predicated region body
PF: predicated region fallthrough
CT: control target
= control target key end

     0   :  { %s1352_s12 = smov 0   ;;  %s1354_s13 = smov 0   ;;  %s1522_s0 = inlined_call_operand.vmem [shape: bf16[32,2048], index: 0, kind: input, shape index: {}]   ;;  %s1523_s1 = inlined_call_operand.vmem [shape: bf16[2048,256], index: 1, kind: input, shape index: {}]   ;;  %s1524_s2 = inlined_call_operand.vmem [shape: f32[1,256], index: 2, kind: input, shape index: {}]   ;;  %s1525_s3 = inlined_call_operand.vmem [shape: f32[32,256], index: 3, kind: output, shape index: {}]  }
   0x1   :  { %s1356_s14 = smov 0   ;;  %s1358_s15 = smov 0  }
   0x2   :  { %s1360_s16 = smov 0  }
   0x3 LB: > { %s25_s17 = sadd.s32 1, %s1325_s15  ;;  %p48_p1 = scmp.ne.s32.totalorder %s1317_s13, %s1313_s12  ;;  %s1329_s16 = sphi %s1360_s16, %s13_s16   ;;  %s1325_s15 = sphi %s1358_s15, %s1529_s15   ;;  %s1321_s14 = sphi %s1356_s14, %s1528_s14   ;;  %s1317_s13 = sphi %s1354_s13, %s1527_s13   ;;  %s1313_s12 = sphi %s1352_s12, %s1526_s12  }
   0x4   : > { %p26_p0 = scmp.ge.s32.totalorder %s25_s17, 4  ;;  %p49_p2 = scmp.eq.s32.totalorder %s1329_s16, 0 }
   0x5   : > { %s41_s19 = sadd.s32 1, %s1317_s13  ;;  %p1045_p5 = scmp.ge.s32.totalorder %s1329_s16, 4 }
   0x6   : > { %s1531_s17 = smov (%p26_p0, %s25_s17), 0  ;;  %p50_p3 = por %p49_p2, %p48_p1 }
   0x7   : > { %s37_s18 = ssub.s32 %s1325_s15, %s1531_s17  ;;  %164 = sbr.rel (%p1045_p5) target bundleno = 22 (0x16), region = 20 }
   0x8   : > { %p39_p4 = scmp.eq.s32.totalorder %s37_s18, 0 }
   0xa   : > { %s1387_s20 = scalar_select %p39_p4, %s1317_s13, %s41_s19  }
   0xe   : > { %167 = sbr.rel (!%p50_p3) target bundleno = 22 (0x16), region = 24  ;;  %s169_s21 = sand.u32 (%p50_p3), 1, %s1317_s13  }
   0xf   : > { %s1132_s22 = sshll.u32 (%p50_p3), %s1325_s15, 4  ;;  %s1046_s23 = sshll.u32 (%p50_p3), %s169_s21, 6 }
  0x10   : > { %s177_s26 = scalar_lea.vmem (%p50_p3), %s1522_s0, %s1132_s22  ;;  %s171_s27 = scalar_lea.vmem (%p50_p3), [#allocation3], %s1046_s23 }
  0x11   : > { %v190_v0 = vld [vmem:[%s177_s26] sm:$0xff] (%p50_p3)  ;;  %v192_v1 = vld [vmem:[%s177_s26 + $0x8] sm:$0xff] (%p50_p3) }
  0x12   : > { %v194_v2 = vld [vmem:[%s177_s26 + $0x40] sm:$0xff] (%p50_p3)  ;;  %191 = vst [vmem:[%s171_s27] sm:$0xff] (%p50_p3), %v190_v0  ;;  %193 = vst [vmem:[%s171_s27 + $0x8] sm:$0xff] (%p50_p3), %v192_v1  ;;  %v196_v3 = vld [vmem:[%s177_s26 + $0x48] sm:$0xff] (%p50_p3) }
  0x13   : > { %195 = vst [vmem:[%s171_s27 + $0x10] sm:$0xff] (%p50_p3), %v194_v2  ;;  %v198_v4 = vld [vmem:[%s177_s26 + $0x80] sm:$0xff] (%p50_p3)  ;;  %v200_v5 = vld [vmem:[%s177_s26 + $0x88] sm:$0xff] (%p50_p3)  ;;  %197 = vst [vmem:[%s171_s27 + $0x18] sm:$0xff] (%p50_p3), %v196_v3 }
  0x14   : > { %199 = vst [vmem:[%s171_s27 + $0x20] sm:$0xff] (%p50_p3), %v198_v4  ;;  %201 = vst [vmem:[%s171_s27 + $0x28] sm:$0xff] (%p50_p3), %v200_v5  ;;  %v202_v6 = vld [vmem:[%s177_s26 + $0xc0] sm:$0xff] (%p50_p3)  ;;  %v204_v7 = vld [vmem:[%s177_s26 + $0xc8] sm:$0xff] (%p50_p3) }
  0x15   : > { %203 = vst [vmem:[%s171_s27 + $0x30] sm:$0xff] %v202_v6  ;;  %205 = vst [vmem:[%s171_s27 + $0x38] sm:$0xff] %v204_v7 }
  0x16 PF: > { %p1049_p6 = scmp.ge.s32.totalorder %s1329_s16, 1  ;;  %p225_p7 = scmp.lt.s32.totalorder %s1329_s16, 5 }
  0x18   : > { %p226_p8 = pnand %p1049_p6, %p225_p7 }
  0x19   : > { %s232_s28 = sand.u32 (!%p226_p8), 1, %s1313_s12   ;;  %s1051_s29 = sshll.u32 (!%p226_p8), %s1321_s14, 6 }
  0x1a   : > { %229 = sbr.rel (%p226_p8) target bundleno = 344 (0x158), region = 51  ;;  %s1050_s30 = sshll.u32 (!%p226_p8), %s232_s28, 6 }
  0x1b   : > { %p278_p9 = scmp.lt.s32.totalorder (!%p226_p8), %s1051_s29, 255  ;;  %s1404_s8 = scalar_lea.vmem (!%p226_p8), [#allocation3], %s1050_s30 }
  0x1c   : > { %p1054_p10 = scmp.ne.s32.totalorder (!%p226_p8), %s1321_s14, 0 }
  0x21   : > { %s1533_s29 = smov (!%p278_p9, %s1051_s29), 255  ;;  %308 = sbr.rel (%p1054_p10) target bundleno = 40 (0x28), region = 59 }
  0x22   : > { %s1133_s4 = sshll.u32 %s1533_s29, 3  ;;  %v1331_v8 = vmov (!%p1054_p10), 0.0  }
  0x23   : > { %s1402_s7 = scalar_lea.vmem %s1523_s1, %s1133_s4  ;;  %309 = vst [vmem:[#allocation2] sm:$0xff] (!%p1054_p10), %v1331_v8  ;;  %310 = vst [vmem:[#allocation2 + $0x8] sm:$0xff] (!%p1054_p10), %v1331_v8 }
  0x24   : > { %311 = vst [vmem:[#allocation2 + $0x10] sm:$0xff] (!%p1054_p10), %v1331_v8  ;;  %312 = vst [vmem:[#allocation2 + $0x18] sm:$0xff] (!%p1054_p10), %v1331_v8 }
  0x25   : > { %313 = vst [vmem:[#allocation2 + $0x20] sm:$0xff] (!%p1054_p10), %v1331_v8  ;;  %314 = vst [vmem:[#allocation2 + $0x28] sm:$0xff] (!%p1054_p10), %v1331_v8 }
  0x26   : > { %315 = vst [vmem:[#allocation2 + $0x30] sm:$0xff] (!%p1054_p10), %v1331_v8  ;;  %316 = vst [vmem:[#allocation2 + $0x38] sm:$0xff] (!%p1054_p10), %v1331_v8 }
  0x28 PF: > { %v1183_v9 = vld [vmem:[%s1402_s7 + $0x4] ss:$8 sps:$4 sm:$0xff]   ;;  %v1187_v11 = vld [vmem:[%s1402_s7] ss:$8 sps:$4 sm:$0xff]   ;;  %v1189_v13 = vld [vmem:[%s1402_s7 + $0x14] ss:$8 sps:$4 sm:$0xff]  }
  0x29   : > { %v1185_v10 = vld [vmem:[%s1402_s7 + $0x104] ss:$8 sps:$4 sm:$0xff]   ;;  %757 = vmatprep.subr.bf16.mxu1 %v1183_v9  ;;  %v1188_v12 = vld [vmem:[%s1402_s7 + $0x100] ss:$8 sps:$4 sm:$0xff]   ;;  %v1191_v14 = vld [vmem:[%s1402_s7 + $0x114] ss:$8 sps:$4 sm:$0xff]  }
  0x2a   : > { %810 = vmatprep.subr.bf16.mxu0 %v1185_v10  ;;  %758 = vmatpush1.bf16.msra.mxu1 %v1187_v11  ;;  %v1193_v15 = vld [vmem:[%s1402_s7 + $0x10] ss:$8 sps:$4 sm:$0xff]   ;;  %v1195_v17 = vld [vmem:[%s1402_s7 + $0x24] ss:$8 sps:$4 sm:$0xff]   ;;  %v1199_v19 = vld [vmem:[%s1402_s7 + $0x20] ss:$8 sps:$4 sm:$0xff]  }
  0x2b   : > { %811 = vmatpush1.bf16.msra.mxu0 %v1188_v12  ;;  %759 = vmatprep.subr.bf16.mxu1 %v1189_v13  ;;  %v1194_v16 = vld [vmem:[%s1402_s7 + $0x110] ss:$8 sps:$4 sm:$0xff]   ;;  %v1197_v18 = vld [vmem:[%s1402_s7 + $0x124] ss:$8 sps:$4 sm:$0xff]   ;;  %v1200_v20 = vld [vmem:[%s1402_s7 + $0x120] ss:$8 sps:$4 sm:$0xff]  }
  0x2c   : > { %812 = vmatprep.subr.bf16.mxu0 %v1191_v14  ;;  %v1201_v21 = vld [vmem:[%s1402_s7 + $0x34] ss:$8 sps:$4 sm:$0xff]   ;;  %v1205_v23 = vld [vmem:[%s1402_s7 + $0x30] ss:$8 sps:$4 sm:$0xff]   ;;  %v1207_v25 = vld [vmem:[%s1402_s7 + $0x44] ss:$8 sps:$4 sm:$0xff]  }
  0x2d   : > { %v1203_v22 = vld [vmem:[%s1402_s7 + $0x134] ss:$8 sps:$4 sm:$0xff]   ;;  %v1206_v24 = vld [vmem:[%s1402_s7 + $0x130] ss:$8 sps:$4 sm:$0xff]   ;;  %v1209_v26 = vld [vmem:[%s1402_s7 + $0x144] ss:$8 sps:$4 sm:$0xff]  }
  0x2e   : > { %760 = vmatpush1.bf16.msra.mxu1 %v1193_v15  ;;  %v1211_v27 = vld [vmem:[%s1402_s7 + $0x40] ss:$8 sps:$4 sm:$0xff]   ;;  %v1213_v29 = vld [vmem:[%s1402_s7 + $0x54] ss:$8 sps:$4 sm:$0xff]   ;;  %v1217_v31 = vld [vmem:[%s1402_s7 + $0x50] ss:$8 sps:$4 sm:$0xff]  }
  0x2f   : > { %813 = vmatpush1.bf16.msra.mxu0 %v1194_v16  ;;  %761 = vmatprep.subr.bf16.mxu1 %v1195_v17  ;;  %v1212_v28 = vld [vmem:[%s1402_s7 + $0x140] ss:$8 sps:$4 sm:$0xff]   ;;  %v1215_v30 = vld [vmem:[%s1402_s7 + $0x154] ss:$8 sps:$4 sm:$0xff]   ;;  %v1218_v32 = vld [vmem:[%s1402_s7 + $0x150] ss:$8 sps:$4 sm:$0xff]  }
  0x30   : > { %814 = vmatprep.subr.bf16.mxu0 %v1197_v18  ;;  %v1219_v33 = vld [vmem:[%s1402_s7 + $0x64] ss:$8 sps:$4 sm:$0xff]   ;;  %v1223_v35 = vld [vmem:[%s1402_s7 + $0x60] ss:$8 sps:$4 sm:$0xff]   ;;  %v1225_v37 = vld [vmem:[%s1402_s7 + $0x74] ss:$8 sps:$4 sm:$0xff]  }
  0x31   : > { %v1221_v34 = vld [vmem:[%s1402_s7 + $0x164] ss:$8 sps:$4 sm:$0xff]   ;;  %v1224_v36 = vld [vmem:[%s1402_s7 + $0x160] ss:$8 sps:$4 sm:$0xff]   ;;  %v1227_v38 = vld [vmem:[%s1402_s7 + $0x174] ss:$8 sps:$4 sm:$0xff]  }
  0x32   : > { %762 = vmatpush1.bf16.msra.mxu1 %v1199_v19  ;;  %v1229_v39 = vld [vmem:[%s1402_s7 + $0x70] ss:$8 sps:$4 sm:$0xff]   ;;  %v1231_v41 = vld [vmem:[%s1402_s7 + $0x84] ss:$8 sps:$4 sm:$0xff]   ;;  %v1235_v43 = vld [vmem:[%s1402_s7 + $0x80] ss:$8 sps:$4 sm:$0xff]  }
  0x33   : > { %815 = vmatpush1.bf16.msra.mxu0 %v1200_v20  ;;  %763 = vmatprep.subr.bf16.mxu1 %v1201_v21  ;;  %v1230_v40 = vld [vmem:[%s1402_s7 + $0x170] ss:$8 sps:$4 sm:$0xff]   ;;  %v1233_v42 = vld [vmem:[%s1402_s7 + $0x184] ss:$8 sps:$4 sm:$0xff]   ;;  %v1236_v44 = vld [vmem:[%s1402_s7 + $0x180] ss:$8 sps:$4 sm:$0xff]  }
  0x34   : > { %816 = vmatprep.subr.bf16.mxu0 %v1203_v22  ;;  %v1237_v45 = vld [vmem:[%s1402_s7 + $0x94] ss:$8 sps:$4 sm:$0xff]   ;;  %v1241_v47 = vld [vmem:[%s1402_s7 + $0x90] ss:$8 sps:$4 sm:$0xff]   ;;  %v1243_v49 = vld [vmem:[%s1402_s7 + $0xa4] ss:$8 sps:$4 sm:$0xff]  }
  0x35   : > { %v1239_v46 = vld [vmem:[%s1402_s7 + $0x194] ss:$8 sps:$4 sm:$0xff]   ;;  %v1242_v48 = vld [vmem:[%s1402_s7 + $0x190] ss:$8 sps:$4 sm:$0xff]   ;;  %v1245_v50 = vld [vmem:[%s1402_s7 + $0x1a4] ss:$8 sps:$4 sm:$0xff]  }
  0x36   : > { %764 = vmatpush1.bf16.msra.mxu1 %v1205_v23  ;;  %v1247_v51 = vld [vmem:[%s1402_s7 + $0xa0] ss:$8 sps:$4 sm:$0xff]   ;;  %v1249_v53 = vld [vmem:[%s1402_s7 + $0xb4] ss:$8 sps:$4 sm:$0xff]   ;;  %v1253_v55 = vld [vmem:[%s1402_s7 + $0xb0] ss:$8 sps:$4 sm:$0xff]  }
  0x37   : > { %817 = vmatpush1.bf16.msra.mxu0 %v1206_v24  ;;  %765 = vmatprep.subr.bf16.mxu1 %v1207_v25  ;;  %v1248_v52 = vld [vmem:[%s1402_s7 + $0x1a0] ss:$8 sps:$4 sm:$0xff]   ;;  %v1251_v54 = vld [vmem:[%s1402_s7 + $0x1b4] ss:$8 sps:$4 sm:$0xff]   ;;  %v1254_v56 = vld [vmem:[%s1402_s7 + $0x1b0] ss:$8 sps:$4 sm:$0xff]  }
  0x38   : > { %818 = vmatprep.subr.bf16.mxu0 %v1209_v26  ;;  %v1255_v57 = vld [vmem:[%s1402_s7 + $0xc4] ss:$8 sps:$4 sm:$0xff]   ;;  %v1259_v61 = vld [vmem:[%s1402_s7 + $0xc0] ss:$8 sps:$4 sm:$0xff]   ;;  %v1261_v63 = vld [vmem:[%s1402_s7 + $0xd4] ss:$8 sps:$4 sm:$0xff]  }
  0x39   : > { %v1281_v58 = vld [vmem:[%s1404_s8 + $0x4] ss:$16 sps:$4 sm:$0xff]   ;;  %v1284_v60 = vld [vmem:[%s1404_s8 + $0xc] ss:$16 sps:$4 sm:$0xff]   ;;  %v1260_v62 = vld [vmem:[%s1402_s7 + $0x1c0] ss:$8 sps:$4 sm:$0xff]  }
  0x3a   : > { %766 = vmatpush1.bf16.msra.mxu1 %v1211_v27  ;;  %v1257_v59 = vld [vmem:[%s1402_s7 + $0x1c4] ss:$8 sps:$4 sm:$0xff]   ;;  %789 = vmatprep.mubr.bf16.mxu1 %v1281_v58  ;;  %v1263_v0 = vld [vmem:[%s1402_s7 + $0x1d4] ss:$8 sps:$4 sm:$0xff]   ;;  %v1265_v1 = vld [vmem:[%s1402_s7 + $0xd0] ss:$8 sps:$4 sm:$0xff]  }
  0x3b   : > { %819 = vmatpush1.bf16.msra.mxu0 %v1212_v28  ;;  %767 = vmatprep.subr.bf16.mxu1 %v1213_v29  ;;  %v1266_v2 = vld [vmem:[%s1402_s7 + $0x1d0] ss:$8 sps:$4 sm:$0xff]   ;;  %v1267_v3 = vld [vmem:[%s1402_s7 + $0xe4] ss:$8 sps:$4 sm:$0xff]   ;;  %v1271_v5 = vld [vmem:[%s1402_s7 + $0xe0] ss:$8 sps:$4 sm:$0xff]  }
  0x3c   : > { %820 = vmatprep.subr.bf16.mxu0 %v1215_v30  ;;  %842 = vmatprep.mubr.bf16.mxu0 %v1284_v60  ;;  %v1269_v4 = vld [vmem:[%s1402_s7 + $0x1e4] ss:$8 sps:$4 sm:$0xff]   ;;  %v1272_v6 = vld [vmem:[%s1402_s7 + $0x1e0] ss:$8 sps:$4 sm:$0xff]   ;;  %v1273_v7 = vld [vmem:[%s1402_s7 + $0xf4] ss:$8 sps:$4 sm:$0xff]  }
  0x3d   : > { %v1275_v8 = vld [vmem:[%s1402_s7 + $0x1f4] ss:$8 sps:$4 sm:$0xff]   ;;  %v1277_v9 = vld [vmem:[%s1402_s7 + $0xf0] ss:$8 sps:$4 sm:$0xff]   ;;  %v317_v18 = vld [vmem:[#allocation2] sm:$0xff]  ;;  %p1127_p11 = scmp.ne.s32.totalorder %s1321_s14, 3 }
  0x3e   : > { %768 = vmatpush1.bf16.msra.mxu1 %v1217_v31  ;;  %v1278_v10 = vld [vmem:[%s1402_s7 + $0x1f0] ss:$8 sps:$4 sm:$0xff]   ;;  %v1285_v13 = vld [vmem:[%s1404_s8 + $0x24] ss:$16 sps:$4 sm:$0xff]   ;;  %v1287_v14 = vld [vmem:[%s1404_s8 + $0x2c] ss:$16 sps:$4 sm:$0xff]  }
  0x3f   : > { %821 = vmatpush1.bf16.msra.mxu0 %v1218_v32  ;;  %769 = vmatprep.subr.bf16.mxu1 %v1219_v33  ;;  %v1279_v11 = vld [vmem:[%s1404_s8] ss:$16 sps:$4 sm:$0xff]   ;;  %v1282_v12 = vld [vmem:[%s1404_s8 + $0x8] ss:$16 sps:$4 sm:$0xff]  }
  0x40   : > { %822 = vmatprep.subr.bf16.mxu0 %v1221_v34  ;;  %v1289_v15 = vld [vmem:[%s1404_s8 + $0x20] ss:$16 sps:$4 sm:$0xff]   ;;  %v1290_v16 = vld [vmem:[%s1404_s8 + $0x28] ss:$16 sps:$4 sm:$0xff]  }
  0x41   : > { %v318_v22 = vld [vmem:[#allocation2 + $0x8] sm:$0xff]  ;;  %v319_v26 = vld [vmem:[#allocation2 + $0x10] sm:$0xff]  ;;  %v320_v31 = vld [vmem:[#allocation2 + $0x18] sm:$0xff] }
  0x42   : > { %770 = vmatpush1.bf16.msra.mxu1 %v1223_v35 }
  0x43   : > { %823 = vmatpush1.bf16.msra.mxu0 %v1224_v36  ;;  %771 = vmatprep.subr.bf16.mxu1 %v1225_v37 }
  0x44   : > { %824 = vmatprep.subr.bf16.mxu0 %v1227_v38  ;;  %v321_v38 = vld [vmem:[#allocation2 + $0x20] sm:$0xff] }
  0x46   : > { %772 = vmatpush1.bf16.msra.mxu1 %v1229_v39 }
  0x47   : > { %825 = vmatpush1.bf16.msra.mxu0 %v1230_v40  ;;  %773 = vmatprep.subr.bf16.mxu1 %v1231_v41 }
  0x48   : > { %826 = vmatprep.subr.bf16.mxu0 %v1233_v42  ;;  %v322_v42 = vld [vmem:[#allocation2 + $0x28] sm:$0xff] }
  0x4a   : > { %774 = vmatpush1.bf16.msra.mxu1 %v1235_v43 }
  0x4b   : > { %827 = vmatpush1.bf16.msra.mxu0 %v1236_v44  ;;  %775 = vmatprep.subr.bf16.mxu1 %v1237_v45 }
  0x4c   : > { %828 = vmatprep.subr.bf16.mxu0 %v1239_v46  ;;  %v323_v46 = vld [vmem:[#allocation2 + $0x30] sm:$0xff] }
  0x4e   : > { %776 = vmatpush1.bf16.msra.mxu1 %v1241_v47 }
  0x4f   : > { %829 = vmatpush1.bf16.msra.mxu0 %v1242_v48  ;;  %777 = vmatprep.subr.bf16.mxu1 %v1243_v49 }
  0x50   : > { %830 = vmatprep.subr.bf16.mxu0 %v1245_v50 }
  0x52   : > { %778 = vmatpush1.bf16.msra.mxu1 %v1247_v51  ;;  %v324_v51 = vld [vmem:[#allocation2 + $0x38] sm:$0xff] }
  0x53   : > { %831 = vmatpush1.bf16.msra.mxu0 %v1248_v52  ;;  %779 = vmatprep.subr.bf16.mxu1 %v1249_v53 }
  0x54   : > { %832 = vmatprep.subr.bf16.mxu0 %v1251_v54 }
  0x56   : > { %780 = vmatpush1.bf16.msra.mxu1 %v1253_v55 }
  0x57   : > { %833 = vmatpush1.bf16.msra.mxu0 %v1254_v56  ;;  %781 = vmatprep.subr.bf16.mxu1 %v1255_v57  ;;  %v893_v57 = vlaneseq (!%p1127_p11) }
  0x58   : > { %834 = vmatprep.subr.bf16.mxu0 %v1257_v59  ;;  %v891_v59 = vld [vmem:[%s1524_s2] sm:$0x3] (!%p1127_p11) }
  0x59   : > { %v894_v58 = vshrl.u32 (!%p1127_p11), %v893_v57, 7 }
  0x5a   : > { %782 = vmatpush1.bf16.msra.mxu1 %v1259_v61 }
  0x5b   : > { %835 = vmatpush1.bf16.msra.mxu0 %v1260_v62  ;;  %783 = vmatprep.subr.bf16.mxu1 %v1261_v63  ;;  %v895_v61 = vsub.s32 (!%p1127_p11), 0, %v894_v58  ;;  %v899_v63 = vsub.s32 (!%p1127_p11), 1, %v894_v58 }
  0x5c   : > { %836 = vmatprep.subr.bf16.mxu0 %v1263_v0 }
  0x5e   : > { %784 = vmatpush1.bf16.msra.mxu1 %v1265_v1 }
  0x5f   : > { %837 = vmatpush1.bf16.msra.mxu0 %v1266_v2  ;;  %785 = vmatprep.subr.bf16.mxu1 %v1267_v3  ;;  %v896_v3 = vrot.slane (!%p1127_p11), %v891_v59, %v895_v61 }
  0x60   : > { %838 = vmatprep.subr.bf16.mxu0 %v1269_v4  ;;  %v900_v4 = vrot.slane (!%p1127_p11), %v891_v59, %v899_v63 }
  0x62   : > { %786 = vmatpush1.bf16.msra.mxu1 %v1271_v5 }
  0x63   : > { %839 = vmatpush1.bf16.msra.mxu0 %v1272_v6  ;;  %787 = vmatprep.subr.bf16.mxu1 %v1273_v7 }
  0x64   : > { %840 = vmatprep.subr.bf16.mxu0 %v1275_v8 }
  0x66   : > { %788 = vmatpush1.bf16.msra.mxu1 %v1277_v9 }
  0x67   : > { %841 = vmatpush1.bf16.msra.mxu0 %v1278_v10 }
  0x69   : > { %790 = vmatmul.mubr.bf16.vlgmr.msra.gmra.mrb[0].mxu1 %v1279_v11 }
  0x6a   : > { %843 = vmatmul.mubr.bf16.vlgmr.msra.gmra.mrb[0].mxu0 %v1282_v12  ;;  %799 = vmatprep.mubr.bf16.mxu1 %v1285_v13 }
  0x6b   : > { %852 = vmatprep.mubr.bf16.mxu0 %v1287_v14 }
  0x71   : > { %800 = vmatmul.mubr.bf16.gmra.mrb[4].mxu1 %v1289_v15 }
  0x72   : > { %853 = vmatmul.mubr.bf16.gmra.mrb[4].mxu0 %v1290_v16 }
 0x13c   : > { %v791_v17 = vpop.f32.mrb[0].mxu1 }
 0x13d   : > { %v844_v19 = vpop.f32.mrb[0].mxu0  ;;  %v793_v21 = vpop.f32.mrb[1].mxu1 }
 0x13e   : > { %v845_v20 = vadd.f32 %v844_v19, %v791_v17  ;;  %v846_v23 = vpop.f32.mrb[1].mxu0  ;;  %v795_v25 = vpop.f32.mrb[2].mxu1 }
 0x13f   : > { %v847_v24 = vadd.f32 %v846_v23, %v793_v21  ;;  %v848_v27 = vpop.f32.mrb[2].mxu0  ;;  %v797_v30 = vpop.f32.mrb[3].mxu1 }
 0x140   : > { %v863_v28 = vadd.f32 %v845_v20, %v317_v18  ;;  %v849_v29 = vadd.f32 %v848_v27, %v795_v25  ;;  %v850_v32 = vpop.f32.mrb[3].mxu0 }
 0x141   : > { %v864_v33 = vadd.f32 %v847_v24, %v318_v22  ;;  %v851_v34 = vadd.f32 %v850_v32, %v797_v30 }
 0x142   : > { %871 = vst [vmem:[#allocation2] sm:$0xff] %v863_v28  ;;  %v865_v35 = vadd.f32 %v849_v29, %v319_v26 }
 0x143   : > { %872 = vst [vmem:[#allocation2 + $0x8] sm:$0xff] %v864_v33  ;;  %v866_v36 = vadd.f32 %v851_v34, %v320_v31 }
 0x144   : > { %873 = vst [vmem:[#allocation2 + $0x10] sm:$0xff] %v865_v35  ;;  %v801_v37 = vpop.f32.mrb[4].mxu1 }
 0x145   : > { %874 = vst [vmem:[#allocation2 + $0x18] sm:$0xff] %v866_v36  ;;  %v854_v39 = vpop.f32.mrb[4].mxu0  ;;  %v803_v41 = vpop.f32.mrb[5].mxu1 }
 0x146   : > { %v855_v40 = vadd.f32 %v854_v39, %v801_v37  ;;  %v856_v43 = vpop.f32.mrb[5].mxu0  ;;  %v805_v45 = vpop.f32.mrb[6].mxu1 }
 0x147   : > { %v857_v44 = vadd.f32 %v856_v43, %v803_v41  ;;  %v858_v47 = vpop.f32.mrb[6].mxu0  ;;  %v807_v50 = vpop.f32.mrb[7].mxu1  ;;  %882 = sbr.rel (%p1127_p11) target bundleno = 344 (0x158), region = 63 }
 0x148   : > { %v867_v48 = vadd.f32 %v855_v40, %v321_v38  ;;  %v859_v49 = vadd.f32 %v858_v47, %v805_v45  ;;  %v860_v52 = vpop.f32.mrb[7].mxu0 }
 0x149   : > { %v868_v53 = vadd.f32 %v857_v44, %v322_v42  ;;  %v861_v54 = vadd.f32 %v860_v52, %v807_v50  ;;  %v883_v60 = vld [vmem:[#allocation2] sm:$0xff] (!%p1127_p11) }
 0x14a   : > { %875 = vst [vmem:[#allocation2 + $0x20] sm:$0xff] %v867_v48  ;;  %v869_v55 = vadd.f32 %v859_v49, %v323_v46  ;;  %v884_v62 = vld [vmem:[#allocation2 + $0x8] sm:$0xff] (!%p1127_p11)  ;;  %v903_v8 = vadd.f32 (!%p1127_p11), %v896_v3, %v883_v60 }
 0x14b   : > { %876 = vst [vmem:[#allocation2 + $0x28] sm:$0xff] %v868_v53  ;;  %v870_v56 = vadd.f32 %v861_v54, %v324_v51  ;;  %v885_v0 = vld [vmem:[#allocation2 + $0x10] sm:$0xff] (!%p1127_p11)  ;;  %v904_v9 = vadd.f32 (!%p1127_p11), %v900_v4, %v884_v62 }
 0x14c   : > { %877 = vst [vmem:[#allocation2 + $0x30] sm:$0xff] %v869_v55  ;;  %v886_v1 = vld [vmem:[#allocation2 + $0x18] sm:$0xff] (!%p1127_p11)  ;;  %v905_v10 = vadd.f32 (!%p1127_p11), %v896_v3, %v885_v0  ;;  %911 = vst [vmem:[%s1525_s3] sm:$0xff] (!%p1127_p11), %v903_v8 }
 0x14d   : > { %878 = vst [vmem:[#allocation2 + $0x38] sm:$0xff] %v870_v56  ;;  %v906_v11 = vadd.f32 (!%p1127_p11), %v900_v4, %v886_v1  ;;  %912 = vst [vmem:[%s1525_s3 + $0x8] sm:$0xff] (!%p1127_p11), %v904_v9 }
 0x14e   : > { %913 = vst [vmem:[%s1525_s3 + $0x10] sm:$0xff] %v905_v10 }
 0x14f   : > { %914 = vst [vmem:[%s1525_s3 + $0x18] sm:$0xff] %v906_v11 }
 0x151   : > { %v887_v2 = vld [vmem:[#allocation2 + $0x20] sm:$0xff] }
 0x152   : > { %v888_v5 = vld [vmem:[#allocation2 + $0x28] sm:$0xff]  ;;  %v907_v12 = vadd.f32 %v896_v3, %v887_v2 }
 0x153   : > { %v889_v6 = vld [vmem:[#allocation2 + $0x30] sm:$0xff]  ;;  %v908_v13 = vadd.f32 %v900_v4, %v888_v5 }
 0x154   : > { %v890_v7 = vld [vmem:[#allocation2 + $0x38] sm:$0xff]  ;;  %v909_v14 = vadd.f32 %v896_v3, %v889_v6  ;;  %915 = vst [vmem:[%s1525_s3 + $0x20] sm:$0xff] %v907_v12 }
 0x155   : > { %v910_v15 = vadd.f32 %v900_v4, %v890_v7  ;;  %916 = vst [vmem:[%s1525_s3 + $0x28] sm:$0xff] %v908_v13 }
 0x156   : > { %917 = vst [vmem:[%s1525_s3 + $0x30] sm:$0xff] %v909_v14 }
 0x157   : > { %918 = vst [vmem:[%s1525_s3 + $0x38] sm:$0xff] %v910_v15 }
 0x158 PF: > { %s13_s16 = sadd.s32 1, %s1329_s16   ;;  %s1526_s12 = smov %s1317_s13 }
 0x159   : > { %p10_p12 = scmp.ge.s32.totalorder %s13_s16, 6   ;;  %s1527_s13 = smov %s1387_s20 }
 0x15a   : > { %s1528_s14 = smov %s1325_s15  ;;  %s1529_s15 = smov %s1531_s17 }
 0x15b   :  { %12 = sbr.rel (!%p10_p12) target bundleno = 3 (0x3), region = 104 }

// kernel: patchgan_forward.17
= control target key start
LH: loop header
LB: loop body
LE: loop exit
PB: predicated region body
PF: predicated region fallthrough
CT: control target
= control target key end

     0   :  { %v24_v0 = vlaneseq  ;;  %s172_s1 = inlined_call_operand.vmem [shape: f32[1,256], index: 1, kind: input, shape index: {}]   ;;  %s173_s2 = inlined_call_operand.vmem [shape: f32[1,256], index: 2, kind: input, shape index: {}]   ;;  %s174_s0 = inlined_call_operand.vmem [shape: f32[32,256], index: 0, kind: input, shape index: {}]   ;;  %s175_s3 = inlined_call_operand.vmem [shape: f32[32,256], index: 3, kind: output, shape index: {}]  }
   0x1   :  { %v22_v2 = vld [vmem:[%s172_s1] sm:$0x3]  ;;  %v15_v6 = vld [vmem:[%s174_s0 + $0x8] sm:$0xff]  ;;  %v16_v8 = vld [vmem:[%s174_s0 + $0x10] sm:$0xff] }
   0x2   :  { %v25_v1 = vshrl.u32 %v24_v0, 7  ;;  %v42_v3 = vld [vmem:[%s173_s2] sm:$0x3]  ;;  %v17_v9 = vld [vmem:[%s174_s0 + $0x18] sm:$0xff]  ;;  %v19_v15 = vld [vmem:[%s174_s0 + $0x28] sm:$0xff] }
   0x3   :  { %v14_v4 = vld [vmem:[%s174_s0] sm:$0xff]  ;;  %v20_v16 = vld [vmem:[%s174_s0 + $0x30] sm:$0xff]  ;;  %v21_v17 = vld [vmem:[%s174_s0 + $0x38] sm:$0xff] }
   0x4   :  { %v26_v5 = vsub.s32 0, %v25_v1  ;;  %v30_v7 = vsub.s32 1, %v25_v1  ;;  %v18_v10 = vld [vmem:[%s174_s0 + $0x20] sm:$0xff] }
   0x6   :  { %v27_v11 = vrot.slane %v22_v2, %v26_v5  ;;  %v47_v12 = vrot.slane %v42_v3, %v26_v5  ;;  %v31_v13 = vrot.slane %v22_v2, %v30_v7  ;;  %v51_v14 = vrot.slane %v42_v3, %v30_v7 }
   0x8   :  { %v34_v18 = vmul.f32 %v27_v11, %v14_v4  ;;  %v35_v19 = vmul.f32 %v31_v13, %v15_v6  ;;  %v36_v20 = vmul.f32 %v27_v11, %v16_v8  ;;  %v37_v21 = vmul.f32 %v31_v13, %v17_v9 }
   0x9   :  { %v38_v22 = vmul.f32 %v27_v11, %v18_v10  ;;  %v39_v23 = vmul.f32 %v31_v13, %v19_v15  ;;  %v40_v24 = vmul.f32 %v27_v11, %v20_v16  ;;  %v41_v25 = vmul.f32 %v31_v13, %v21_v17 }
   0xa   :  { %v54_v26 = vadd.f32 %v47_v12, %v34_v18  ;;  %v55_v27 = vadd.f32 %v51_v14, %v35_v19  ;;  %v56_v28 = vadd.f32 %v47_v12, %v36_v20  ;;  %v57_v29 = vadd.f32 %v51_v14, %v37_v21 }
   0xb   :  { %v58_v30 = vadd.f32 %v47_v12, %v38_v22  ;;  %v59_v31 = vadd.f32 %v51_v14, %v39_v23  ;;  %v60_v32 = vadd.f32 %v47_v12, %v40_v24  ;;  %v61_v33 = vadd.f32 %v51_v14, %v41_v25 }
   0xc   :  { %vm62_vm0 = vcmp.ge.f32.partialorder %v54_v26, 0.0  ;;  %v70_v34 = vmul.f32 0.2, %v54_v26  ;;  %vm63_vm1 = vcmp.ge.f32.partialorder %v55_v27, 0.0  ;;  %v71_v35 = vmul.f32 0.2, %v55_v27 }
   0xd   :  { %vm64_vm2 = vcmp.ge.f32.partialorder %v56_v28, 0.0  ;;  %v72_v36 = vmul.f32 0.2, %v56_v28  ;;  %vm65_vm3 = vcmp.ge.f32.partialorder %v57_v29, 0.0  ;;  %v73_v37 = vmul.f32 0.2, %v57_v29 }
   0xe   :  { %v78_v38 = vsel %vm62_vm0, %v54_v26, %v70_v34  ;;  %v79_v39 = vsel %vm63_vm1, %v55_v27, %v71_v35  ;;  %vm66_vm4 = vcmp.ge.f32.partialorder %v58_v30, 0.0  ;;  %v74_v40 = vmul.f32 0.2, %v58_v30 }
   0xf   :  { %86 = vst [vmem:[%s175_s3] sm:$0xff] %v78_v38  ;;  %87 = vst [vmem:[%s175_s3 + $0x8] sm:$0xff] %v79_v39  ;;  %v80_v41 = vsel %vm64_vm2, %v56_v28, %v72_v36  ;;  %v81_v42 = vsel %vm65_vm3, %v57_v29, %v73_v37  ;;  %vm67_vm5 = vcmp.ge.f32.partialorder %v59_v31, 0.0  ;;  %v75_v43 = vmul.f32 0.2, %v59_v31 }
  0x10   :  { %88 = vst [vmem:[%s175_s3 + $0x10] sm:$0xff] %v80_v41  ;;  %89 = vst [vmem:[%s175_s3 + $0x18] sm:$0xff] %v81_v42  ;;  %v82_v44 = vsel %vm66_vm4, %v58_v30, %v74_v40  ;;  %vm68_vm6 = vcmp.ge.f32.partialorder %v60_v32, 0.0  ;;  %v76_v45 = vmul.f32 0.2, %v60_v32  ;;  %vm69_vm7 = vcmp.ge.f32.partialorder %v61_v33, 0.0 }
  0x11   :  { %90 = vst [vmem:[%s175_s3 + $0x20] sm:$0xff] %v82_v44  ;;  %v83_v46 = vsel %vm67_vm5, %v59_v31, %v75_v43  ;;  %v77_v47 = vmul.f32 0.2, %v61_v33 }
  0x12   :  { %91 = vst [vmem:[%s175_s3 + $0x28] sm:$0xff] %v83_v46  ;;  %v84_v48 = vsel %vm68_vm6, %v60_v32, %v76_v45 }
  0x13   :  { %92 = vst [vmem:[%s175_s3 + $0x30] sm:$0xff] %v84_v48  ;;  %v85_v49 = vsel %vm69_vm7, %v61_v33, %v77_v47 }
  0x14   :  { %93 = vst [vmem:[%s175_s3 + $0x38] sm:$0xff] %v85_v49 }

// kernel: patchgan_forward.19
= control target key start
LH: loop header
LB: loop body
LE: loop exit
PB: predicated region body
PF: predicated region fallthrough
CT: control target
= control target key end

     0   :  { %v14_v0 = vlaneseq  ;;  %v217_v4 = vmov 1966171168   ;;  %v218_v11 = vmov 0.0   ;;  %s308_s0 = inlined_call_operand.vmem [shape: f32[24,512], index: 0, kind: input, shape index: {}]   ;;  %s309_s1 = inlined_call_operand.vmem [shape: f32[1,512], index: 1, kind: output, shape index: {0}]   ;;  %s310_s2 = inlined_call_operand.vmem [shape: f32[1,512], index: 2, kind: output, shape index: {1}]  }
   0x1   :  { %v38_v1 = vld [vmem:[%s308_s0] sm:$0xff]  ;;  %v39_v2 = vld [vmem:[%s308_s0 + $0x8] sm:$0xff]  ;;  %v40_v3 = vld [vmem:[%s308_s0 + $0x10] sm:$0xff]  ;;  %v102_v5 = vunpack.c.l.s4 %v217_v4 }
   0x2   :  { %vm243_vm0 = vcmp.lt.s32.totalorder %v14_v0, 512  ;;  %v21_v7 = vshrl.u32 %v14_v0, 7  ;;  %v41_v8 = vld [vmem:[%s308_s0 + $0x18] sm:$0xff]  ;;  %v42_v9 = vld [vmem:[%s308_s0 + $0x20] sm:$0xff]  ;;  %v43_v10 = vld [vmem:[%s308_s0 + $0x28] sm:$0xff]  ;;  %v131_v15 = vmul.f32 %v38_v1, %v38_v1  ;;  %v132_v16 = vmul.f32 %v39_v2, %v39_v2 }
   0x3   :  { %18 = vst.msk [vmem:[%s309_s1] sm:$0xf] %vm243_vm0, %v218_v11  ;;  %v44_v12 = vld [vmem:[%s308_s0 + $0x30] sm:$0xff]  ;;  %v45_v13 = vld [vmem:[%s308_s0 + $0x38] sm:$0xff]  ;;  %v103_v14 = vunpack.c.0.s8 %v102_v5  ;;  %19 = vst.msk [vmem:[%s310_s2] sm:$0xf] %vm243_vm0, %v218_v11  ;;  %v63_v19 = vadd.f32 %v42_v9, %v38_v1  ;;  %v71_v20 = vadd.f32 %v43_v10, %v39_v2  ;;  %v133_v21 = vmul.f32 %v40_v3, %v40_v3 }
   0x4   :  { %v23_v17 = vadd.s32 16, %v21_v7  ;;  %v46_v18 = vld [vmem:[%s308_s0 + $0x40] sm:$0xff]  ;;  %v47_v22 = vld [vmem:[%s308_s0 + $0x48] sm:$0xff]  ;;  %v48_v23 = vld [vmem:[%s308_s0 + $0x50] sm:$0xff]  ;;  %v134_v25 = vmul.f32 %v41_v8, %v41_v8  ;;  %v135_v26 = vmul.f32 %v42_v9, %v42_v9  ;;  %v136_v27 = vmul.f32 %v43_v10, %v43_v10 }
   0x5   :  { %v49_v24 = vld [vmem:[%s308_s0 + $0x58] sm:$0xff]  ;;  %v137_v28 = vmul.f32 %v44_v12, %v44_v12  ;;  %v79_v29 = vadd.f32 %v44_v12, %v40_v3  ;;  %v87_v30 = vadd.f32 %v45_v13, %v41_v8  ;;  %v138_v31 = vmul.f32 %v45_v13, %v45_v13 }
   0x6   :  { %vm31_vm1 = vcmp.lt.s32.totalorder %v23_v17, 18  ;;  %v284_v33 = vsub.s32 %v103_v14, %v21_v7  ;;  %v143_v38 = vadd.f32 %v135_v26, %v131_v15  ;;  %v151_v39 = vadd.f32 %v136_v27, %v132_v16 }
   0x7   :  { %v214_v32 = vsel %vm31_vm1, 1.0, %v218_v11  ;;  %v159_v40 = vadd.f32 %v137_v28, %v133_v21  ;;  %v167_v41 = vadd.f32 %v138_v31, %v134_v25 }
   0x8   :  { %v58_v34 = vmul.f32 %v214_v32, %v46_v18  ;;  %v59_v35 = vmul.f32 %v214_v32, %v47_v22  ;;  %v60_v36 = vmul.f32 %v214_v32, %v48_v23  ;;  %v61_v37 = vmul.f32 %v214_v32, %v49_v24 }
   0xa   :  { %v64_v42 = vadd.f32 %v63_v19, %v58_v34  ;;  %v72_v43 = vadd.f32 %v71_v20, %v59_v35  ;;  %v80_v44 = vadd.f32 %v79_v29, %v60_v36  ;;  %v88_v45 = vadd.f32 %v87_v30, %v61_v37 }
   0xb   :  { %v139_v46 = vmul.f32 %v58_v34, %v58_v34  ;;  %v140_v47 = vmul.f32 %v59_v35, %v59_v35  ;;  %v141_v48 = vmul.f32 %v60_v36, %v60_v36  ;;  %v142_v49 = vmul.f32 %v61_v37, %v61_v37 }
   0xc   :  { %v65_v50 = vrot.slane %v64_v42, 4  ;;  %v73_v51 = vrot.slane %v72_v43, 4  ;;  %v81_v52 = vrot.slane %v80_v44, 4  ;;  %v89_v53 = vrot.slane %v88_v45, 4 }
   0xd   :  { %v144_v54 = vadd.f32 %v143_v38, %v139_v46  ;;  %v152_v55 = vadd.f32 %v151_v39, %v140_v47  ;;  %v160_v56 = vadd.f32 %v159_v40, %v141_v48  ;;  %v168_v57 = vadd.f32 %v167_v41, %v142_v49  ;;  %v62_v47 = vld [vmem:[%s309_s1] sm:$0xf] }
   0xe   :  { %v66_v58 = vadd.f32 %v65_v50, %v64_v42  ;;  %v74_v59 = vadd.f32 %v73_v51, %v72_v43  ;;  %v82_v60 = vadd.f32 %v81_v52, %v80_v44  ;;  %v90_v61 = vadd.f32 %v89_v53, %v88_v45  ;;  %v130_v53 = vld [vmem:[%s310_s2] sm:$0xf] }
   0xf   :  { %v145_v62 = vrot.slane %v144_v54, 4  ;;  %v153_v63 = vrot.slane %v152_v55, 4  ;;  %v161_v0 = vrot.slane %v160_v56, 4  ;;  %v169_v1 = vrot.slane %v168_v57, 4 }
  0x10   :  { %v67_v2 = vrot.slane %v66_v58, 2  ;;  %v75_v3 = vrot.slane %v74_v59, 2  ;;  %v83_v4 = vrot.slane %v82_v60, 2  ;;  %v91_v5 = vrot.slane %v90_v61, 2 }
  0x11   :  { %v146_v7 = vadd.f32 %v145_v62, %v144_v54  ;;  %v154_v8 = vadd.f32 %v153_v63, %v152_v55  ;;  %v162_v9 = vadd.f32 %v161_v0, %v160_v56  ;;  %v170_v10 = vadd.f32 %v169_v1, %v168_v57 }
  0x12   :  { %v68_v11 = vadd.f32 %v67_v2, %v66_v58  ;;  %v76_v12 = vadd.f32 %v75_v3, %v74_v59  ;;  %v84_v13 = vadd.f32 %v83_v4, %v82_v60  ;;  %v92_v14 = vadd.f32 %v91_v5, %v90_v61 }
  0x13   :  { %v147_v15 = vrot.slane %v146_v7, 2  ;;  %v155_v16 = vrot.slane %v154_v8, 2  ;;  %v163_v17 = vrot.slane %v162_v9, 2  ;;  %v171_v18 = vrot.slane %v170_v10, 2 }
  0x14   :  { %v69_v19 = vrot.slane %v68_v11, 1  ;;  %v77_v20 = vrot.slane %v76_v12, 1  ;;  %v85_v21 = vrot.slane %v84_v13, 1  ;;  %v93_v22 = vrot.slane %v92_v14, 1 }
  0x15   :  { %v148_v23 = vadd.f32 %v147_v15, %v146_v7  ;;  %v156_v24 = vadd.f32 %v155_v16, %v154_v8  ;;  %v164_v25 = vadd.f32 %v163_v17, %v162_v9  ;;  %v172_v26 = vadd.f32 %v171_v18, %v170_v10 }
  0x16   :  { %v70_v27 = vadd.f32 %v69_v19, %v68_v11  ;;  %v78_v28 = vadd.f32 %v77_v20, %v76_v12  ;;  %v86_v29 = vadd.f32 %v85_v21, %v84_v13  ;;  %v94_v30 = vadd.f32 %v93_v22, %v92_v14 }
  0x17   :  { %v149_v31 = vrot.slane %v148_v23, 1  ;;  %v157_v32 = vrot.slane %v156_v24, 1  ;;  %v165_v34 = vrot.slane %v164_v25, 1  ;;  %v173_v35 = vrot.slane %v172_v26, 1 }
  0x18   :  { %v99_v36 = vcombine.low %v70_v27, %v78_v28  ;;  %v100_v37 = vcombine.low %v86_v29, %v94_v30 }
  0x19   :  { %v150_v38 = vadd.f32 %v149_v31, %v148_v23  ;;  %v158_v39 = vadd.f32 %v157_v32, %v156_v24  ;;  %v166_v40 = vadd.f32 %v165_v34, %v164_v25  ;;  %v174_v41 = vadd.f32 %v173_v35, %v172_v26 }
  0x1a   :  { %v107_v42 = vrot.slane %v99_v36, %v284_v33  ;;  %v114_v43 = vrot.slane %v100_v37, %v284_v33 }
  0x1b   :  { %v179_v44 = vcombine.low %v150_v38, %v158_v39  ;;  %v180_v45 = vcombine.low %v166_v40, %v174_v41 }
  0x1c   :  { %v115_v46 = vcombine.low %v107_v42, %v114_v43 }
  0x1d   :  { %v187_v48 = vrot.slane %v179_v44, %v284_v33  ;;  %v194_v49 = vrot.slane %v180_v45, %v284_v33 }
  0x1e   :  { %v122_v50 = vrot.slane %v115_v46, %v284_v33 }
  0x1f   :  { %v195_v51 = vcombine.low %v187_v48, %v194_v49 }
  0x20   :  { %v124_v52 = vadd.f32 %v122_v50, %v62_v47 }
  0x21   :  { %v202_v54 = vrot.slane %v195_v51, %v284_v33 }
  0x22   :  { %129 = vst.msk [vmem:[%s309_s1] sm:$0xf] %vm243_vm0, %v124_v52 }
  0x23   :  { %v204_v55 = vadd.f32 %v202_v54, %v130_v53 }
  0x25   :  { %205 = vst.msk [vmem:[%s310_s2] sm:$0xf] %vm243_vm0, %v204_v55 }

// kernel: patchgan_forward.18
= control target key start
LH: loop header
LB: loop body
LE: loop exit
PB: predicated region body
PF: predicated region fallthrough
CT: control target
= control target key end

     0   :  { %s2091_s0 = inlined_call_operand.vmem [shape: bf16[24,4096], index: 0, kind: input, shape index: {}]   ;;  %s2092_s1 = inlined_call_operand.vmem [shape: bf16[4096,512], index: 1, kind: input, shape index: {}]   ;;  %s2093_s2 = inlined_call_operand.vmem [shape: f32[1,512], index: 2, kind: input, shape index: {}]   ;;  %s2094_s3 = inlined_call_operand.vmem [shape: f32[24,512], index: 3, kind: output, shape index: {}]  }
   0x1   :  { %2096 = sst [smem:[#allocation7_spill]] %s2091_s0 }
   0x2   :  { %2097 = sst [smem:[#allocation8_spill]] %s2092_s1 }
   0x3   :  { %s1699_s12 = smov 0   ;;  %s1701_s13 = smov 0  }
   0x4   :  { %s1703_s14 = smov 0   ;;  %s1705_s15 = smov 0  }
   0x5   :  { %s1707_s16 = smov 0   ;;  %s1709_s17 = smov 0  }
   0x6   :  { %s1711_s18 = smov 0   ;;  %s1713_s19 = smov 0  }
   0x7   :  { %s1715_s20 = smov 0   ;;  %s1717_s21 = smov 0  }
   0x8   :  { %s1719_s22 = smov 0  }
   0x9 LB: > { %s1293_s23 = sadd.s32 4294967295, %s1676_s22   ;;  %s25_s24 = sadd.s32 1, %s1668_s20  ;;  %s1676_s22 = sphi %s1719_s22, %s13_s22   ;;  %s1672_s21 = sphi %s1717_s21, %s2114_s21   ;;  %s1668_s20 = sphi %s1715_s20, %s2113_s20   ;;  %s1664_s19 = sphi %s1713_s19, %s2112_s19   ;;  %s1660_s18 = sphi %s1711_s18, %s2111_s18   ;;  %s1656_s17 = sphi %s1709_s17, %s2110_s17   ;;  %s1652_s16 = sphi %s1707_s16, %s2109_s16   ;;  %s1648_s15 = sphi %s1705_s15, %s2108_s15   ;;  %s1644_s14 = sphi %s1703_s14, %s2107_s14   ;;  %s1640_s13 = sphi %s1701_s13, %s2106_s13   ;;  %s1636_s12 = sphi %s1699_s12, %s2105_s12  }
   0xa   : > { %p26_p0 = scmp.ge.s32.totalorder %s25_s24, 8  ;;  %s28_s25 = sadd.s32 1, %s1672_s21 }
   0xb   : > { %s41_s26 = sadd.s32 1, %s1656_s17  ;;  %p48_p1 = scmp.ne.s32.totalorder %s1656_s17, %s1652_s16 }
   0xc   : > { %s2116_s24 = smov (%p26_p0, %s25_s24), 0  ;;  %s2118_s25 = smov (!%p26_p0, %s28_s25), %s1672_s21 }
   0xd   : > { %s37_s27 = ssub.s32 %s1668_s20, %s2116_s24  ;;  %p49_p2 = scmp.eq.s32.totalorder %s1676_s22, 0 }
   0xe   : > { %p30_p3 = scmp.ge.s32.totalorder %s2118_s25, 2  ;;  %p39_p4 = scmp.eq.s32.totalorder %s37_s27, 0 }
   0xf   : > { %p1766_p5 = por %p49_p2, %p48_p1  ;;  %s69_s29 = sadd.s32 1, %s1648_s15 }
  0x10   : > { %s2120_s25 = smov (%p30_p3, %s2118_s25), 0  ;;  %p76_p6 = scmp.ne.s32.totalorder %s1648_s15, %s1644_s14 }
  0x11   : > { %2099 = sst [smem:[#allocation6_spill]] %s2120_s25  ;;  %s65_s4 = ssub.s32 %s1672_s21, %s2120_s25 }
  0x12   : > { %s1774_s30 = scalar_select %p39_p4, %s1656_s17, %s41_s26  }
  0x13   : > { %s66_s5 = sor.u32 %s65_s4, %s37_s27  ;;  %p121_p7 = scmp.eq.s32.totalorder %s65_s4, 0 }
  0x14   : > { %p67_p8 = scmp.eq.s32.totalorder %s66_s5, 0  ;;  %p1780_p9 = por %p76_p6, %p49_p2 }
  0x15   : > { %s123_s7 = sadd.s32 1, %s1640_s13  ;;  %p133_p10 = scmp.ne.s32.totalorder %s1640_s13, %s1636_s12 }
  0x16   : > { %s1788_s8 = scalar_select %p67_p8, %s1648_s15, %s69_s29  }
  0x17   : > { %s1791_s9 = scalar_select %p121_p7, %s1640_s13, %s123_s7  }
  0x18   : > { %p134_p11 = scmp.eq.s32.totalorder %s1293_s23, 15  ;;  %p1296_p13 = scmp.ge.s32.totalorder %s1676_s22, 16 }
  0x1a   : > { %p1793_p12 = por %p134_p11, %p133_p10  ;;  %156 = sbr.rel (%p1296_p13) target bundleno = 88 (0x58), region = 16 }
  0x21   : > { %159 = sbr.rel (!%p1766_p5) target bundleno = 46 (0x2e), region = 20  ;;  %s161_s11 = sand.u32 (%p1766_p5), 1, %s1656_s17  }
  0x22   : > { %s1385_s26 = sshll.u32 (%p1766_p5), %s1668_s20, 4  ;;  %s1392_s27 = smul.u32 (%p1766_p5), 48, %s161_s11 }
  0x23   : > { %s2102_s0 = sld [smem:[#allocation7_spill]] (%p1766_p5) }
  0x24   : > { %s163_s23 = scalar_lea.vmem (%p1766_p5), [#allocation3], %s1392_s27 }
  0x29   : > { %s169_s5 = scalar_lea.vmem %s2102_s0, %s1385_s26 }
  0x2a   : > { %v182_v0 = vld [vmem:[%s169_s5] sm:$0xff]  ;;  %v184_v1 = vld [vmem:[%s169_s5 + $0x8] sm:$0xff] }
  0x2b   : > { %v186_v2 = vld [vmem:[%s169_s5 + $0x80] sm:$0xff]  ;;  %v188_v3 = vld [vmem:[%s169_s5 + $0x88] sm:$0xff]  ;;  %183 = vst [vmem:[%s163_s23] sm:$0xff] %v182_v0  ;;  %185 = vst [vmem:[%s163_s23 + $0x8] sm:$0xff] %v184_v1 }
  0x2c   : > { %v190_v4 = vld [vmem:[%s169_s5 + $0x100] sm:$0xff]  ;;  %v192_v5 = vld [vmem:[%s169_s5 + $0x108] sm:$0xff]  ;;  %187 = vst [vmem:[%s163_s23 + $0x10] sm:$0xff] %v186_v2  ;;  %189 = vst [vmem:[%s163_s23 + $0x18] sm:$0xff] %v188_v3 }
  0x2d   : > { %191 = vst [vmem:[%s163_s23 + $0x20] sm:$0xff] %v190_v4  ;;  %193 = vst [vmem:[%s163_s23 + $0x28] sm:$0xff] %v192_v5 }
  0x2e PF: > { %199 = sbr.rel (!%p1780_p9) target bundleno = 88 (0x58), region = 43  ;;  %s201_s28 = sand.u32 (%p1780_p9), 1, %s1648_s15  }
  0x2f   : > { %s1301_s7 = sshll.u32 (%p1780_p9), %s1672_s21, 1  ;;  %s1299_s11 = sshll.u32 (%p1780_p9), %s201_s28, 9 }
  0x30   : > { %s1386_s26 = sshll.u32 (%p1780_p9), %s1668_s20, 8  ;;  %s2103_s1 = sld [smem:[#allocation8_spill]] (%p1780_p9) }
  0x31   : > { %s207_s29 = sadd.s32 (%p1780_p9), %s1386_s26, %s1301_s7  ;;  %s1818_s6 = scalar_lea.vmem (%p1780_p9), [#allocation4], %s1299_s11 }
  0x32   : > { %s1303_s4 = sshll.u32 (%p1780_p9), %s207_s29, 2 }
  0x36   : > { %s1813_s0 = scalar_lea.vmem %s2103_s1, %s1303_s4 }
  0x37   : > { %v363_v6 = vld [vmem:[%s1813_s0] sm:$0xff]  ;;  %v365_v7 = vld [vmem:[%s1813_s0 + $0x10] sm:$0xff] }
  0x38   : > { %v367_v8 = vld [vmem:[%s1813_s0 + $0x20] sm:$0xff]  ;;  %364 = vst [vmem:[%s1818_s6] sm:$0xff] %v363_v6  ;;  %366 = vst [vmem:[%s1818_s6 + $0x8] sm:$0xff] %v365_v7  ;;  %v369_v9 = vld [vmem:[%s1813_s0 + $0x30] sm:$0xff] }
  0x39   : > { %368 = vst [vmem:[%s1818_s6 + $0x10] sm:$0xff] %v367_v8  ;;  %v371_v10 = vld [vmem:[%s1813_s0 + $0x40] sm:$0xff]  ;;  %v373_v11 = vld [vmem:[%s1813_s0 + $0x50] sm:$0xff]  ;;  %370 = vst [vmem:[%s1818_s6 + $0x18] sm:$0xff] %v369_v9 }
  0x3a   : > { %372 = vst [vmem:[%s1818_s6 + $0x20] sm:$0xff] %v371_v10  ;;  %374 = vst [vmem:[%s1818_s6 + $0x28] sm:$0xff] %v373_v11  ;;  %v375_v12 = vld [vmem:[%s1813_s0 + $0x60] sm:$0xff]  ;;  %v377_v13 = vld [vmem:[%s1813_s0 + $0x70] sm:$0xff] }
  0x3b   : > { %v379_v14 = vld [vmem:[%s1813_s0 + $0x80] sm:$0xff]  ;;  %376 = vst [vmem:[%s1818_s6 + $0x30] sm:$0xff] %v375_v12  ;;  %378 = vst [vmem:[%s1818_s6 + $0x38] sm:$0xff] %v377_v13  ;;  %v381_v15 = vld [vmem:[%s1813_s0 + $0x90] sm:$0xff] }
  0x3c   : > { %380 = vst [vmem:[%s1818_s6 + $0x40] sm:$0xff] %v379_v14  ;;  %v383_v16 = vld [vmem:[%s1813_s0 + $0xa0] sm:$0xff]  ;;  %v385_v17 = vld [vmem:[%s1813_s0 + $0xb0] sm:$0xff]  ;;  %382 = vst [vmem:[%s1818_s6 + $0x48] sm:$0xff] %v381_v15 }
  0x3d   : > { %384 = vst [vmem:[%s1818_s6 + $0x50] sm:$0xff] %v383_v16  ;;  %386 = vst [vmem:[%s1818_s6 + $0x58] sm:$0xff] %v385_v17  ;;  %v387_v18 = vld [vmem:[%s1813_s0 + $0xc0] sm:$0xff]  ;;  %v389_v19 = vld [vmem:[%s1813_s0 + $0xd0] sm:$0xff] }
  0x3e   : > { %v391_v20 = vld [vmem:[%s1813_s0 + $0xe0] sm:$0xff]  ;;  %388 = vst [vmem:[%s1818_s6 + $0x60] sm:$0xff] %v387_v18  ;;  %390 = vst [vmem:[%s1818_s6 + $0x68] sm:$0xff] %v389_v19  ;;  %v393_v21 = vld [vmem:[%s1813_s0 + $0xf0] sm:$0xff] }
  0x3f   : > { %392 = vst [vmem:[%s1818_s6 + $0x70] sm:$0xff] %v391_v20  ;;  %v395_v22 = vld [vmem:[%s1813_s0 + $0x100] sm:$0xff]  ;;  %v397_v23 = vld [vmem:[%s1813_s0 + $0x110] sm:$0xff]  ;;  %394 = vst [vmem:[%s1818_s6 + $0x78] sm:$0xff] %v393_v21 }
  0x40   : > { %396 = vst [vmem:[%s1818_s6 + $0x80] sm:$0xff] %v395_v22  ;;  %398 = vst [vmem:[%s1818_s6 + $0x88] sm:$0xff] %v397_v23  ;;  %v399_v24 = vld [vmem:[%s1813_s0 + $0x120] sm:$0xff]  ;;  %v401_v25 = vld [vmem:[%s1813_s0 + $0x130] sm:$0xff] }
  0x41   : > { %v403_v26 = vld [vmem:[%s1813_s0 + $0x140] sm:$0xff]  ;;  %400 = vst [vmem:[%s1818_s6 + $0x90] sm:$0xff] %v399_v24  ;;  %402 = vst [vmem:[%s1818_s6 + $0x98] sm:$0xff] %v401_v25  ;;  %v405_v27 = vld [vmem:[%s1813_s0 + $0x150] sm:$0xff] }
  0x42   : > { %404 = vst [vmem:[%s1818_s6 + $0xa0] sm:$0xff] %v403_v26  ;;  %v407_v28 = vld [vmem:[%s1813_s0 + $0x160] sm:$0xff]  ;;  %v409_v29 = vld [vmem:[%s1813_s0 + $0x170] sm:$0xff]  ;;  %406 = vst [vmem:[%s1818_s6 + $0xa8] sm:$0xff] %v405_v27 }
  0x43   : > { %408 = vst [vmem:[%s1818_s6 + $0xb0] sm:$0xff] %v407_v28  ;;  %410 = vst [vmem:[%s1818_s6 + $0xb8] sm:$0xff] %v409_v29  ;;  %v411_v30 = vld [vmem:[%s1813_s0 + $0x180] sm:$0xff]  ;;  %v413_v31 = vld [vmem:[%s1813_s0 + $0x190] sm:$0xff] }
  0x44   : > { %v415_v32 = vld [vmem:[%s1813_s0 + $0x1a0] sm:$0xff]  ;;  %412 = vst [vmem:[%s1818_s6 + $0xc0] sm:$0xff] %v411_v30  ;;  %414 = vst [vmem:[%s1818_s6 + $0xc8] sm:$0xff] %v413_v31  ;;  %v417_v33 = vld [vmem:[%s1813_s0 + $0x1b0] sm:$0xff] }
  0x45   : > { %416 = vst [vmem:[%s1818_s6 + $0xd0] sm:$0xff] %v415_v32  ;;  %v419_v34 = vld [vmem:[%s1813_s0 + $0x1c0] sm:$0xff]  ;;  %v421_v35 = vld [vmem:[%s1813_s0 + $0x1d0] sm:$0xff]  ;;  %418 = vst [vmem:[%s1818_s6 + $0xd8] sm:$0xff] %v417_v33 }
  0x46   : > { %420 = vst [vmem:[%s1818_s6 + $0xe0] sm:$0xff] %v419_v34  ;;  %422 = vst [vmem:[%s1818_s6 + $0xe8] sm:$0xff] %v421_v35  ;;  %v423_v36 = vld [vmem:[%s1813_s0 + $0x1e0] sm:$0xff]  ;;  %v425_v37 = vld [vmem:[%s1813_s0 + $0x1f0] sm:$0xff] }
  0x47   : > { %v427_v38 = vld [vmem:[%s1813_s0 + $0x200] sm:$0xff]  ;;  %424 = vst [vmem:[%s1818_s6 + $0xf0] sm:$0xff] %v423_v36  ;;  %426 = vst [vmem:[%s1818_s6 + $0xf8] sm:$0xff] %v425_v37  ;;  %v429_v39 = vld [vmem:[%s1813_s0 + $0x210] sm:$0xff] }
  0x48   : > { %428 = vst [vmem:[%s1818_s6 + $0x100] sm:$0xff] %v427_v38  ;;  %v431_v40 = vld [vmem:[%s1813_s0 + $0x220] sm:$0xff]  ;;  %v433_v41 = vld [vmem:[%s1813_s0 + $0x230] sm:$0xff]  ;;  %430 = vst [vmem:[%s1818_s6 + $0x108] sm:$0xff] %v429_v39 }
  0x49   : > { %432 = vst [vmem:[%s1818_s6 + $0x110] sm:$0xff] %v431_v40  ;;  %434 = vst [vmem:[%s1818_s6 + $0x118] sm:$0xff] %v433_v41  ;;  %v435_v42 = vld [vmem:[%s1813_s0 + $0x240] sm:$0xff]  ;;  %v437_v43 = vld [vmem:[%s1813_s0 + $0x250] sm:$0xff] }
  0x4a   : > { %v439_v44 = vld [vmem:[%s1813_s0 + $0x260] sm:$0xff]  ;;  %436 = vst [vmem:[%s1818_s6 + $0x120] sm:$0xff] %v435_v42  ;;  %438 = vst [vmem:[%s1818_s6 + $0x128] sm:$0xff] %v437_v43  ;;  %v441_v45 = vld [vmem:[%s1813_s0 + $0x270] sm:$0xff] }
  0x4b   : > { %440 = vst [vmem:[%s1818_s6 + $0x130] sm:$0xff] %v439_v44  ;;  %v443_v46 = vld [vmem:[%s1813_s0 + $0x280] sm:$0xff]  ;;  %v445_v47 = vld [vmem:[%s1813_s0 + $0x290] sm:$0xff]  ;;  %442 = vst [vmem:[%s1818_s6 + $0x138] sm:$0xff] %v441_v45 }
  0x4c   : > { %444 = vst [vmem:[%s1818_s6 + $0x140] sm:$0xff] %v443_v46  ;;  %446 = vst [vmem:[%s1818_s6 + $0x148] sm:$0xff] %v445_v47  ;;  %v447_v48 = vld [vmem:[%s1813_s0 + $0x2a0] sm:$0xff]  ;;  %v449_v49 = vld [vmem:[%s1813_s0 + $0x2b0] sm:$0xff] }
  0x4d   : > { %v451_v50 = vld [vmem:[%s1813_s0 + $0x2c0] sm:$0xff]  ;;  %448 = vst [vmem:[%s1818_s6 + $0x150] sm:$0xff] %v447_v48  ;;  %450 = vst [vmem:[%s1818_s6 + $0x158] sm:$0xff] %v449_v49  ;;  %v453_v51 = vld [vmem:[%s1813_s0 + $0x2d0] sm:$0xff] }
  0x4e   : > { %452 = vst [vmem:[%s1818_s6 + $0x160] sm:$0xff] %v451_v50  ;;  %v455_v52 = vld [vmem:[%s1813_s0 + $0x2e0] sm:$0xff]  ;;  %v457_v53 = vld [vmem:[%s1813_s0 + $0x2f0] sm:$0xff]  ;;  %454 = vst [vmem:[%s1818_s6 + $0x168] sm:$0xff] %v453_v51 }
  0x4f   : > { %456 = vst [vmem:[%s1818_s6 + $0x170] sm:$0xff] %v455_v52  ;;  %458 = vst [vmem:[%s1818_s6 + $0x178] sm:$0xff] %v457_v53  ;;  %v459_v54 = vld [vmem:[%s1813_s0 + $0x300] sm:$0xff]  ;;  %v461_v55 = vld [vmem:[%s1813_s0 + $0x310] sm:$0xff] }
  0x50   : > { %v463_v56 = vld [vmem:[%s1813_s0 + $0x320] sm:$0xff]  ;;  %460 = vst [vmem:[%s1818_s6 + $0x180] sm:$0xff] %v459_v54  ;;  %462 = vst [vmem:[%s1818_s6 + $0x188] sm:$0xff] %v461_v55  ;;  %v465_v57 = vld [vmem:[%s1813_s0 + $0x330] sm:$0xff] }
  0x51   : > { %464 = vst [vmem:[%s1818_s6 + $0x190] sm:$0xff] %v463_v56  ;;  %v467_v58 = vld [vmem:[%s1813_s0 + $0x340] sm:$0xff]  ;;  %v469_v59 = vld [vmem:[%s1813_s0 + $0x350] sm:$0xff]  ;;  %466 = vst [vmem:[%s1818_s6 + $0x198] sm:$0xff] %v465_v57 }
  0x52   : > { %468 = vst [vmem:[%s1818_s6 + $0x1a0] sm:$0xff] %v467_v58  ;;  %470 = vst [vmem:[%s1818_s6 + $0x1a8] sm:$0xff] %v469_v59  ;;  %v471_v60 = vld [vmem:[%s1813_s0 + $0x360] sm:$0xff]  ;;  %v473_v61 = vld [vmem:[%s1813_s0 + $0x370] sm:$0xff] }
  0x53   : > { %v475_v62 = vld [vmem:[%s1813_s0 + $0x380] sm:$0xff]  ;;  %472 = vst [vmem:[%s1818_s6 + $0x1b0] sm:$0xff] %v471_v60  ;;  %474 = vst [vmem:[%s1818_s6 + $0x1b8] sm:$0xff] %v473_v61  ;;  %v477_v63 = vld [vmem:[%s1813_s0 + $0x390] sm:$0xff] }
  0x54   : > { %476 = vst [vmem:[%s1818_s6 + $0x1c0] sm:$0xff] %v475_v62  ;;  %v479_v0 = vld [vmem:[%s1813_s0 + $0x3a0] sm:$0xff]  ;;  %v481_v1 = vld [vmem:[%s1813_s0 + $0x3b0] sm:$0xff]  ;;  %478 = vst [vmem:[%s1818_s6 + $0x1c8] sm:$0xff] %v477_v63 }
  0x55   : > { %480 = vst [vmem:[%s1818_s6 + $0x1d0] sm:$0xff] %v479_v0  ;;  %482 = vst [vmem:[%s1818_s6 + $0x1d8] sm:$0xff] %v481_v1  ;;  %v483_v2 = vld [vmem:[%s1813_s0 + $0x3c0] sm:$0xff]  ;;  %v485_v3 = vld [vmem:[%s1813_s0 + $0x3d0] sm:$0xff] }
  0x56   : > { %v487_v4 = vld [vmem:[%s1813_s0 + $0x3e0] sm:$0xff]  ;;  %484 = vst [vmem:[%s1818_s6 + $0x1e0] sm:$0xff] %v483_v2  ;;  %486 = vst [vmem:[%s1818_s6 + $0x1e8] sm:$0xff] %v485_v3  ;;  %v489_v5 = vld [vmem:[%s1813_s0 + $0x3f0] sm:$0xff] }
  0x57   : > { %488 = vst [vmem:[%s1818_s6 + $0x1f0] sm:$0xff] %v487_v4  ;;  %490 = vst [vmem:[%s1818_s6 + $0x1f8] sm:$0xff] %v489_v5 }
  0x58 PF: > { %p1304_p0 = scmp.ge.s32.totalorder %s1676_s22, 1  ;;  %p503_p1 = scmp.lt.s32.totalorder %s1676_s22, 17 }
  0x5a   : > { %p504_p2 = pnand %p1304_p0, %p503_p1 }
  0x5b   : > { %s510_s23 = sand.u32 (!%p504_p2), 1, %s1652_s16   ;;  %s517_s28 = sand.u32 (!%p504_p2), 1, %s1644_s14  }
  0x5c   : > { %507 = sbr.rel (%p504_p2) target bundleno = 417 (0x1a1), region = 85  ;;  %s1305_s11 = sshll.u32 (!%p504_p2), %s517_s28, 9 }
  0x5d   : > { %s1393_s7 = smul.u32 (!%p504_p2), 48, %s510_s23  ;;  %s544_s26 = sand.u32 (!%p504_p2), 1, %s1636_s12  }
  0x5e   : > { %s1394_s29 = smul.u32 (!%p504_p2), 48, %s544_s26  ;;  %s1306_s0 = sshll.u32 (!%p504_p2), %s1664_s19, 1 }
  0x5f   : > { %p552_p3 = scmp.lt.s32.totalorder (!%p504_p2), %s1306_s0, 3  ;;  %s1957_s6 = scalar_lea.vmem (!%p504_p2), [#allocation3], %s1393_s7 }
  0x60   : > { %s1959_s1 = scalar_lea.vmem (!%p504_p2), [#allocation4], %s1305_s11  ;;  %s1961_s25 = scalar_lea.vmem (!%p504_p2), [#allocation5], %s1394_s29 }
  0x61   : > { %p1307_p4 = scmp.ne.s32.totalorder (!%p504_p2), %s1660_s18, 0 }
  0x63   : > { %s2122_s0 = smov (!%p552_p3, %s1306_s0), 3  ;;  %561 = sbr.rel (%p1307_p4) target bundleno = 106 (0x6a), region = 97 }
  0x64   : > { %s554_s5 = scalar_lea.vmem %s2093_s2, %s2122_s0  ;;  %v1678_v6 = vmov (!%p1307_p4), 0.0  }
  0x65   : > { %562 = vst [vmem:[#allocation2] sm:$0xff] (!%p1307_p4), %v1678_v6  ;;  %563 = vst [vmem:[#allocation2 + $0x8] sm:$0xff] (!%p1307_p4), %v1678_v6 }
  0x66   : > { %564 = vst [vmem:[#allocation2 + $0x10] sm:$0xff] (!%p1307_p4), %v1678_v6  ;;  %565 = vst [vmem:[#allocation2 + $0x18] sm:$0xff] (!%p1307_p4), %v1678_v6 }
  0x67   : > { %566 = vst [vmem:[#allocation2 + $0x20] sm:$0xff] (!%p1307_p4), %v1678_v6  ;;  %567 = vst [vmem:[#allocation2 + $0x28] sm:$0xff] (!%p1307_p4), %v1678_v6 }
  0x6a PF: > { %v1484_v7 = vld [vmem:[%s1959_s1 + $0x4] ss:$8 sps:$4 sm:$0xff]   ;;  %v1488_v9 = vld [vmem:[%s1959_s1] ss:$8 sps:$4 sm:$0xff]   ;;  %v1490_v11 = vld [vmem:[%s1959_s1 + $0x14] ss:$8 sps:$4 sm:$0xff]  }
  0x6b   : > { %v1486_v8 = vld [vmem:[%s1959_s1 + $0x104] ss:$8 sps:$4 sm:$0xff]   ;;  %998 = vmatprep.subr.bf16.mxu1 %v1484_v7  ;;  %v1489_v10 = vld [vmem:[%s1959_s1 + $0x100] ss:$8 sps:$4 sm:$0xff]   ;;  %v1492_v12 = vld [vmem:[%s1959_s1 + $0x114] ss:$8 sps:$4 sm:$0xff]  }
  0x6c   : > { %1049 = vmatprep.subr.bf16.mxu0 %v1486_v8  ;;  %999 = vmatpush1.bf16.msra.mxu1 %v1488_v9  ;;  %v1494_v13 = vld [vmem:[%s1959_s1 + $0x10] ss:$8 sps:$4 sm:$0xff]   ;;  %v1496_v15 = vld [vmem:[%s1959_s1 + $0x24] ss:$8 sps:$4 sm:$0xff]   ;;  %v1500_v17 = vld [vmem:[%s1959_s1 + $0x20] ss:$8 sps:$4 sm:$0xff]  }
  0x6d   : > { %1050 = vmatpush1.bf16.msra.mxu0 %v1489_v10  ;;  %1000 = vmatprep.subr.bf16.mxu1 %v1490_v11  ;;  %v1495_v14 = vld [vmem:[%s1959_s1 + $0x110] ss:$8 sps:$4 sm:$0xff]   ;;  %v1498_v16 = vld [vmem:[%s1959_s1 + $0x124] ss:$8 sps:$4 sm:$0xff]   ;;  %v1501_v18 = vld [vmem:[%s1959_s1 + $0x120] ss:$8 sps:$4 sm:$0xff]  }
  0x6e   : > { %1051 = vmatprep.subr.bf16.mxu0 %v1492_v12  ;;  %v1502_v19 = vld [vmem:[%s1959_s1 + $0x34] ss:$8 sps:$4 sm:$0xff]   ;;  %v1506_v21 = vld [vmem:[%s1959_s1 + $0x30] ss:$8 sps:$4 sm:$0xff]   ;;  %v1508_v23 = vld [vmem:[%s1959_s1 + $0x44] ss:$8 sps:$4 sm:$0xff]  }
  0x6f   : > { %v1504_v20 = vld [vmem:[%s1959_s1 + $0x134] ss:$8 sps:$4 sm:$0xff]   ;;  %v1507_v22 = vld [vmem:[%s1959_s1 + $0x130] ss:$8 sps:$4 sm:$0xff]   ;;  %v1510_v24 = vld [vmem:[%s1959_s1 + $0x144] ss:$8 sps:$4 sm:$0xff]  }
  0x70   : > { %1001 = vmatpush1.bf16.msra.mxu1 %v1494_v13  ;;  %v1512_v25 = vld [vmem:[%s1959_s1 + $0x40] ss:$8 sps:$4 sm:$0xff]   ;;  %v1514_v27 = vld [vmem:[%s1959_s1 + $0x54] ss:$8 sps:$4 sm:$0xff]   ;;  %v1518_v29 = vld [vmem:[%s1959_s1 + $0x50] ss:$8 sps:$4 sm:$0xff]  }
  0x71   : > { %1052 = vmatpush1.bf16.msra.mxu0 %v1495_v14  ;;  %1002 = vmatprep.subr.bf16.mxu1 %v1496_v15  ;;  %v1513_v26 = vld [vmem:[%s1959_s1 + $0x140] ss:$8 sps:$4 sm:$0xff]   ;;  %v1516_v28 = vld [vmem:[%s1959_s1 + $0x154] ss:$8 sps:$4 sm:$0xff]   ;;  %v1519_v30 = vld [vmem:[%s1959_s1 + $0x150] ss:$8 sps:$4 sm:$0xff]  }
  0x72   : > { %1053 = vmatprep.subr.bf16.mxu0 %v1498_v16  ;;  %v1520_v31 = vld [vmem:[%s1959_s1 + $0x64] ss:$8 sps:$4 sm:$0xff]   ;;  %v1524_v33 = vld [vmem:[%s1959_s1 + $0x60] ss:$8 sps:$4 sm:$0xff]   ;;  %v1526_v35 = vld [vmem:[%s1959_s1 + $0x74] ss:$8 sps:$4 sm:$0xff]  }
  0x73   : > { %v1522_v32 = vld [vmem:[%s1959_s1 + $0x164] ss:$8 sps:$4 sm:$0xff]   ;;  %v1525_v34 = vld [vmem:[%s1959_s1 + $0x160] ss:$8 sps:$4 sm:$0xff]   ;;  %v1528_v36 = vld [vmem:[%s1959_s1 + $0x174] ss:$8 sps:$4 sm:$0xff]  }
  0x74   : > { %1003 = vmatpush1.bf16.msra.mxu1 %v1500_v17  ;;  %v1530_v37 = vld [vmem:[%s1959_s1 + $0x70] ss:$8 sps:$4 sm:$0xff]   ;;  %v1532_v39 = vld [vmem:[%s1959_s1 + $0x84] ss:$8 sps:$4 sm:$0xff]   ;;  %v1536_v41 = vld [vmem:[%s1959_s1 + $0x80] ss:$8 sps:$4 sm:$0xff]  }
  0x75   : > { %1054 = vmatpush1.bf16.msra.mxu0 %v1501_v18  ;;  %1004 = vmatprep.subr.bf16.mxu1 %v1502_v19  ;;  %v1531_v38 = vld [vmem:[%s1959_s1 + $0x170] ss:$8 sps:$4 sm:$0xff]   ;;  %v1534_v40 = vld [vmem:[%s1959_s1 + $0x184] ss:$8 sps:$4 sm:$0xff]   ;;  %v1537_v42 = vld [vmem:[%s1959_s1 + $0x180] ss:$8 sps:$4 sm:$0xff]  }
  0x76   : > { %1055 = vmatprep.subr.bf16.mxu0 %v1504_v20  ;;  %v1538_v43 = vld [vmem:[%s1959_s1 + $0x94] ss:$8 sps:$4 sm:$0xff]   ;;  %v1542_v45 = vld [vmem:[%s1959_s1 + $0x90] ss:$8 sps:$4 sm:$0xff]   ;;  %v1544_v47 = vld [vmem:[%s1959_s1 + $0xa4] ss:$8 sps:$4 sm:$0xff]  }
  0x77   : > { %v1540_v44 = vld [vmem:[%s1959_s1 + $0x194] ss:$8 sps:$4 sm:$0xff]   ;;  %v1543_v46 = vld [vmem:[%s1959_s1 + $0x190] ss:$8 sps:$4 sm:$0xff]   ;;  %v1546_v48 = vld [vmem:[%s1959_s1 + $0x1a4] ss:$8 sps:$4 sm:$0xff]  }
  0x78   : > { %1005 = vmatpush1.bf16.msra.mxu1 %v1506_v21  ;;  %v1548_v49 = vld [vmem:[%s1959_s1 + $0xa0] ss:$8 sps:$4 sm:$0xff]   ;;  %v1550_v51 = vld [vmem:[%s1959_s1 + $0xb4] ss:$8 sps:$4 sm:$0xff]   ;;  %v1554_v53 = vld [vmem:[%s1959_s1 + $0xb0] ss:$8 sps:$4 sm:$0xff]  }
  0x79   : > { %1056 = vmatpush1.bf16.msra.mxu0 %v1507_v22  ;;  %1006 = vmatprep.subr.bf16.mxu1 %v1508_v23  ;;  %v1549_v50 = vld [vmem:[%s1959_s1 + $0x1a0] ss:$8 sps:$4 sm:$0xff]   ;;  %v1552_v52 = vld [vmem:[%s1959_s1 + $0x1b4] ss:$8 sps:$4 sm:$0xff]   ;;  %v1555_v55 = vld [vmem:[%s1959_s1 + $0x1b0] ss:$8 sps:$4 sm:$0xff]  }
  0x7a   : > { %1057 = vmatprep.subr.bf16.mxu0 %v1510_v24  ;;  %v1582_v54 = vld [vmem:[%s1957_s6 + $0x4] ss:$16 sps:$4 sm:$0xff]   ;;  %v1585_v58 = vld [vmem:[%s1957_s6 + $0xc] ss:$16 sps:$4 sm:$0xff]   ;;  %v1560_v59 = vld [vmem:[%s1959_s1 + $0xc0] ss:$8 sps:$4 sm:$0xff]  }
  0x7b   : > { %v1556_v56 = vld [vmem:[%s1959_s1 + $0xc4] ss:$8 sps:$4 sm:$0xff]   ;;  %1030 = vmatprep.mubr.bf16.mxu1 %v1582_v54  ;;  %1081 = vmatprep.mubr.bf16.mxu0 %v1585_v58  ;;  %v1561_v60 = vld [vmem:[%s1959_s1 + $0x1c0] ss:$8 sps:$4 sm:$0xff]   ;;  %v1562_v61 = vld [vmem:[%s1959_s1 + $0xd4] ss:$8 sps:$4 sm:$0xff]  }
  0x7c   : > { %1007 = vmatpush1.bf16.msra.mxu1 %v1512_v25  ;;  %v1558_v57 = vld [vmem:[%s1959_s1 + $0x1c4] ss:$8 sps:$4 sm:$0xff]   ;;  %v1564_v62 = vld [vmem:[%s1959_s1 + $0x1d4] ss:$8 sps:$4 sm:$0xff]   ;;  %v1566_v63 = vld [vmem:[%s1959_s1 + $0xd0] ss:$8 sps:$4 sm:$0xff]  }
  0x7d   : > { %1058 = vmatpush1.bf16.msra.mxu0 %v1513_v26  ;;  %1008 = vmatprep.subr.bf16.mxu1 %v1514_v27  ;;  %v1567_v0 = vld [vmem:[%s1959_s1 + $0x1d0] ss:$8 sps:$4 sm:$0xff]   ;;  %v1568_v1 = vld [vmem:[%s1959_s1 + $0xe4] ss:$8 sps:$4 sm:$0xff]   ;;  %v1572_v3 = vld [vmem:[%s1959_s1 + $0xe0] ss:$8 sps:$4 sm:$0xff]  }
  0x7e   : > { %1059 = vmatprep.subr.bf16.mxu0 %v1516_v28  ;;  %v1570_v2 = vld [vmem:[%s1959_s1 + $0x1e4] ss:$8 sps:$4 sm:$0xff]   ;;  %v1573_v4 = vld [vmem:[%s1959_s1 + $0x1e0] ss:$8 sps:$4 sm:$0xff]   ;;  %v1574_v5 = vld [vmem:[%s1959_s1 + $0xf4] ss:$8 sps:$4 sm:$0xff]  }
  0x7f   : > { %v1576_v6 = vld [vmem:[%s1959_s1 + $0x1f4] ss:$8 sps:$4 sm:$0xff]   ;;  %v1578_v7 = vld [vmem:[%s1959_s1 + $0xf0] ss:$8 sps:$4 sm:$0xff]   ;;  %v570_v26 = vld [vmem:[#allocation2 + $0x10] sm:$0xff]  ;;  %p1380_p5 = scmp.ne.s32.totalorder %s1660_s18, 7 }
  0x80   : > { %1009 = vmatpush1.bf16.msra.mxu1 %v1518_v29  ;;  %v1579_v8 = vld [vmem:[%s1959_s1 + $0x1f0] ss:$8 sps:$4 sm:$0xff]  }
  0x81   : > { %1060 = vmatpush1.bf16.msra.mxu0 %v1519_v30  ;;  %1010 = vmatprep.subr.bf16.mxu1 %v1520_v31  ;;  %v578_v9 = vld [vmem:[%s1957_s6 + $0x20] sm:$0xff]  ;;  %v579_v10 = vld [vmem:[%s1957_s6 + $0x28] sm:$0xff] }
  0x82   : > { %1061 = vmatprep.subr.bf16.mxu0 %v1522_v32  ;;  %v1580_v11 = vld [vmem:[%s1957_s6] ss:$16 sps:$4 sm:$0xff]   ;;  %v1583_v12 = vld [vmem:[%s1957_s6 + $0x8] ss:$16 sps:$4 sm:$0xff]   ;;  %v1313_v13 = vcombine.high %v578_v9, %v578_v9  ;;  %v1315_v14 = vcombine.high %v579_v10, %v579_v10  ;;  %v1312_v15 = vcombine.low %v578_v9, %v578_v9  ;;  %v1314_v16 = vcombine.low %v579_v10, %v579_v10 }
  0x83   : > { %v568_v18 = vld [vmem:[#allocation2] sm:$0xff]  ;;  %v569_v22 = vld [vmem:[#allocation2 + $0x8] sm:$0xff]  ;;  %v571_v31 = vld [vmem:[#allocation2 + $0x18] sm:$0xff] }
  0x84   : > { %1011 = vmatpush1.bf16.msra.mxu1 %v1524_v33 }
  0x85   : > { %1062 = vmatpush1.bf16.msra.mxu0 %v1525_v34  ;;  %1012 = vmatprep.subr.bf16.mxu1 %v1526_v35 }
  0x86   : > { %1063 = vmatprep.subr.bf16.mxu0 %v1528_v36 }
  0x88   : > { %1013 = vmatpush1.bf16.msra.mxu1 %v1530_v37 }
  0x89   : > { %1064 = vmatpush1.bf16.msra.mxu0 %v1531_v38  ;;  %1014 = vmatprep.subr.bf16.mxu1 %v1532_v39  ;;  %v572_v38 = vld [vmem:[#allocation2 + $0x20] sm:$0xff] }
  0x8a   : > { %1065 = vmatprep.subr.bf16.mxu0 %v1534_v40 }
  0x8c   : > { %1015 = vmatpush1.bf16.msra.mxu1 %v1536_v41 }
  0x8d   : > { %1066 = vmatpush1.bf16.msra.mxu0 %v1537_v42  ;;  %1016 = vmatprep.subr.bf16.mxu1 %v1538_v43  ;;  %v573_v42 = vld [vmem:[#allocation2 + $0x28] sm:$0xff] }
  0x8e   : > { %1067 = vmatprep.subr.bf16.mxu0 %v1540_v44 }
  0x90   : > { %1017 = vmatpush1.bf16.msra.mxu1 %v1542_v45 }
  0x91   : > { %1068 = vmatpush1.bf16.msra.mxu0 %v1543_v46  ;;  %1018 = vmatprep.subr.bf16.mxu1 %v1544_v47 }
  0x92   : > { %1069 = vmatprep.subr.bf16.mxu0 %v1546_v48 }
  0x94   : > { %1019 = vmatpush1.bf16.msra.mxu1 %v1548_v49 }
  0x95   : > { %1070 = vmatpush1.bf16.msra.mxu0 %v1549_v50  ;;  %1020 = vmatprep.subr.bf16.mxu1 %v1550_v51  ;;  %v1124_v51 = vlaneseq (!%p1380_p5) }
  0x96   : > { %1071 = vmatprep.subr.bf16.mxu0 %v1552_v52 }
  0x97   : > { %v1125_v52 = vshrl.u32 (!%p1380_p5), %v1124_v51, 7 }
  0x98   : > { %1021 = vmatpush1.bf16.msra.mxu1 %v1554_v53  ;;  %v1122_v53 = vld [vmem:[%s554_s5] sm:$0x3] (!%p1380_p5) }
  0x99   : > { %1072 = vmatpush1.bf16.msra.mxu0 %v1555_v55  ;;  %1022 = vmatprep.subr.bf16.mxu1 %v1556_v56  ;;  %v1126_v55 = vsub.s32 (!%p1380_p5), 0, %v1125_v52  ;;  %v1130_v56 = vsub.s32 (!%p1380_p5), 1, %v1125_v52 }
  0x9a   : > { %1073 = vmatprep.subr.bf16.mxu0 %v1558_v57 }
  0x9c   : > { %1023 = vmatpush1.bf16.msra.mxu1 %v1560_v59 }
  0x9d   : > { %1074 = vmatpush1.bf16.msra.mxu0 %v1561_v60  ;;  %1024 = vmatprep.subr.bf16.mxu1 %v1562_v61  ;;  %v1127_v60 = vrot.slane (!%p1380_p5), %v1122_v53, %v1126_v55  ;;  %v1131_v61 = vrot.slane (!%p1380_p5), %v1122_v53, %v1130_v56 }
  0x9e   : > { %1075 = vmatprep.subr.bf16.mxu0 %v1564_v62 }
  0xa0   : > { %1025 = vmatpush1.bf16.msra.mxu1 %v1566_v63 }
  0xa1   : > { %1076 = vmatpush1.bf16.msra.mxu0 %v1567_v0  ;;  %1026 = vmatprep.subr.bf16.mxu1 %v1568_v1 }
  0xa2   : > { %1077 = vmatprep.subr.bf16.mxu0 %v1570_v2 }
  0xa4   : > { %1027 = vmatpush1.bf16.msra.mxu1 %v1572_v3 }
  0xa5   : > { %1078 = vmatpush1.bf16.msra.mxu0 %v1573_v4  ;;  %1028 = vmatprep.subr.bf16.mxu1 %v1574_v5 }
  0xa6   : > { %1079 = vmatprep.subr.bf16.mxu0 %v1576_v6 }
  0xa8   : > { %1029 = vmatpush1.bf16.msra.mxu1 %v1578_v7 }
  0xa9   : > { %1080 = vmatpush1.bf16.msra.mxu0 %v1579_v8 }
  0xab   : > { %1031 = vmatmul.mubr.bf16.vlgmr.msra.gmra.mrb[0].mxu1 %v1580_v11 }
  0xac   : > { %1082 = vmatmul.mubr.bf16.vlgmr.msra.gmra.mrb[0].mxu0 %v1583_v12  ;;  %1040 = vmatprep.mubr.bf16.mxu1 %v1313_v13 }
  0xad   : > { %1091 = vmatprep.mubr.bf16.mxu0 %v1315_v14 }
  0xb3   : > { %1041 = vmatmul.mubr.bf16.gmra.mrb[4].mxu1 %v1312_v15 }
  0xb4   : > { %1092 = vmatmul.mubr.bf16.gmra.mrb[4].mxu0 %v1314_v16 }
 0x17e   : > { %v1032_v17 = vpop.f32.mrb[0].mxu1 }
 0x17f   : > { %v1083_v19 = vpop.f32.mrb[0].mxu0  ;;  %v1034_v21 = vpop.f32.mrb[1].mxu1 }
 0x180   : > { %v1084_v20 = vadd.f32 %v1083_v19, %v1032_v17  ;;  %v1085_v23 = vpop.f32.mrb[1].mxu0  ;;  %v1036_v25 = vpop.f32.mrb[2].mxu1 }
 0x181   : > { %v1086_v24 = vadd.f32 %v1085_v23, %v1034_v21  ;;  %v1087_v27 = vpop.f32.mrb[2].mxu0  ;;  %v1038_v30 = vpop.f32.mrb[3].mxu1 }
 0x182   : > { %v1100_v28 = vadd.f32 %v1084_v20, %v568_v18  ;;  %v1088_v29 = vadd.f32 %v1087_v27, %v1036_v25  ;;  %v1089_v32 = vpop.f32.mrb[3].mxu0 }
 0x183   : > { %v1101_v33 = vadd.f32 %v1086_v24, %v569_v22  ;;  %v1090_v34 = vadd.f32 %v1089_v32, %v1038_v30 }
 0x184   : > { %1106 = vst [vmem:[#allocation2] sm:$0xff] %v1100_v28  ;;  %v1102_v35 = vadd.f32 %v1088_v29, %v570_v26 }
 0x185   : > { %1107 = vst [vmem:[#allocation2 + $0x8] sm:$0xff] %v1101_v33  ;;  %v1103_v36 = vadd.f32 %v1090_v34, %v571_v31 }
 0x186   : > { %1108 = vst [vmem:[#allocation2 + $0x10] sm:$0xff] %v1102_v35  ;;  %v1042_v37 = vpop.f32.mrb[4].mxu1 }
 0x187   : > { %1109 = vst [vmem:[#allocation2 + $0x18] sm:$0xff] %v1103_v36  ;;  %v1093_v39 = vpop.f32.mrb[4].mxu0  ;;  %v1044_v41 = vpop.f32.mrb[5].mxu1  ;;  %1115 = sbr.rel (%p1380_p5) target bundleno = 408 (0x198), region = 101 }
 0x188   : > { %v1094_v40 = vadd.f32 %v1093_v39, %v1042_v37  ;;  %v1095_v43 = vpop.f32.mrb[5].mxu0  ;;  %v1046_v45 = vpop.f32.mrb[6].mxu1 }
 0x189   : > { %v1096_v44 = vadd.f32 %v1095_v43, %v1044_v41  ;;  %v1097_v46 = vpop.f32.mrb[6].mxu0  ;;  %v1047_v48 = vpop.f32.mrb[7].mxu1 }
 0x18a   : > { %v1104_v47 = vadd.f32 %v1094_v40, %v572_v38  ;;  %v1098_v49 = vpop.f32.mrb[7].mxu0 }
 0x18b   : > { %v1105_v50 = vadd.f32 %v1096_v44, %v573_v42  ;;  %v1116_v54 = vld [vmem:[#allocation2] sm:$0xff] (!%p1380_p5) }
 0x18c   : > { %1110 = vst [vmem:[#allocation2 + $0x20] sm:$0xff] %v1104_v47  ;;  %v1117_v57 = vld [vmem:[#allocation2 + $0x8] sm:$0xff] (!%p1380_p5)  ;;  %v1134_v0 = vadd.f32 (!%p1380_p5), %v1127_v60, %v1116_v54 }
 0x18d   : > { %1111 = vst [vmem:[#allocation2 + $0x28] sm:$0xff] %v1105_v50  ;;  %v1118_v58 = vld [vmem:[#allocation2 + $0x10] sm:$0xff] (!%p1380_p5)  ;;  %v1135_v1 = vadd.f32 (!%p1380_p5), %v1131_v61, %v1117_v57 }
 0x18e   : > { %v1119_v59 = vld [vmem:[#allocation2 + $0x18] sm:$0xff]  ;;  %v1136_v2 = vadd.f32 %v1127_v60, %v1118_v58  ;;  %1140 = vst [vmem:[%s1961_s25] sm:$0xff] %v1134_v0 }
 0x18f   : > { %v1137_v3 = vadd.f32 %v1131_v61, %v1119_v59  ;;  %1141 = vst [vmem:[%s1961_s25 + $0x8] sm:$0xff] %v1135_v1 }
 0x190   : > { %1142 = vst [vmem:[%s1961_s25 + $0x10] sm:$0xff] %v1136_v2 }
 0x191   : > { %1143 = vst [vmem:[%s1961_s25 + $0x18] sm:$0xff] %v1137_v3 }
 0x193   : > { %v1120_v62 = vld [vmem:[#allocation2 + $0x20] sm:$0xff] }
 0x194   : > { %v1121_v63 = vld [vmem:[#allocation2 + $0x28] sm:$0xff]  ;;  %v1138_v4 = vadd.f32 %v1127_v60, %v1120_v62 }
 0x195   : > { %v1139_v5 = vadd.f32 %v1131_v61, %v1121_v63 }
 0x196   : > { %1144 = vst [vmem:[%s1961_s25 + $0x20] sm:$0xff] %v1138_v4 }
 0x197   : > { %1145 = vst [vmem:[%s1961_s25 + $0x28] sm:$0xff] %v1139_v5 }
 0x198 PF: > { %1152 = sbr.rel (!%p1793_p12) target bundleno = 417 (0x1a1), region = 105  ;;  %s1387_s14 = sshll.u32 (%p1793_p12), %s1664_s19, 4  ;;  %v1173_v7 = vld [vmem:[%s1961_s25 + $0x8] sm:$0xff] (%p1793_p12)  ;;  %v1175_v8 = vld [vmem:[%s1961_s25 + $0x10] sm:$0xff] (%p1793_p12)  ;;  %v1177_v9 = vld [vmem:[%s1961_s25 + $0x18] sm:$0xff] (%p1793_p12) }
 0x199   : > { %s1158_s23 = scalar_lea.vmem (%p1793_p12), %s2094_s3, %s1387_s14 }
 0x19a   : > { %1174 = vst [vmem:[%s1158_s23 + $0x8] sm:$0xff] (%p1793_p12), %v1173_v7  ;;  %1176 = vst [vmem:[%s1158_s23 + $0x20] sm:$0xff] (%p1793_p12), %v1175_v8 }
 0x19b   : > { %1178 = vst [vmem:[%s1158_s23 + $0x28] sm:$0xff] (%p1793_p12), %v1177_v9 }
 0x19d   : > { %v1179_v10 = vld [vmem:[%s1961_s25 + $0x20] sm:$0xff] (%p1793_p12) }
 0x19e   : > { %v1181_v11 = vld [vmem:[%s1961_s25 + $0x28] sm:$0xff] (%p1793_p12)  ;;  %1180 = vst [vmem:[%s1158_s23 + $0x40] sm:$0xff] (%p1793_p12), %v1179_v10 }
 0x19f   : > { %v1171_v6 = vld [vmem:[%s1961_s25] sm:$0xff]  ;;  %1182 = vst [vmem:[%s1158_s23 + $0x48] sm:$0xff] %v1181_v11 }
 0x1a0   : > { %1172 = vst [vmem:[%s1158_s23] sm:$0xff] %v1171_v6 }
 0x1a1 PF: > { %s13_s22 = sadd.s32 1, %s1676_s22   ;;  %s2104_s25 = sld [smem:[#allocation6_spill]] }
 0x1a2   : > { %p10_p6 = scmp.ge.s32.totalorder %s13_s22, 18   ;;  %s2105_s12 = smov %s1640_s13 }
 0x1a3   : > { %s2106_s13 = smov %s1791_s9  ;;  %s2107_s14 = smov %s1648_s15 }
 0x1a4   : > { %s2108_s15 = smov %s1788_s8  ;;  %s2109_s16 = smov %s1656_s17 }
 0x1a5   : > { %s2110_s17 = smov %s1774_s30  ;;  %s2111_s18 = smov %s1668_s20 }
 0x1a6   : > { %s2112_s19 = smov %s1672_s21  ;;  %s2113_s20 = smov %s2116_s24 }
 0x1a7   : > { %s2114_s21 = smov %s2104_s25  ;;  %12 = sbr.rel (!%p10_p6) target bundleno = 9 (0x9), region = 170 }

// kernel: patchgan_forward.20
= control target key start
LH: loop header
LB: loop body
LE: loop exit
PB: predicated region body
PF: predicated region fallthrough
CT: control target
= control target key end

     0   :  { %v28_v0 = vlaneseq  ;;  %s254_s1 = inlined_call_operand.vmem [shape: f32[1,512], index: 1, kind: input, shape index: {}]   ;;  %s255_s2 = inlined_call_operand.vmem [shape: f32[1,512], index: 2, kind: input, shape index: {}]   ;;  %s256_s0 = inlined_call_operand.vmem [shape: f32[24,512], index: 0, kind: input, shape index: {}]   ;;  %s257_s3 = inlined_call_operand.vmem [shape: f32[24,512], index: 3, kind: output, shape index: {}]  }
   0x1   :  { %v26_v2 = vld [vmem:[%s254_s1] sm:$0xf]  ;;  %v15_v6 = vld [vmem:[%s256_s0 + $0x8] sm:$0xff]  ;;  %v16_v10 = vld [vmem:[%s256_s0 + $0x10] sm:$0xff] }
   0x2   :  { %v29_v1 = vshrl.u32 %v28_v0, 7  ;;  %v60_v3 = vld [vmem:[%s255_s2] sm:$0xf]  ;;  %v19_v12 = vld [vmem:[%s256_s0 + $0x28] sm:$0xff]  ;;  %v17_v17 = vld [vmem:[%s256_s0 + $0x18] sm:$0xff] }
   0x3   :  { %v14_v4 = vld [vmem:[%s256_s0] sm:$0xff]  ;;  %v20_v18 = vld [vmem:[%s256_s0 + $0x30] sm:$0xff]  ;;  %v21_v19 = vld [vmem:[%s256_s0 + $0x38] sm:$0xff] }
   0x4   :  { %v30_v5 = vsub.s32 0, %v29_v1  ;;  %v34_v7 = vsub.s32 1, %v29_v1  ;;  %v38_v8 = vsub.s32 2, %v29_v1  ;;  %v42_v9 = vsub.s32 3, %v29_v1  ;;  %v18_v11 = vld [vmem:[%s256_s0 + $0x20] sm:$0xff]  ;;  %v23_v48 = vld [vmem:[%s256_s0 + $0x48] sm:$0xff] }
   0x5   :  { %v22_v47 = vld [vmem:[%s256_s0 + $0x40] sm:$0xff]  ;;  %v24_v52 = vld [vmem:[%s256_s0 + $0x50] sm:$0xff]  ;;  %v25_v53 = vld [vmem:[%s256_s0 + $0x58] sm:$0xff] }
   0x6   :  { %v31_v13 = vrot.slane %v26_v2, %v30_v5  ;;  %v187_v14 = vrot.slane %v60_v3, %v30_v5  ;;  %v35_v15 = vrot.slane %v26_v2, %v34_v7  ;;  %v189_v16 = vrot.slane %v60_v3, %v34_v7 }
   0x7   :  { %v39_v20 = vrot.slane %v26_v2, %v38_v8  ;;  %v73_v21 = vrot.slane %v60_v3, %v38_v8  ;;  %v43_v22 = vrot.slane %v26_v2, %v42_v9  ;;  %v77_v23 = vrot.slane %v60_v3, %v42_v9 }
   0x8   :  { %v48_v24 = vmul.f32 %v31_v13, %v14_v4  ;;  %v49_v25 = vmul.f32 %v35_v15, %v15_v6  ;;  %v52_v26 = vmul.f32 %v31_v13, %v18_v11  ;;  %v53_v27 = vmul.f32 %v35_v15, %v19_v12 }
   0x9   :  { %v50_v28 = vmul.f32 %v39_v20, %v16_v10  ;;  %v51_v29 = vmul.f32 %v43_v22, %v17_v17  ;;  %v54_v30 = vmul.f32 %v39_v20, %v20_v18  ;;  %v55_v31 = vmul.f32 %v43_v22, %v21_v19 }
   0xa   :  { %v82_v32 = vadd.f32 %v187_v14, %v48_v24  ;;  %v83_v33 = vadd.f32 %v189_v16, %v49_v25  ;;  %v86_v34 = vadd.f32 %v187_v14, %v52_v26  ;;  %v87_v35 = vadd.f32 %v189_v16, %v53_v27 }
   0xb   :  { %v84_v36 = vadd.f32 %v73_v21, %v50_v28  ;;  %v85_v37 = vadd.f32 %v77_v23, %v51_v29  ;;  %v88_v38 = vadd.f32 %v73_v21, %v54_v30  ;;  %v89_v39 = vadd.f32 %v77_v23, %v55_v31 }
   0xc   :  { %vm94_vm0 = vcmp.ge.f32.partialorder %v82_v32, 0.0  ;;  %v106_v40 = vmul.f32 0.2, %v82_v32  ;;  %vm95_vm1 = vcmp.ge.f32.partialorder %v83_v33, 0.0  ;;  %v107_v41 = vmul.f32 0.2, %v83_v33 }
   0xd   :  { %vm96_vm2 = vcmp.ge.f32.partialorder %v84_v36, 0.0  ;;  %v108_v42 = vmul.f32 0.2, %v84_v36  ;;  %vm97_vm3 = vcmp.ge.f32.partialorder %v85_v37, 0.0  ;;  %v109_v43 = vmul.f32 0.2, %v85_v37 }
   0xe   :  { %v118_v44 = vsel %vm94_vm0, %v82_v32, %v106_v40  ;;  %v119_v45 = vsel %vm95_vm1, %v83_v33, %v107_v41  ;;  %vm98_vm4 = vcmp.ge.f32.partialorder %v86_v34, 0.0  ;;  %v110_v46 = vmul.f32 0.2, %v86_v34 }
   0xf   :  { %130 = vst [vmem:[%s257_s3] sm:$0xff] %v118_v44  ;;  %131 = vst [vmem:[%s257_s3 + $0x8] sm:$0xff] %v119_v45  ;;  %v120_v49 = vsel %vm96_vm2, %v84_v36, %v108_v42  ;;  %v121_v50 = vsel %vm97_vm3, %v85_v37, %v109_v43  ;;  %vm99_vm5 = vcmp.ge.f32.partialorder %v87_v35, 0.0  ;;  %v111_v51 = vmul.f32 0.2, %v87_v35 }
  0x10   :  { %132 = vst [vmem:[%s257_s3 + $0x10] sm:$0xff] %v120_v49  ;;  %133 = vst [vmem:[%s257_s3 + $0x18] sm:$0xff] %v121_v50  ;;  %v122_v54 = vsel %vm98_vm4, %v86_v34, %v110_v46  ;;  %vm100_vm6 = vcmp.ge.f32.partialorder %v88_v38, 0.0  ;;  %v112_v55 = vmul.f32 0.2, %v88_v38  ;;  %vm101_vm7 = vcmp.ge.f32.partialorder %v89_v39, 0.0 }
  0x11   :  { %134 = vst [vmem:[%s257_s3 + $0x20] sm:$0xff] %v122_v54  ;;  %v123_v56 = vsel %vm99_vm5, %v87_v35, %v111_v51  ;;  %v113_v57 = vmul.f32 0.2, %v89_v39  ;;  %v56_v58 = vmul.f32 %v31_v13, %v22_v47  ;;  %v57_v59 = vmul.f32 %v35_v15, %v23_v48 }
  0x12   :  { %135 = vst [vmem:[%s257_s3 + $0x28] sm:$0xff] %v123_v56  ;;  %v124_v60 = vsel %vm100_vm6, %v88_v38, %v112_v55  ;;  %v58_v61 = vmul.f32 %v39_v20, %v24_v52  ;;  %v59_v62 = vmul.f32 %v43_v22, %v25_v53 }
  0x13   :  { %136 = vst [vmem:[%s257_s3 + $0x30] sm:$0xff] %v124_v60  ;;  %v125_v63 = vsel %vm101_vm7, %v89_v39, %v113_v57  ;;  %v90_v0 = vadd.f32 %v187_v14, %v56_v58  ;;  %v91_v1 = vadd.f32 %v189_v16, %v57_v59 }
  0x14   :  { %137 = vst [vmem:[%s257_s3 + $0x38] sm:$0xff] %v125_v63  ;;  %v92_v2 = vadd.f32 %v73_v21, %v58_v61  ;;  %v93_v3 = vadd.f32 %v77_v23, %v59_v62 }
  0x15   :  { %vm102_vm8 = vcmp.ge.f32.partialorder %v90_v0, 0.0  ;;  %v114_v4 = vmul.f32 0.2, %v90_v0  ;;  %vm103_vm9 = vcmp.ge.f32.partialorder %v91_v1, 0.0  ;;  %v115_v5 = vmul.f32 0.2, %v91_v1 }
  0x16   :  { %vm104_vm10 = vcmp.ge.f32.partialorder %v92_v2, 0.0  ;;  %v116_v6 = vmul.f32 0.2, %v92_v2  ;;  %vm105_vm11 = vcmp.ge.f32.partialorder %v93_v3, 0.0  ;;  %v117_v7 = vmul.f32 0.2, %v93_v3 }
  0x17   :  { %v126_v8 = vsel %vm102_vm8, %v90_v0, %v114_v4  ;;  %v127_v9 = vsel %vm103_vm9, %v91_v1, %v115_v5 }
  0x18   :  { %138 = vst [vmem:[%s257_s3 + $0x40] sm:$0xff] %v126_v8  ;;  %139 = vst [vmem:[%s257_s3 + $0x48] sm:$0xff] %v127_v9  ;;  %v128_v10 = vsel %vm104_vm10, %v92_v2, %v116_v6  ;;  %v129_v11 = vsel %vm105_vm11, %v93_v3, %v117_v7 }
  0x19   :  { %140 = vst [vmem:[%s257_s3 + $0x50] sm:$0xff] %v128_v10  ;;  %141 = vst [vmem:[%s257_s3 + $0x58] sm:$0xff] %v129_v11 }

// kernel: patchgan_forward.21
= control target key start
LH: loop header
LB: loop body
LE: loop exit
PB: predicated region body
PF: predicated region fallthrough
CT: control target
= control target key end

     0   :  { %s951_s12 = smov 0   ;;  %s953_s13 = smov 0   ;;  %s1034_s0 = inlined_call_operand.vmem [shape: bf16[8,8192], index: 0, kind: input, shape index: {}]   ;;  %s1035_s1 = inlined_call_operand.vmem [shape: bf16[8192,128], index: 1, kind: input, shape index: {}]   ;;  %s1036_s2 = inlined_call_operand.vmem [shape: f32[1,128], index: 2, kind: input, shape index: {}]   ;;  %s1037_s3 = inlined_call_operand.vmem [shape: f32[8,128], index: 3, kind: output, shape index: {}]  }
   0x1   :  { %s955_s14 = smov 0  }
   0x2 LB: > { %s25_s15 = sadd.s32 1, %s924_s13  ;;  %p749_p0 = scmp.ge.s32.totalorder %s928_s14, 1  ;;  %s928_s14 = sphi %s955_s14, %s13_s14   ;;  %s924_s13 = sphi %s953_s13, %s1039_s13   ;;  %s920_s12 = sphi %s951_s12, %s1038_s12  }
   0x3   : > { %p26_p1 = scmp.ge.s32.totalorder %s25_s15, 16  ;;  %p189_p2 = scmp.lt.s32.totalorder %s928_s14, 17 }
   0x5   : > { %s1041_s15 = smov (%p26_p1, %s25_s15), 0  ;;  %p190_p3 = pnand %p749_p0, %p189_p2 }
   0x6   : > { %s750_s16 = sshll.u32 (!%p190_p3), %s920_s12, 2  ;;  %s752_s17 = sshll.u32 (!%p190_p3), %s920_s12, 6 }
   0x7   : > { %193 = sbr.rel (%p190_p3) target bundleno = 315 (0x13b), region = 32  ;;  %p233_p4 = scmp.lt.s32.totalorder (!%p190_p3), %s750_s16, 63 }
   0x8   : > { %p241_p5 = scmp.lt.s32.totalorder (!%p190_p3), %s752_s17, 1023  ;;  %p754_p6 = scmp.ne.s32.totalorder (!%p190_p3), %s920_s12, 0 }
   0xe   : > { %s1043_s16 = smov (!%p233_p4, %s750_s16), 63  ;;  %s1045_s17 = smov (!%p241_p5, %s752_s17), 1023 }
   0xf   : > { %s751_s18 = sshll.u32 %s1043_s16, 2  ;;  %s753_s22 = sshll.u32 %s1045_s17, 2  ;;  %v930_v0 = vmov (!%p754_p6), 0.0  }
  0x10   : > { %s976_s21 = scalar_lea.vmem %s1034_s0, %s751_s18  ;;  %s981_s25 = scalar_lea.vmem %s1035_s1, %s753_s22  ;;  %264 = vst [vmem:[#allocation2] sm:$0xff] (!%p754_p6), %v930_v0 }
  0x11   : > { %263 = sbr.rel (%p754_p6) target bundleno = 24 (0x18), region = 36 }
  0x18 PF: > { %v866_v1 = vld [vmem:[%s981_s25 + $0x40] sm:$0xff]   ;;  %v870_v5 = vld [vmem:[%s981_s25 + $0x48] sm:$0xff]   ;;  %v874_v9 = vld [vmem:[%s981_s25 + $0x50] sm:$0xff]   ;;  %p791_p7 = scmp.ne.s32.totalorder %s920_s12, 15 }
  0x19   : > { %v867_v2 = vld [vmem:[%s981_s25 + $0xc0] sm:$0xff]   ;;  %797 = vmatprep.subr.bf16.mxu0 %v866_v1  ;;  %v871_v6 = vld [vmem:[%s981_s25 + $0xc8] sm:$0xff]   ;;  %v875_v10 = vld [vmem:[%s981_s25 + $0xd0] sm:$0xff]  }
  0x1a   : > { %v868_v3 = vld [vmem:[%s981_s25] sm:$0xff]   ;;  %819 = vmatprep.subr.bf16.mxu1 %v867_v2  ;;  %v872_v7 = vld [vmem:[%s981_s25 + $0x8] sm:$0xff]   ;;  %v876_v11 = vld [vmem:[%s981_s25 + $0x10] sm:$0xff]  }
  0x1b   : > { %v869_v4 = vld [vmem:[%s981_s25 + $0x80] sm:$0xff]   ;;  %798 = vmatpush3.bf16.msra.mxu0 %v868_v3  ;;  %v873_v8 = vld [vmem:[%s981_s25 + $0x88] sm:$0xff]   ;;  %v877_v12 = vld [vmem:[%s981_s25 + $0x90] sm:$0xff]  }
  0x1c   : > { %820 = vmatpush3.bf16.msra.mxu1 %v869_v4  ;;  %799 = vmatprep.subr.bf16.mxu0 %v870_v5  ;;  %v878_v13 = vld [vmem:[%s981_s25 + $0x58] sm:$0xff]   ;;  %v882_v17 = vld [vmem:[%s981_s25 + $0x60] sm:$0xff]   ;;  %v886_v21 = vld [vmem:[%s981_s25 + $0x68] sm:$0xff]  }
  0x1d   : > { %821 = vmatprep.subr.bf16.mxu1 %v871_v6  ;;  %v879_v14 = vld [vmem:[%s981_s25 + $0xd8] sm:$0xff]   ;;  %v883_v18 = vld [vmem:[%s981_s25 + $0xe0] sm:$0xff]   ;;  %v887_v22 = vld [vmem:[%s981_s25 + $0xe8] sm:$0xff]  }
  0x1e   : > { %v880_v15 = vld [vmem:[%s981_s25 + $0x18] sm:$0xff]   ;;  %v884_v19 = vld [vmem:[%s981_s25 + $0x20] sm:$0xff]   ;;  %v888_v23 = vld [vmem:[%s981_s25 + $0x28] sm:$0xff]  }
  0x1f   : > { %800 = vmatpush3.bf16.msra.mxu0 %v872_v7  ;;  %v881_v16 = vld [vmem:[%s981_s25 + $0x98] sm:$0xff]   ;;  %v885_v20 = vld [vmem:[%s981_s25 + $0xa0] sm:$0xff]   ;;  %v889_v24 = vld [vmem:[%s981_s25 + $0xa8] sm:$0xff]  }
  0x20   : > { %822 = vmatpush3.bf16.msra.mxu1 %v873_v8  ;;  %801 = vmatprep.subr.bf16.mxu0 %v874_v9  ;;  %v890_v25 = vld [vmem:[%s981_s25 + $0x70] sm:$0xff]   ;;  %v894_v29 = vld [vmem:[%s981_s25 + $0x78] sm:$0xff]   ;;  %v266_v33 = vld [vmem:[%s976_s21] sm:$0xff] }
  0x21   : > { %823 = vmatprep.subr.bf16.mxu1 %v875_v10  ;;  %v891_v26 = vld [vmem:[%s981_s25 + $0xf0] sm:$0xff]   ;;  %v895_v30 = vld [vmem:[%s981_s25 + $0xf8] sm:$0xff]   ;;  %v267_v34 = vld [vmem:[%s976_s21 + $0x8] sm:$0xff]  ;;  %v755_v35 = vcombine.low %v266_v33, %v266_v33  ;;  %v756_v36 = vcombine.high %v266_v33, %v266_v33 }
  0x22   : > { %v892_v27 = vld [vmem:[%s981_s25 + $0x30] sm:$0xff]   ;;  %v896_v31 = vld [vmem:[%s981_s25 + $0x38] sm:$0xff]   ;;  %v757_v37 = vcombine.low %v267_v34, %v267_v34  ;;  %v758_v38 = vcombine.high %v267_v34, %v267_v34  ;;  %v265_v47 = vld [vmem:[#allocation2] sm:$0xff] }
  0x23   : > { %802 = vmatpush3.bf16.msra.mxu0 %v876_v11  ;;  %v893_v28 = vld [vmem:[%s981_s25 + $0xb0] sm:$0xff]   ;;  %v897_v32 = vld [vmem:[%s981_s25 + $0xb8] sm:$0xff]   ;;  %570 = vmatprep.mubr.bf16.mxu0 %v756_v36  ;;  %v792_v53 = vld [vmem:[%s1036_s2] ss:$0 sm:$0xff] (!%p791_p7) }
  0x24   : > { %824 = vmatpush3.bf16.msra.mxu1 %v877_v12  ;;  %803 = vmatprep.subr.bf16.mxu0 %v878_v13 }
  0x25   : > { %825 = vmatprep.subr.bf16.mxu1 %v879_v14  ;;  %610 = vmatprep.mubr.bf16.mxu1 %v758_v38 }
  0x27   : > { %804 = vmatpush3.bf16.msra.mxu0 %v880_v15 }
  0x28   : > { %826 = vmatpush3.bf16.msra.mxu1 %v881_v16  ;;  %805 = vmatprep.subr.bf16.mxu0 %v882_v17 }
  0x29   : > { %827 = vmatprep.subr.bf16.mxu1 %v883_v18 }
  0x2b   : > { %806 = vmatpush3.bf16.msra.mxu0 %v884_v19 }
  0x2c   : > { %828 = vmatpush3.bf16.msra.mxu1 %v885_v20  ;;  %807 = vmatprep.subr.bf16.mxu0 %v886_v21 }
  0x2d   : > { %829 = vmatprep.subr.bf16.mxu1 %v887_v22 }
  0x2f   : > { %808 = vmatpush3.bf16.msra.mxu0 %v888_v23 }
  0x30   : > { %830 = vmatpush3.bf16.msra.mxu1 %v889_v24  ;;  %809 = vmatprep.subr.bf16.mxu0 %v890_v25 }
  0x31   : > { %831 = vmatprep.subr.bf16.mxu1 %v891_v26 }
  0x33   : > { %810 = vmatpush3.bf16.msra.mxu0 %v892_v27 }
  0x34   : > { %832 = vmatpush3.bf16.msra.mxu1 %v893_v28  ;;  %811 = vmatprep.subr.bf16.mxu0 %v894_v29 }
  0x35   : > { %833 = vmatprep.subr.bf16.mxu1 %v895_v30 }
  0x37   : > { %812 = vmatpush3.bf16.msra.mxu0 %v896_v31 }
  0x38   : > { %834 = vmatpush3.bf16.msra.mxu1 %v897_v32 }
  0x3a   : > { %571 = vmatmul.mubr.bf16.vlgmr.msra.gmra.mrb[0].mxu0 %v755_v35 }
  0x3b   : > { %611 = vmatmul.mubr.bf16.vlgmr.msra.gmra.mrb[0].mxu1 %v757_v37 }
 0x10d   : > { %v813_v39 = vpop.f32.mrb[0].mxu0 }
 0x10e   : > { %v835_v40 = vpop.f32.mrb[0].mxu1  ;;  %v814_v41 = vpop.f32.mrb[1].mxu0 }
 0x10f   : > { %v836_v42 = vpop.f32.mrb[1].mxu1  ;;  %v815_v43 = vadd.f32 %v814_v41, %v813_v39  ;;  %v816_v45 = vpop.f32.mrb[2].mxu0 }
 0x110   : > { %v837_v44 = vadd.f32 %v836_v42, %v835_v40  ;;  %v838_v46 = vpop.f32.mrb[2].mxu1  ;;  %v817_v48 = vpop.f32.mrb[3].mxu0  ;;  %623 = sbr.rel (%p791_p7) target bundleno = 315 (0x13b), region = 40 }
 0x111   : > { %v839_v49 = vpop.f32.mrb[3].mxu1 }
 0x112   : > { %v613_v50 = vadd.f32 %v837_v44, %v815_v43 }
 0x114   : > { %v618_v51 = vadd.f32 %v613_v50, %v265_v47 }
 0x116   : > { %619 = vst [vmem:[#allocation2] sm:$0xff] %v618_v51 }
 0x11d   : > { %v624_v52 = vld [vmem:[#allocation2] sm:$0xff] }
 0x11e   : > { %v632_v54 = vadd.f32 %v792_v53, %v624_v52 }
 0x120   : > { %v793_v55 = vmul.f32 -1.442695, %v632_v54 }
 0x122   : > { %902 = vpow2.f32 %v793_v55 }
 0x12c   : > { %v903_v56 = vpop.eup %902 }
 0x12d   : > { %v636_v57 = vadd.f32 1.0, %v903_v56 }
 0x12f   : > { %904 = vrcp.f32 %v636_v57 }
 0x139   : > { %v905_v58 = vpop.eup %904 }
 0x13a   : > { %639 = vst [vmem:[%s1037_s3] sm:$0xff] %v905_v58 }
 0x13b PF: > { %s13_s14 = sadd.s32 1, %s928_s14   ;;  %s1038_s12 = smov %s924_s13 }
 0x13c   : > { %p10_p8 = scmp.ge.s32.totalorder %s13_s14, 18   ;;  %s1039_s13 = smov %s1041_s15 }
 0x13e   :  { %12 = sbr.rel (!%p10_p8) target bundleno = 2 (0x2), region = 76 }

</bundles_post_ra>
